<compile_context>
chip_gen: v7x
topology: tpu7x:2x2x1
jax: 0.10.0
libtpu: 0.0.40
codegen_flags: <defaults>
</compile_context>

<pallas_src>
import jax
import jax.numpy as jnp
from jax import lax
from jax.experimental import pallas as pl
from jax.experimental.pallas import tpu as pltpu

# ------------------------- configuration (module hyper-params) -------------------------
DEDX_HIDDEN = 32     # dedx_hidden_size
DEDX_LAYERS = 2      # dedx_num_layers (GRU)
LSTM_HIDDEN = 32     # lstm_hidden_size
LSTM_LAYERS = 1      # lstm_num_layers
ADJ_SCALE = 0.1      # adjustment_scale
B = 8                # batch
T = 12               # padded sequence length

GP = 128             # one 128-lane vreg block per gate (vreg-aligned gate slices)
GW = 3 * GP          # packed gate width per layer: GRU (r|z|n), adjust-LSTM (i|g|o)


# ----------------------------------- Pallas kernel -------------------------------------
def lstm_v2b_kernel(seq_ref, mask_ref, extras_ref, wrec_ref, wih1_ref, p_ref,
                    out_ref, gx0_ref):
    H = DEDX_HIDDEN
    Tn = seq_ref.shape[0]
    Bn = seq_ref.shape[1]

    # ---- hoist loop-invariant parameters out of the recurrence ----
    W_rec = wrec_ref[...]             # (2H, 2*GW) block-diag [Whh0 | Whh1], gate-padded
    W_ih1 = wih1_ref[...]             # (H, GW)
    bhh   = p_ref[3:4, :]             # (1, 2*GW)  [bhh0 | bhh1]
    bih1  = p_ref[2:3, 0:GW]          # (1, GW)

    # ---- precompute layer-0 input contribution for ALL timesteps (off the serial path) ----
    wih0 = p_ref[0:1, 0:GW]
    bih0 = p_ref[1:2, 0:GW]
    gx0_ref[...] = seq_ref[...] * wih0[None, :, :] + bih0[None, :, :]   # (T, B, GW)

    def step(t, hcat):                # hcat: (B, 2H) = [h1 | h2]
        # one fused block-diagonal recurrent matmul for both GRU layers
        gh = jnp.dot(hcat, W_rec, preferred_element_type=jnp.float32) + bhh   # (B, 2*GW)
        gx0 = gx0_ref[t]                                                      # (B, GW)
        h1_old = hcat[:, 0:H]
        h2_old = hcat[:, H:2 * H]

        # GRU layer 0 (all gate slices are 128-lane aligned; pad lanes stay exactly 0)
        r0 = jax.nn.sigmoid(gx0[:, 0:GP] + gh[:, 0:GP])
        z0 = jax.nn.sigmoid(gx0[:, GP:2 * GP] + gh[:, GP:2 * GP])
        n0 = jnp.tanh(gx0[:, 2 * GP:3 * GP] + r0 * gh[:, 2 * GP:3 * GP])
        h1n = (1.0 - z0[:, 0:H]) * n0[:, 0:H] + z0[:, 0:H] * h1_old           # (B, H)

        # GRU layer 1 (input = freshly computed layer-0 hidden)
        gx1 = jnp.dot(h1n, W_ih1, preferred_element_type=jnp.float32) + bih1  # (B, GW)
        r1 = jax.nn.sigmoid(gx1[:, 0:GP] + gh[:, GW:GW + GP])
        z1 = jax.nn.sigmoid(gx1[:, GP:2 * GP] + gh[:, GW + GP:GW + 2 * GP])
        n1 = jnp.tanh(gx1[:, 2 * GP:3 * GP] + r1 * gh[:, GW + 2 * GP:GW + 3 * GP])
        h2n = (1.0 - z1[:, 0:H]) * n1[:, 0:H] + z1[:, 0:H] * h2_old           # (B, H)

        # pack_padded_sequence semantics: freeze hidden past each sequence's length
        hnew = jnp.concatenate([h1n, h2n], axis=-1)                           # (B, 2H)
        m = mask_ref[t]                                                       # (B, 1) float {0,1}
        return hcat + m * (hnew - hcat)

    hcat0 = jnp.zeros((Bn, 2 * H), jnp.float32)
    hcat = lax.fori_loop(0, Tn, step, hcat0, unroll=True)

    # ---- dedx_fc -> dropout (identity in eval) -> ReLU ----
    h2 = hcat[:, H:2 * H]
    fc_w = p_ref[8:9, 0:H]
    fc_b = p_ref[10:11, 0:1]
    dedx_pred = jnp.maximum(
        jnp.sum(h2 * fc_w, axis=1, keepdims=True) + fc_b, 0.0)               # (B, 1)

    # ---- adjust_lstm: single step, h0 = c0 = 0, so only the i/g/o input gates matter
    # (the W_hh @ h0 term is exactly zero; the forget gate is irrelevant since c0 == 0).
    lw_p  = p_ref[4:5, 0:GW]
    lw_e0 = p_ref[5:6, 0:GW]
    lw_e1 = p_ref[6:7, 0:GW]
    lb    = p_ref[7:8, 0:GW]
    gates = (dedx_pred * lw_p + extras_ref[:, 0:1] * lw_e0
             + extras_ref[:, 1:2] * lw_e1 + lb)                               # (B, GW)
    i_g = jax.nn.sigmoid(gates[:, 0:GP])
    g_g = jnp.tanh(gates[:, GP:2 * GP])
    o_g = jax.nn.sigmoid(gates[:, 2 * GP:3 * GP])
    h_lstm = o_g * jnp.tanh(i_g * g_g)                                        # (B, GP)

    afc_w = p_ref[9:10, 0:GP]
    afc_b = p_ref[11:12, 0:1]
    adjustment = jnp.sum(h_lstm * afc_w, axis=1, keepdims=True) + afc_b       # (B, 1)
    out_ref[...] = dedx_pred + ADJ_SCALE * adjustment


# ------------------------------ host-side operand packing -------------------------------
def _pad_gru_gates(w, h):
    """(in_dim, 3*h) r|z|n  ->  (in_dim, GW) with each gate in its own 128-lane block."""
    out = jnp.zeros((w.shape[0], GW), jnp.float32)
    for g in range(3):
        out = out.at[:, g * GP:g * GP + h].set(w[:, g * h:(g + 1) * h])
    return out


def _pack_params(params):
    H, LH = DEDX_HIDDEN, LSTM_HIDDEN

    whh0 = _pad_gru_gates(params['gru_whh0_T'], H)          # (H, GW)
    whh1 = _pad_gru_gates(params['gru_whh1_T'], H)          # (H, GW)
    W_rec = jnp.zeros((2 * H, 2 * GW), jnp.float32)         # block-diag recurrent weight
    W_rec = W_rec.at[0:H, 0:GW].set(whh0)
    W_rec = W_rec.at[H:2 * H, GW:2 * GW].set(whh1)
    W_ih1 = _pad_gru_gates(params['gru_wih1_T'], H)         # (H, GW)

    def pack_igo(w):   # (rows, 4*LH) i|f|g|o  ->  (rows, GW) i|g|o in 128-lane blocks
        out = jnp.zeros((w.shape[0], GW), jnp.float32)
        out = out.at[:, 0:LH].set(w[:, 0:LH])                       # i
        out = out.at[:, GP:GP + LH].set(w[:, 2 * LH:3 * LH])        # g
        out = out.at[:, 2 * GP:2 * GP + LH].set(w[:, 3 * LH:4 * LH])  # o
        return out

    P = jnp.zeros((16, 2 * GW), jnp.float32)                # single small-params blob
    P = P.at[0, 0:GW].set(_pad_gru_gates(params['gru_wih0_T'], H)[0])
    P = P.at[1, 0:GW].set(_pad_gru_gates(params['gru_bih0'], H)[0])
    P = P.at[2, 0:GW].set(_pad_gru_gates(params['gru_bih1'], H)[0])
    P = P.at[3, 0:GW].set(_pad_gru_gates(params['gru_bhh0'], H)[0])
    P = P.at[3, GW:2 * GW].set(_pad_gru_gates(params['gru_bhh1'], H)[0])
    P = P.at[4:7, 0:GW].set(pack_igo(params['lstm_wih_T']))
    P = P.at[7, 0:GW].set(pack_igo(params['lstm_bih'] + params['lstm_bhh'])[0])
    P = P.at[8, 0:H].set(params['fc_w'][0])
    P = P.at[9, 0:LH].set(params['afc_w'][0])
    P = P.at[10, 0].set(params['fc_b'][0, 0])
    P = P.at[11, 0].set(params['afc_b'][0, 0])
    return W_rec, W_ih1, P


# ------------------------------------ host wrapper --------------------------------------
def lstm_v2b_forward(dedx_seq, lengths, extras, params):
    Bn, Tn, _ = dedx_seq.shape
    seq_tb = jnp.transpose(dedx_seq, (1, 0, 2)).astype(jnp.float32)      # (T, B, 1) time-major
    # pack_padded_sequence semantics -> per-timestep validity mask (T, B, 1)
    mask = (jnp.arange(Tn, dtype=jnp.int32)[:, None]
            < lengths.astype(jnp.int32)[None, :]).astype(jnp.float32)[:, :, None]
    W_rec, W_ih1, P = _pack_params(params)

    args = (seq_tb, mask, extras.astype(jnp.float32), W_rec, W_ih1, P)
    vmem = pl.BlockSpec(memory_space=pltpu.MemorySpace.VMEM)
    return pl.pallas_call(
        lstm_v2b_kernel,
        out_shape=jax.ShapeDtypeStruct((Bn, 1), jnp.float32),
        in_specs=[vmem] * len(args),
        out_specs=vmem,
        scratch_shapes=[pltpu.VMEM((Tn, Bn, GW), jnp.float32)],   # precomputed gx0, all steps
    )(*args)


# ------------------------------ deterministic parameter init ----------------------------
def init_params(key):
    H, LH = DEDX_HIDDEN, LSTM_HIDDEN
    ks = jax.random.split(key, 16)
    sH = 1.0 / (H ** 0.5)
    sLH = 1.0 / (LH ** 0.5)

    def u(k, shape, s):
        return jax.random.uniform(k, shape, jnp.float32, -s, s)

    return {
        # GRU layer 0  (input_size = 1) — weights stored transposed (in, 3H)
        'gru_wih0_T': u(ks[0], (1, 3 * H), sH),
        'gru_whh0_T': u(ks[1], (H, 3 * H), sH),
        'gru_bih0':   u(ks[2], (1, 3 * H), sH),
        'gru_bhh0':   u(ks[3], (1, 3 * H), sH),
        # GRU layer 1  (input_size = H)
        'gru_wih1_T': u(ks[4], (H, 3 * H), sH),
        'gru_whh1_T': u(ks[5], (H, 3 * H), sH),
        'gru_bih1':   u(ks[6], (1, 3 * H), sH),
        'gru_bhh1':   u(ks[7], (1, 3 * H), sH),
        # dedx_fc : Linear(H, 1)  (PyTorch weight shape (1, H))
        'fc_w': u(ks[8], (1, H), sH),
        'fc_b': u(ks[9], (1, 1), sH),
        # adjust_lstm (input_size = 3) — weight stored transposed (3, 4*LH); W_hh unused (h0 = 0)
        'lstm_wih_T': u(ks[10], (3, 4 * LH), sLH),
        'lstm_bih':   u(ks[11], (1, 4 * LH), sLH),
        'lstm_bhh':   u(ks[12], (1, 4 * LH), sLH),
        # adjust_fc : Linear(LH, 1)
        'afc_w': u(ks[13], (1, LH), sLH),
        'afc_b': u(ks[14], (1, 1), sLH),
    }


# ----------------------------------- pure-JAX reference ---------------------------------
def reference_forward(dedx_seq, lengths, extras, params):
    H, LH = DEDX_HIDDEN, LSTM_HIDDEN
    Bn, Tn, _ = dedx_seq.shape

    def gru_cell(gx, h, whh_T, bhh):
        gh = h @ whh_T + bhh
        r = jax.nn.sigmoid(gx[:, :H] + gh[:, :H])
        z = jax.nn.sigmoid(gx[:, H:2 * H] + gh[:, H:2 * H])
        n = jnp.tanh(gx[:, 2 * H:] + r * gh[:, 2 * H:])
        return (1.0 - z) * n + z * h

    h1 = jnp.zeros((Bn, H), jnp.float32)
    h2 = jnp.zeros((Bn, H), jnp.float32)
    lens = lengths.reshape(Bn, 1)
    for t in range(Tn):
        x = dedx_seq[:, t, :]
        gx0 = x * params['gru_wih0_T'] + params['gru_bih0']
        h1n = gru_cell(gx0, h1, params['gru_whh0_T'], params['gru_bhh0'])
        gx1 = h1n @ params['gru_wih1_T'] + params['gru_bih1']
        h2n = gru_cell(gx1, h2, params['gru_whh1_T'], params['gru_bhh1'])
        mask = lens > t
        h1 = jnp.where(mask, h1n, h1)
        h2 = jnp.where(mask, h2n, h2)

    dedx_pred = jnp.maximum(h2 @ params['fc_w'].T + params['fc_b'], 0.0)
    combined = jnp.concatenate([dedx_pred, extras], axis=1)         # (B, 3)
    gates = combined @ params['lstm_wih_T'] + params['lstm_bih'] + params['lstm_bhh']
    i_g = jax.nn.sigmoid(gates[:, :LH])
    g_g = jnp.tanh(gates[:, 2 * LH:3 * LH])
    o_g = jax.nn.sigmoid(gates[:, 3 * LH:])
    h_lstm = o_g * jnp.tanh(i_g * g_g)
    adjustment = h_lstm @ params['afc_w'].T + params['afc_b']
    return dedx_pred + ADJ_SCALE * adjustment


# ---------------------------------------- main -------------------------------------------
if __name__ == "__main__":
    key = jax.random.PRNGKey(0)
    kp, kx, kl, ke = jax.random.split(key, 4)

    params = init_params(kp)
    dedx_seq = jax.random.normal(kx, (B, T, 1), jnp.float32)
    lengths = jax.random.randint(kl, (B,), 1, T + 1, jnp.int32)     # valid lengths >= 1
    extras = jax.random.normal(ke, (B, 2), jnp.float32)

    out = jax.jit(lstm_v2b_forward)(dedx_seq, lengths, extras, params)
    out = jax.block_until_ready(out)

    ref = reference_forward(dedx_seq, lengths, extras, params)
    assert out.shape == (B, 1)
    assert jnp.allclose(out, ref, atol=1e-4, rtol=1e-4), (out, ref)
    print("KERNEL_OK")
</pallas_src>

<mosaic_0001>
module attributes {stable_mosaic.version = 11 : i64} {
  func.func @lstm_v2b_kernel(%arg0: memref<12x8x1xf32, #tpu.memory_space<vmem>>, %arg1: memref<12x8x1xf32, #tpu.memory_space<vmem>>, %arg2: memref<8x2xf32, #tpu.memory_space<vmem>>, %arg3: memref<64x768xf32, #tpu.memory_space<vmem>>, %arg4: memref<32x384xf32, #tpu.memory_space<vmem>>, %arg5: memref<16x768xf32, #tpu.memory_space<vmem>>, %arg6: memref<8x1xf32, #tpu.memory_space<vmem>>, %arg7: memref<12x8x384xf32, #tpu.memory_space<vmem>>) attributes {dimension_semantics = [], scalar_prefetch = 0 : i64, scratch_operands = 1 : i64, tpu.core_type = #tpu.core_type<tc>} {
    %c0 = arith.constant 0 : index
    %c0_0 = arith.constant 0 : index
    %0 = vector.load %arg3[%c0, %c0_0] : memref<64x768xf32, #tpu.memory_space<vmem>>, vector<64x768xf32>
    %c0_1 = arith.constant 0 : index
    %c0_2 = arith.constant 0 : index
    %1 = vector.load %arg4[%c0_1, %c0_2] : memref<32x384xf32, #tpu.memory_space<vmem>>, vector<32x384xf32>
    %c3 = arith.constant 3 : index
    %c0_3 = arith.constant 0 : index
    %2 = vector.load %arg5[%c3, %c0_3] : memref<16x768xf32, #tpu.memory_space<vmem>>, vector<1x768xf32>
    %c2 = arith.constant 2 : index
    %c0_4 = arith.constant 0 : index
    %3 = vector.load %arg5[%c2, %c0_4] : memref<16x768xf32, #tpu.memory_space<vmem>>, vector<1x384xf32>
    %c0_5 = arith.constant 0 : index
    %c0_6 = arith.constant 0 : index
    %4 = vector.load %arg5[%c0_5, %c0_6] : memref<16x768xf32, #tpu.memory_space<vmem>>, vector<1x384xf32>
    %c1 = arith.constant 1 : index
    %c0_7 = arith.constant 0 : index
    %5 = vector.load %arg5[%c1, %c0_7] : memref<16x768xf32, #tpu.memory_space<vmem>>, vector<1x384xf32>
    %c0_8 = arith.constant 0 : index
    %c0_9 = arith.constant 0 : index
    %c0_10 = arith.constant 0 : index
    %6 = vector.load %arg0[%c0_8, %c0_9, %c0_10] : memref<12x8x1xf32, #tpu.memory_space<vmem>>, vector<12x8x1xf32>
    %7 = vector.shape_cast %4 : vector<1x384xf32> to vector<1x1x384xf32>
    %8 = vector.broadcast %6 : vector<12x8x1xf32> to vector<12x8x384xf32>
    %9 = vector.broadcast %7 : vector<1x1x384xf32> to vector<12x8x384xf32>
    %10 = arith.mulf %8, %9 : vector<12x8x384xf32>
    %11 = vector.shape_cast %5 : vector<1x384xf32> to vector<1x1x384xf32>
    %12 = vector.broadcast %11 : vector<1x1x384xf32> to vector<12x8x384xf32>
    %13 = arith.addf %10, %12 : vector<12x8x384xf32>
    %c0_11 = arith.constant 0 : index
    %c0_12 = arith.constant 0 : index
    %c0_13 = arith.constant 0 : index
    %14 = vector.load %arg7[%c0_11, %c0_12, %c0_13] : memref<12x8x384xf32, #tpu.memory_space<vmem>>, vector<12x8x384xf32>
    tpu.vector_store %arg7[%c0_11, %c0_12, %c0_13], %13 {strides = array<i32>} : memref<12x8x384xf32, #tpu.memory_space<vmem>>, vector<12x8x384xf32>,
    %cst = arith.constant 0.000000e+00 : f32
    %15 = vector.broadcast %cst : f32 to vector<8x64xf32>
    %c0_i32 = arith.constant 0 : i32
    %cst_14 = arith.constant dense<0.000000e+00> : vector<8x768xf32>
    %16 = tpu.matmul %15, %0, %cst_14 {dimension_numbers = #tpu.dot_dimension_numbers<[1], [0], [0], [1], [0, 0, 1, 1], [], []>} : vector<8x64xf32>, vector<64x768xf32>, vector<8x768xf32> -> vector<8x768xf32>
    %17 = vector.broadcast %2 : vector<1x768xf32> to vector<8x768xf32>
    %18 = arith.addf %16, %17 : vector<8x768xf32>
    %19 = arith.index_cast %c0_i32 : i32 to index
    %c0_15 = arith.constant 0 : index
    %c0_16 = arith.constant 0 : index
    %20 = vector.load %arg7[%19, %c0_15, %c0_16] : memref<12x8x384xf32, #tpu.memory_space<vmem>>, vector<1x8x384xf32>
    %21 = vector.shape_cast %20 : vector<1x8x384xf32> to vector<8x384xf32>
    %22 = vector.extract_strided_slice %15 {offsets = [0, 0], sizes = [8, 32], strides = [1, 1]} : vector<8x64xf32> to vector<8x32xf32>
    %23 = vector.extract_strided_slice %15 {offsets = [0, 32], sizes = [8, 32], strides = [1, 1]} : vector<8x64xf32> to vector<8x32xf32>
    %24 = vector.extract_strided_slice %21 {offsets = [0, 0], sizes = [8, 128], strides = [1, 1]} : vector<8x384xf32> to vector<8x128xf32>
    %25 = vector.extract_strided_slice %18 {offsets = [0, 0], sizes = [8, 128], strides = [1, 1]} : vector<8x768xf32> to vector<8x128xf32>
    %26 = arith.addf %24, %25 : vector<8x128xf32>
    %27 = arith.negf %26 : vector<8x128xf32>
    %28 = math.exp %27 : vector<8x128xf32>
    %cst_17 = arith.constant 1.000000e+00 : f32
    %29 = vector.broadcast %cst_17 : f32 to vector<8x128xf32>
    %30 = arith.addf %29, %28 : vector<8x128xf32>
    %31 = arith.divf %29, %30 : vector<8x128xf32>
    %32 = vector.extract_strided_slice %21 {offsets = [0, 128], sizes = [8, 128], strides = [1, 1]} : vector<8x384xf32> to vector<8x128xf32>
    %33 = vector.extract_strided_slice %18 {offsets = [0, 128], sizes = [8, 128], strides = [1, 1]} : vector<8x768xf32> to vector<8x128xf32>
    %34 = arith.addf %32, %33 : vector<8x128xf32>
    %35 = arith.negf %34 : vector<8x128xf32>
    %36 = math.exp %35 : vector<8x128xf32>
    %cst_18 = arith.constant 1.000000e+00 : f32
    %37 = vector.broadcast %cst_18 : f32 to vector<8x128xf32>
    %38 = arith.addf %37, %36 : vector<8x128xf32>
    %39 = arith.divf %37, %38 : vector<8x128xf32>
    %40 = vector.extract_strided_slice %21 {offsets = [0, 256], sizes = [8, 128], strides = [1, 1]} : vector<8x384xf32> to vector<8x128xf32>
    %41 = vector.extract_strided_slice %18 {offsets = [0, 256], sizes = [8, 128], strides = [1, 1]} : vector<8x768xf32> to vector<8x128xf32>
    %42 = arith.mulf %31, %41 : vector<8x128xf32>
    %43 = arith.addf %40, %42 : vector<8x128xf32>
    %44 = math.tanh %43 : vector<8x128xf32>
    %45 = vector.extract_strided_slice %39 {offsets = [0, 0], sizes = [8, 32], strides = [1, 1]} : vector<8x128xf32> to vector<8x32xf32>
    %cst_19 = arith.constant 1.000000e+00 : f32
    %46 = vector.broadcast %cst_19 : f32 to vector<8x32xf32>
    %47 = arith.subf %46, %45 : vector<8x32xf32>
    %48 = vector.extract_strided_slice %44 {offsets = [0, 0], sizes = [8, 32], strides = [1, 1]} : vector<8x128xf32> to vector<8x32xf32>
    %49 = arith.mulf %47, %48 : vector<8x32xf32>
    %50 = vector.extract_strided_slice %39 {offsets = [0, 0], sizes = [8, 32], strides = [1, 1]} : vector<8x128xf32> to vector<8x32xf32>
    %51 = arith.mulf %50, %22 : vector<8x32xf32>
    %52 = arith.addf %49, %51 : vector<8x32xf32>
    %cst_20 = arith.constant dense<0.000000e+00> : vector<8x384xf32>
    %53 = tpu.matmul %52, %1, %cst_20 {dimension_numbers = #tpu.dot_dimension_numbers<[1], [0], [0], [1], [0, 0, 1, 1], [], []>} : vector<8x32xf32>, vector<32x384xf32>, vector<8x384xf32> -> vector<8x384xf32>
    %54 = vector.broadcast %3 : vector<1x384xf32> to vector<8x384xf32>
    %55 = arith.addf %53, %54 : vector<8x384xf32>
    %56 = vector.extract_strided_slice %55 {offsets = [0, 0], sizes = [8, 128], strides = [1, 1]} : vector<8x384xf32> to vector<8x128xf32>
    %57 = vector.extract_strided_slice %18 {offsets = [0, 384], sizes = [8, 128], strides = [1, 1]} : vector<8x768xf32> to vector<8x128xf32>
    %58 = arith.addf %56, %57 : vector<8x128xf32>
    %59 = arith.negf %58 : vector<8x128xf32>
    %60 = math.exp %59 : vector<8x128xf32>
    %cst_21 = arith.constant 1.000000e+00 : f32
    %61 = vector.broadcast %cst_21 : f32 to vector<8x128xf32>
    %62 = arith.addf %61, %60 : vector<8x128xf32>
    %63 = arith.divf %61, %62 : vector<8x128xf32>
    %64 = vector.extract_strided_slice %55 {offsets = [0, 128], sizes = [8, 128], strides = [1, 1]} : vector<8x384xf32> to vector<8x128xf32>
    %65 = vector.extract_strided_slice %18 {offsets = [0, 512], sizes = [8, 128], strides = [1, 1]} : vector<8x768xf32> to vector<8x128xf32>
    %66 = arith.addf %64, %65 : vector<8x128xf32>
    %67 = arith.negf %66 : vector<8x128xf32>
    %68 = math.exp %67 : vector<8x128xf32>
    %cst_22 = arith.constant 1.000000e+00 : f32
    %69 = vector.broadcast %cst_22 : f32 to vector<8x128xf32>
    %70 = arith.addf %69, %68 : vector<8x128xf32>
    %71 = arith.divf %69, %70 : vector<8x128xf32>
    %72 = vector.extract_strided_slice %55 {offsets = [0, 256], sizes = [8, 128], strides = [1, 1]} : vector<8x384xf32> to vector<8x128xf32>
    %73 = vector.extract_strided_slice %18 {offsets = [0, 640], sizes = [8, 128], strides = [1, 1]} : vector<8x768xf32> to vector<8x128xf32>
    %74 = arith.mulf %63, %73 : vector<8x128xf32>
    %75 = arith.addf %72, %74 : vector<8x128xf32>
    %76 = math.tanh %75 : vector<8x128xf32>
    %77 = vector.extract_strided_slice %71 {offsets = [0, 0], sizes = [8, 32], strides = [1, 1]} : vector<8x128xf32> to vector<8x32xf32>
    %cst_23 = arith.constant 1.000000e+00 : f32
    %78 = vector.broadcast %cst_23 : f32 to vector<8x32xf32>
    %79 = arith.subf %78, %77 : vector<8x32xf32>
    %80 = vector.extract_strided_slice %76 {offsets = [0, 0], sizes = [8, 32], strides = [1, 1]} : vector<8x128xf32> to vector<8x32xf32>
    %81 = arith.mulf %79, %80 : vector<8x32xf32>
    %82 = vector.extract_strided_slice %71 {offsets = [0, 0], sizes = [8, 32], strides = [1, 1]} : vector<8x128xf32> to vector<8x32xf32>
    %83 = arith.mulf %82, %23 : vector<8x32xf32>
    %84 = arith.addf %81, %83 : vector<8x32xf32>
    %85 = tpu.concatenate %52, %84 in 1 : vector<8x32xf32>, vector<8x32xf32> -> vector<8x64xf32>
    %86 = arith.index_cast %c0_i32 : i32 to index
    %c0_24 = arith.constant 0 : index
    %c0_25 = arith.constant 0 : index
    %87 = vector.load %arg1[%86, %c0_24, %c0_25] : memref<12x8x1xf32, #tpu.memory_space<vmem>>, vector<1x8x1xf32>
    %88 = vector.shape_cast %87 : vector<1x8x1xf32> to vector<8x1xf32>
    %89 = arith.subf %85, %15 : vector<8x64xf32>
    %90 = vector.broadcast %88 : vector<8x1xf32> to vector<8x64xf32>
    %91 = arith.mulf %90, %89 : vector<8x64xf32>
    %92 = arith.addf %15, %91 : vector<8x64xf32>
    %c1_i32 = arith.constant 1 : i32
    %cst_26 = arith.constant dense<0.000000e+00> : vector<8x768xf32>
    %93 = tpu.matmul %92, %0, %cst_26 {dimension_numbers = #tpu.dot_dimension_numbers<[1], [0], [0], [1], [0, 0, 1, 1], [], []>} : vector<8x64xf32>, vector<64x768xf32>, vector<8x768xf32> -> vector<8x768xf32>
    %94 = vector.broadcast %2 : vector<1x768xf32> to vector<8x768xf32>
    %95 = arith.addf %93, %94 : vector<8x768xf32>
    %96 = arith.index_cast %c1_i32 : i32 to index
    %c0_27 = arith.constant 0 : index
    %c0_28 = arith.constant 0 : index
    %97 = vector.load %arg7[%96, %c0_27, %c0_28] : memref<12x8x384xf32, #tpu.memory_space<vmem>>, vector<1x8x384xf32>
    %98 = vector.shape_cast %97 : vector<1x8x384xf32> to vector<8x384xf32>
    %99 = vector.extract_strided_slice %92 {offsets = [0, 0], sizes = [8, 32], strides = [1, 1]} : vector<8x64xf32> to vector<8x32xf32>
    %100 = vector.extract_strided_slice %92 {offsets = [0, 32], sizes = [8, 32], strides = [1, 1]} : vector<8x64xf32> to vector<8x32xf32>
    %101 = vector.extract_strided_slice %98 {offsets = [0, 0], sizes = [8, 128], strides = [1, 1]} : vector<8x384xf32> to vector<8x128xf32>
    %102 = vector.extract_strided_slice %95 {offsets = [0, 0], sizes = [8, 128], strides = [1, 1]} : vector<8x768xf32> to vector<8x128xf32>
    %103 = arith.addf %101, %102 : vector<8x128xf32>
    %104 = arith.negf %103 : vector<8x128xf32>
    %105 = math.exp %104 : vector<8x128xf32>
    %cst_29 = arith.constant 1.000000e+00 : f32
    %106 = vector.broadcast %cst_29 : f32 to vector<8x128xf32>
    %107 = arith.addf %106, %105 : vector<8x128xf32>
    %108 = arith.divf %106, %107 : vector<8x128xf32>
    %109 = vector.extract_strided_slice %98 {offsets = [0, 128], sizes = [8, 128], strides = [1, 1]} : vector<8x384xf32> to vector<8x128xf32>
    %110 = vector.extract_strided_slice %95 {offsets = [0, 128], sizes = [8, 128], strides = [1, 1]} : vector<8x768xf32> to vector<8x128xf32>
    %111 = arith.addf %109, %110 : vector<8x128xf32>
    %112 = arith.negf %111 : vector<8x128xf32>
    %113 = math.exp %112 : vector<8x128xf32>
    %cst_30 = arith.constant 1.000000e+00 : f32
    %114 = vector.broadcast %cst_30 : f32 to vector<8x128xf32>
    %115 = arith.addf %114, %113 : vector<8x128xf32>
    %116 = arith.divf %114, %115 : vector<8x128xf32>
    %117 = vector.extract_strided_slice %98 {offsets = [0, 256], sizes = [8, 128], strides = [1, 1]} : vector<8x384xf32> to vector<8x128xf32>
    %118 = vector.extract_strided_slice %95 {offsets = [0, 256], sizes = [8, 128], strides = [1, 1]} : vector<8x768xf32> to vector<8x128xf32>
    %119 = arith.mulf %108, %118 : vector<8x128xf32>
    %120 = arith.addf %117, %119 : vector<8x128xf32>
    %121 = math.tanh %120 : vector<8x128xf32>
    %122 = vector.extract_strided_slice %116 {offsets = [0, 0], sizes = [8, 32], strides = [1, 1]} : vector<8x128xf32> to vector<8x32xf32>
    %cst_31 = arith.constant 1.000000e+00 : f32
    %123 = vector.broadcast %cst_31 : f32 to vector<8x32xf32>
    %124 = arith.subf %123, %122 : vector<8x32xf32>
    %125 = vector.extract_strided_slice %121 {offsets = [0, 0], sizes = [8, 32], strides = [1, 1]} : vector<8x128xf32> to vector<8x32xf32>
    %126 = arith.mulf %124, %125 : vector<8x32xf32>
    %127 = vector.extract_strided_slice %116 {offsets = [0, 0], sizes = [8, 32], strides = [1, 1]} : vector<8x128xf32> to vector<8x32xf32>
    %128 = arith.mulf %127, %99 : vector<8x32xf32>
    %129 = arith.addf %126, %128 : vector<8x32xf32>
    %cst_32 = arith.constant dense<0.000000e+00> : vector<8x384xf32>
    %130 = tpu.matmul %129, %1, %cst_32 {dimension_numbers = #tpu.dot_dimension_numbers<[1], [0], [0], [1], [0, 0, 1, 1], [], []>} : vector<8x32xf32>, vector<32x384xf32>, vector<8x384xf32> -> vector<8x384xf32>
    %131 = vector.broadcast %3 : vector<1x384xf32> to vector<8x384xf32>
    %132 = arith.addf %130, %131 : vector<8x384xf32>
    %133 = vector.extract_strided_slice %132 {offsets = [0, 0], sizes = [8, 128], strides = [1, 1]} : vector<8x384xf32> to vector<8x128xf32>
    %134 = vector.extract_strided_slice %95 {offsets = [0, 384], sizes = [8, 128], strides = [1, 1]} : vector<8x768xf32> to vector<8x128xf32>
    %135 = arith.addf %133, %134 : vector<8x128xf32>
    %136 = arith.negf %135 : vector<8x128xf32>
    %137 = math.exp %136 : vector<8x128xf32>
    %cst_33 = arith.constant 1.000000e+00 : f32
    %138 = vector.broadcast %cst_33 : f32 to vector<8x128xf32>
    %139 = arith.addf %138, %137 : vector<8x128xf32>
    %140 = arith.divf %138, %139 : vector<8x128xf32>
    %141 = vector.extract_strided_slice %132 {offsets = [0, 128], sizes = [8, 128], strides = [1, 1]} : vector<8x384xf32> to vector<8x128xf32>
    %142 = vector.extract_strided_slice %95 {offsets = [0, 512], sizes = [8, 128], strides = [1, 1]} : vector<8x768xf32> to vector<8x128xf32>
    %143 = arith.addf %141, %142 : vector<8x128xf32>
    %144 = arith.negf %143 : vector<8x128xf32>
    %145 = math.exp %144 : vector<8x128xf32>
    %cst_34 = arith.constant 1.000000e+00 : f32
    %146 = vector.broadcast %cst_34 : f32 to vector<8x128xf32>
    %147 = arith.addf %146, %145 : vector<8x128xf32>
    %148 = arith.divf %146, %147 : vector<8x128xf32>
    %149 = vector.extract_strided_slice %132 {offsets = [0, 256], sizes = [8, 128], strides = [1, 1]} : vector<8x384xf32> to vector<8x128xf32>
    %150 = vector.extract_strided_slice %95 {offsets = [0, 640], sizes = [8, 128], strides = [1, 1]} : vector<8x768xf32> to vector<8x128xf32>
    %151 = arith.mulf %140, %150 : vector<8x128xf32>
    %152 = arith.addf %149, %151 : vector<8x128xf32>
    %153 = math.tanh %152 : vector<8x128xf32>
    %154 = vector.extract_strided_slice %148 {offsets = [0, 0], sizes = [8, 32], strides = [1, 1]} : vector<8x128xf32> to vector<8x32xf32>
    %cst_35 = arith.constant 1.000000e+00 : f32
    %155 = vector.broadcast %cst_35 : f32 to vector<8x32xf32>
    %156 = arith.subf %155, %154 : vector<8x32xf32>
    %157 = vector.extract_strided_slice %153 {offsets = [0, 0], sizes = [8, 32], strides = [1, 1]} : vector<8x128xf32> to vector<8x32xf32>
    %158 = arith.mulf %156, %157 : vector<8x32xf32>
    %159 = vector.extract_strided_slice %148 {offsets = [0, 0], sizes = [8, 32], strides = [1, 1]} : vector<8x128xf32> to vector<8x32xf32>
    %160 = arith.mulf %159, %100 : vector<8x32xf32>
    %161 = arith.addf %158, %160 : vector<8x32xf32>
    %162 = tpu.concatenate %129, %161 in 1 : vector<8x32xf32>, vector<8x32xf32> -> vector<8x64xf32>
    %163 = arith.index_cast %c1_i32 : i32 to index
    %c0_36 = arith.constant 0 : index
    %c0_37 = arith.constant 0 : index
    %164 = vector.load %arg1[%163, %c0_36, %c0_37] : memref<12x8x1xf32, #tpu.memory_space<vmem>>, vector<1x8x1xf32>
    %165 = vector.shape_cast %164 : vector<1x8x1xf32> to vector<8x1xf32>
    %166 = arith.subf %162, %92 : vector<8x64xf32>
    %167 = vector.broadcast %165 : vector<8x1xf32> to vector<8x64xf32>
    %168 = arith.mulf %167, %166 : vector<8x64xf32>
    %169 = arith.addf %92, %168 : vector<8x64xf32>
    %c2_i32 = arith.constant 2 : i32
    %cst_38 = arith.constant dense<0.000000e+00> : vector<8x768xf32>
    %170 = tpu.matmul %169, %0, %cst_38 {dimension_numbers = #tpu.dot_dimension_numbers<[1], [0], [0], [1], [0, 0, 1, 1], [], []>} : vector<8x64xf32>, vector<64x768xf32>, vector<8x768xf32> -> vector<8x768xf32>
    %171 = vector.broadcast %2 : vector<1x768xf32> to vector<8x768xf32>
    %172 = arith.addf %170, %171 : vector<8x768xf32>
    %173 = arith.index_cast %c2_i32 : i32 to index
    %c0_39 = arith.constant 0 : index
    %c0_40 = arith.constant 0 : index
    %174 = vector.load %arg7[%173, %c0_39, %c0_40] : memref<12x8x384xf32, #tpu.memory_space<vmem>>, vector<1x8x384xf32>
    %175 = vector.shape_cast %174 : vector<1x8x384xf32> to vector<8x384xf32>
    %176 = vector.extract_strided_slice %169 {offsets = [0, 0], sizes = [8, 32], strides = [1, 1]} : vector<8x64xf32> to vector<8x32xf32>
    %177 = vector.extract_strided_slice %169 {offsets = [0, 32], sizes = [8, 32], strides = [1, 1]} : vector<8x64xf32> to vector<8x32xf32>
    %178 = vector.extract_strided_slice %175 {offsets = [0, 0], sizes = [8, 128], strides = [1, 1]} : vector<8x384xf32> to vector<8x128xf32>
    %179 = vector.extract_strided_slice %172 {offsets = [0, 0], sizes = [8, 128], strides = [1, 1]} : vector<8x768xf32> to vector<8x128xf32>
    %180 = arith.addf %178, %179 : vector<8x128xf32>
    %181 = arith.negf %180 : vector<8x128xf32>
    %182 = math.exp %181 : vector<8x128xf32>
    %cst_41 = arith.constant 1.000000e+00 : f32
    %183 = vector.broadcast %cst_41 : f32 to vector<8x128xf32>
    %184 = arith.addf %183, %182 : vector<8x128xf32>
    %185 = arith.divf %183, %184 : vector<8x128xf32>
    %186 = vector.extract_strided_slice %175 {offsets = [0, 128], sizes = [8, 128], strides = [1, 1]} : vector<8x384xf32> to vector<8x128xf32>
    %187 = vector.extract_strided_slice %172 {offsets = [0, 128], sizes = [8, 128], strides = [1, 1]} : vector<8x768xf32> to vector<8x128xf32>
    %188 = arith.addf %186, %187 : vector<8x128xf32>
    %189 = arith.negf %188 : vector<8x128xf32>
    %190 = math.exp %189 : vector<8x128xf32>
    %cst_42 = arith.constant 1.000000e+00 : f32
    %191 = vector.broadcast %cst_42 : f32 to vector<8x128xf32>
    %192 = arith.addf %191, %190 : vector<8x128xf32>
    %193 = arith.divf %191, %192 : vector<8x128xf32>
    %194 = vector.extract_strided_slice %175 {offsets = [0, 256], sizes = [8, 128], strides = [1, 1]} : vector<8x384xf32> to vector<8x128xf32>
    %195 = vector.extract_strided_slice %172 {offsets = [0, 256], sizes = [8, 128], strides = [1, 1]} : vector<8x768xf32> to vector<8x128xf32>
    %196 = arith.mulf %185, %195 : vector<8x128xf32>
    %197 = arith.addf %194, %196 : vector<8x128xf32>
    %198 = math.tanh %197 : vector<8x128xf32>
    %199 = vector.extract_strided_slice %193 {offsets = [0, 0], sizes = [8, 32], strides = [1, 1]} : vector<8x128xf32> to vector<8x32xf32>
    %cst_43 = arith.constant 1.000000e+00 : f32
    %200 = vector.broadcast %cst_43 : f32 to vector<8x32xf32>
    %201 = arith.subf %200, %199 : vector<8x32xf32>
    %202 = vector.extract_strided_slice %198 {offsets = [0, 0], sizes = [8, 32], strides = [1, 1]} : vector<8x128xf32> to vector<8x32xf32>
    %203 = arith.mulf %201, %202 : vector<8x32xf32>
    %204 = vector.extract_strided_slice %193 {offsets = [0, 0], sizes = [8, 32], strides = [1, 1]} : vector<8x128xf32> to vector<8x32xf32>
    %205 = arith.mulf %204, %176 : vector<8x32xf32>
    %206 = arith.addf %203, %205 : vector<8x32xf32>
    %cst_44 = arith.constant dense<0.000000e+00> : vector<8x384xf32>
    %207 = tpu.matmul %206, %1, %cst_44 {dimension_numbers = #tpu.dot_dimension_numbers<[1], [0], [0], [1], [0, 0, 1, 1], [], []>} : vector<8x32xf32>, vector<32x384xf32>, vector<8x384xf32> -> vector<8x384xf32>
    %208 = vector.broadcast %3 : vector<1x384xf32> to vector<8x384xf32>
    %209 = arith.addf %207, %208 : vector<8x384xf32>
    %210 = vector.extract_strided_slice %209 {offsets = [0, 0], sizes = [8, 128], strides = [1, 1]} : vector<8x384xf32> to vector<8x128xf32>
    %211 = vector.extract_strided_slice %172 {offsets = [0, 384], sizes = [8, 128], strides = [1, 1]} : vector<8x768xf32> to vector<8x128xf32>
    %212 = arith.addf %210, %211 : vector<8x128xf32>
    %213 = arith.negf %212 : vector<8x128xf32>
    %214 = math.exp %213 : vector<8x128xf32>
    %cst_45 = arith.constant 1.000000e+00 : f32
    %215 = vector.broadcast %cst_45 : f32 to vector<8x128xf32>
    %216 = arith.addf %215, %214 : vector<8x128xf32>
    %217 = arith.divf %215, %216 : vector<8x128xf32>
    %218 = vector.extract_strided_slice %209 {offsets = [0, 128], sizes = [8, 128], strides = [1, 1]} : vector<8x384xf32> to vector<8x128xf32>
    %219 = vector.extract_strided_slice %172 {offsets = [0, 512], sizes = [8, 128], strides = [1, 1]} : vector<8x768xf32> to vector<8x128xf32>
    %220 = arith.addf %218, %219 : vector<8x128xf32>
    %221 = arith.negf %220 : vector<8x128xf32>
    %222 = math.exp %221 : vector<8x128xf32>
    %cst_46 = arith.constant 1.000000e+00 : f32
    %223 = vector.broadcast %cst_46 : f32 to vector<8x128xf32>
    %224 = arith.addf %223, %222 : vector<8x128xf32>
    %225 = arith.divf %223, %224 : vector<8x128xf32>
    %226 = vector.extract_strided_slice %209 {offsets = [0, 256], sizes = [8, 128], strides = [1, 1]} : vector<8x384xf32> to vector<8x128xf32>
    %227 = vector.extract_strided_slice %172 {offsets = [0, 640], sizes = [8, 128], strides = [1, 1]} : vector<8x768xf32> to vector<8x128xf32>
    %228 = arith.mulf %217, %227 : vector<8x128xf32>
    %229 = arith.addf %226, %228 : vector<8x128xf32>
    %230 = math.tanh %229 : vector<8x128xf32>
    %231 = vector.extract_strided_slice %225 {offsets = [0, 0], sizes = [8, 32], strides = [1, 1]} : vector<8x128xf32> to vector<8x32xf32>
    %cst_47 = arith.constant 1.000000e+00 : f32
    %232 = vector.broadcast %cst_47 : f32 to vector<8x32xf32>
    %233 = arith.subf %232, %231 : vector<8x32xf32>
    %234 = vector.extract_strided_slice %230 {offsets = [0, 0], sizes = [8, 32], strides = [1, 1]} : vector<8x128xf32> to vector<8x32xf32>
    %235 = arith.mulf %233, %234 : vector<8x32xf32>
    %236 = vector.extract_strided_slice %225 {offsets = [0, 0], sizes = [8, 32], strides = [1, 1]} : vector<8x128xf32> to vector<8x32xf32>
    %237 = arith.mulf %236, %177 : vector<8x32xf32>
    %238 = arith.addf %235, %237 : vector<8x32xf32>
    %239 = tpu.concatenate %206, %238 in 1 : vector<8x32xf32>, vector<8x32xf32> -> vector<8x64xf32>
    %240 = arith.index_cast %c2_i32 : i32 to index
    %c0_48 = arith.constant 0 : index
    %c0_49 = arith.constant 0 : index
    %241 = vector.load %arg1[%240, %c0_48, %c0_49] : memref<12x8x1xf32, #tpu.memory_space<vmem>>, vector<1x8x1xf32>
    %242 = vector.shape_cast %241 : vector<1x8x1xf32> to vector<8x1xf32>
    %243 = arith.subf %239, %169 : vector<8x64xf32>
    %244 = vector.broadcast %242 : vector<8x1xf32> to vector<8x64xf32>
    %245 = arith.mulf %244, %243 : vector<8x64xf32>
    %246 = arith.addf %169, %245 : vector<8x64xf32>
    %c3_i32 = arith.constant 3 : i32
    %cst_50 = arith.constant dense<0.000000e+00> : vector<8x768xf32>
    %247 = tpu.matmul %246, %0, %cst_50 {dimension_numbers = #tpu.dot_dimension_numbers<[1], [0], [0], [1], [0, 0, 1, 1], [], []>} : vector<8x64xf32>, vector<64x768xf32>, vector<8x768xf32> -> vector<8x768xf32>
    %248 = vector.broadcast %2 : vector<1x768xf32> to vector<8x768xf32>
    %249 = arith.addf %247, %248 : vector<8x768xf32>
    %250 = arith.index_cast %c3_i32 : i32 to index
    %c0_51 = arith.constant 0 : index
    %c0_52 = arith.constant 0 : index
    %251 = vector.load %arg7[%250, %c0_51, %c0_52] : memref<12x8x384xf32, #tpu.memory_space<vmem>>, vector<1x8x384xf32>
    %252 = vector.shape_cast %251 : vector<1x8x384xf32> to vector<8x384xf32>
    %253 = vector.extract_strided_slice %246 {offsets = [0, 0], sizes = [8, 32], strides = [1, 1]} : vector<8x64xf32> to vector<8x32xf32>
    %254 = vector.extract_strided_slice %246 {offsets = [0, 32], sizes = [8, 32], strides = [1, 1]} : vector<8x64xf32> to vector<8x32xf32>
    %255 = vector.extract_strided_slice %252 {offsets = [0, 0], sizes = [8, 128], strides = [1, 1]} : vector<8x384xf32> to vector<8x128xf32>
    %256 = vector.extract_strided_slice %249 {offsets = [0, 0], sizes = [8, 128], strides = [1, 1]} : vector<8x768xf32> to vector<8x128xf32>
    %257 = arith.addf %255, %256 : vector<8x128xf32>
    %258 = arith.negf %257 : vector<8x128xf32>
    %259 = math.exp %258 : vector<8x128xf32>
    %cst_53 = arith.constant 1.000000e+00 : f32
    %260 = vector.broadcast %cst_53 : f32 to vector<8x128xf32>
    %261 = arith.addf %260, %259 : vector<8x128xf32>
    %262 = arith.divf %260, %261 : vector<8x128xf32>
    %263 = vector.extract_strided_slice %252 {offsets = [0, 128], sizes = [8, 128], strides = [1, 1]} : vector<8x384xf32> to vector<8x128xf32>
    %264 = vector.extract_strided_slice %249 {offsets = [0, 128], sizes = [8, 128], strides = [1, 1]} : vector<8x768xf32> to vector<8x128xf32>
    %265 = arith.addf %263, %264 : vector<8x128xf32>
    %266 = arith.negf %265 : vector<8x128xf32>
    %267 = math.exp %266 : vector<8x128xf32>
    %cst_54 = arith.constant 1.000000e+00 : f32
    %268 = vector.broadcast %cst_54 : f32 to vector<8x128xf32>
    %269 = arith.addf %268, %267 : vector<8x128xf32>
    %270 = arith.divf %268, %269 : vector<8x128xf32>
    %271 = vector.extract_strided_slice %252 {offsets = [0, 256], sizes = [8, 128], strides = [1, 1]} : vector<8x384xf32> to vector<8x128xf32>
    %272 = vector.extract_strided_slice %249 {offsets = [0, 256], sizes = [8, 128], strides = [1, 1]} : vector<8x768xf32> to vector<8x128xf32>
    %273 = arith.mulf %262, %272 : vector<8x128xf32>
    %274 = arith.addf %271, %273 : vector<8x128xf32>
    %275 = math.tanh %274 : vector<8x128xf32>
    %276 = vector.extract_strided_slice %270 {offsets = [0, 0], sizes = [8, 32], strides = [1, 1]} : vector<8x128xf32> to vector<8x32xf32>
    %cst_55 = arith.constant 1.000000e+00 : f32
    %277 = vector.broadcast %cst_55 : f32 to vector<8x32xf32>
    %278 = arith.subf %277, %276 : vector<8x32xf32>
    %279 = vector.extract_strided_slice %275 {offsets = [0, 0], sizes = [8, 32], strides = [1, 1]} : vector<8x128xf32> to vector<8x32xf32>
    %280 = arith.mulf %278, %279 : vector<8x32xf32>
    %281 = vector.extract_strided_slice %270 {offsets = [0, 0], sizes = [8, 32], strides = [1, 1]} : vector<8x128xf32> to vector<8x32xf32>
    %282 = arith.mulf %281, %253 : vector<8x32xf32>
    %283 = arith.addf %280, %282 : vector<8x32xf32>
    %cst_56 = arith.constant dense<0.000000e+00> : vector<8x384xf32>
    %284 = tpu.matmul %283, %1, %cst_56 {dimension_numbers = #tpu.dot_dimension_numbers<[1], [0], [0], [1], [0, 0, 1, 1], [], []>} : vector<8x32xf32>, vector<32x384xf32>, vector<8x384xf32> -> vector<8x384xf32>
    %285 = vector.broadcast %3 : vector<1x384xf32> to vector<8x384xf32>
    %286 = arith.addf %284, %285 : vector<8x384xf32>
    %287 = vector.extract_strided_slice %286 {offsets = [0, 0], sizes = [8, 128], strides = [1, 1]} : vector<8x384xf32> to vector<8x128xf32>
    %288 = vector.extract_strided_slice %249 {offsets = [0, 384], sizes = [8, 128], strides = [1, 1]} : vector<8x768xf32> to vector<8x128xf32>
    %289 = arith.addf %287, %288 : vector<8x128xf32>
    %290 = arith.negf %289 : vector<8x128xf32>
    %291 = math.exp %290 : vector<8x128xf32>
    %cst_57 = arith.constant 1.000000e+00 : f32
    %292 = vector.broadcast %cst_57 : f32 to vector<8x128xf32>
    %293 = arith.addf %292, %291 : vector<8x128xf32>
    %294 = arith.divf %292, %293 : vector<8x128xf32>
    %295 = vector.extract_strided_slice %286 {offsets = [0, 128], sizes = [8, 128], strides = [1, 1]} : vector<8x384xf32> to vector<8x128xf32>
    %296 = vector.extract_strided_slice %249 {offsets = [0, 512], sizes = [8, 128], strides = [1, 1]} : vector<8x768xf32> to vector<8x128xf32>
    %297 = arith.addf %295, %296 : vector<8x128xf32>
    %298 = arith.negf %297 : vector<8x128xf32>
    %299 = math.exp %298 : vector<8x128xf32>
    %cst_58 = arith.constant 1.000000e+00 : f32
    %300 = vector.broadcast %cst_58 : f32 to vector<8x128xf32>
    %301 = arith.addf %300, %299 : vector<8x128xf32>
    %302 = arith.divf %300, %301 : vector<8x128xf32>
    %303 = vector.extract_strided_slice %286 {offsets = [0, 256], sizes = [8, 128], strides = [1, 1]} : vector<8x384xf32> to vector<8x128xf32>
    %304 = vector.extract_strided_slice %249 {offsets = [0, 640], sizes = [8, 128], strides = [1, 1]} : vector<8x768xf32> to vector<8x128xf32>
    %305 = arith.mulf %294, %304 : vector<8x128xf32>
    %306 = arith.addf %303, %305 : vector<8x128xf32>
    %307 = math.tanh %306 : vector<8x128xf32>
    %308 = vector.extract_strided_slice %302 {offsets = [0, 0], sizes = [8, 32], strides = [1, 1]} : vector<8x128xf32> to vector<8x32xf32>
    %cst_59 = arith.constant 1.000000e+00 : f32
    %309 = vector.broadcast %cst_59 : f32 to vector<8x32xf32>
    %310 = arith.subf %309, %308 : vector<8x32xf32>
    %311 = vector.extract_strided_slice %307 {offsets = [0, 0], sizes = [8, 32], strides = [1, 1]} : vector<8x128xf32> to vector<8x32xf32>
    %312 = arith.mulf %310, %311 : vector<8x32xf32>
    %313 = vector.extract_strided_slice %302 {offsets = [0, 0], sizes = [8, 32], strides = [1, 1]} : vector<8x128xf32> to vector<8x32xf32>
    %314 = arith.mulf %313, %254 : vector<8x32xf32>
    %315 = arith.addf %312, %314 : vector<8x32xf32>
    %316 = tpu.concatenate %283, %315 in 1 : vector<8x32xf32>, vector<8x32xf32> -> vector<8x64xf32>
    %317 = arith.index_cast %c3_i32 : i32 to index
    %c0_60 = arith.constant 0 : index
    %c0_61 = arith.constant 0 : index
    %318 = vector.load %arg1[%317, %c0_60, %c0_61] : memref<12x8x1xf32, #tpu.memory_space<vmem>>, vector<1x8x1xf32>
    %319 = vector.shape_cast %318 : vector<1x8x1xf32> to vector<8x1xf32>
    %320 = arith.subf %316, %246 : vector<8x64xf32>
    %321 = vector.broadcast %319 : vector<8x1xf32> to vector<8x64xf32>
    %322 = arith.mulf %321, %320 : vector<8x64xf32>
    %323 = arith.addf %246, %322 : vector<8x64xf32>
    %c4_i32 = arith.constant 4 : i32
    %cst_62 = arith.constant dense<0.000000e+00> : vector<8x768xf32>
    %324 = tpu.matmul %323, %0, %cst_62 {dimension_numbers = #tpu.dot_dimension_numbers<[1], [0], [0], [1], [0, 0, 1, 1], [], []>} : vector<8x64xf32>, vector<64x768xf32>, vector<8x768xf32> -> vector<8x768xf32>
    %325 = vector.broadcast %2 : vector<1x768xf32> to vector<8x768xf32>
    %326 = arith.addf %324, %325 : vector<8x768xf32>
    %327 = arith.index_cast %c4_i32 : i32 to index
    %c0_63 = arith.constant 0 : index
    %c0_64 = arith.constant 0 : index
    %328 = vector.load %arg7[%327, %c0_63, %c0_64] : memref<12x8x384xf32, #tpu.memory_space<vmem>>, vector<1x8x384xf32>
    %329 = vector.shape_cast %328 : vector<1x8x384xf32> to vector<8x384xf32>
    %330 = vector.extract_strided_slice %323 {offsets = [0, 0], sizes = [8, 32], strides = [1, 1]} : vector<8x64xf32> to vector<8x32xf32>
    %331 = vector.extract_strided_slice %323 {offsets = [0, 32], sizes = [8, 32], strides = [1, 1]} : vector<8x64xf32> to vector<8x32xf32>
    %332 = vector.extract_strided_slice %329 {offsets = [0, 0], sizes = [8, 128], strides = [1, 1]} : vector<8x384xf32> to vector<8x128xf32>
    %333 = vector.extract_strided_slice %326 {offsets = [0, 0], sizes = [8, 128], strides = [1, 1]} : vector<8x768xf32> to vector<8x128xf32>
    %334 = arith.addf %332, %333 : vector<8x128xf32>
    %335 = arith.negf %334 : vector<8x128xf32>
    %336 = math.exp %335 : vector<8x128xf32>
    %cst_65 = arith.constant 1.000000e+00 : f32
    %337 = vector.broadcast %cst_65 : f32 to vector<8x128xf32>
    %338 = arith.addf %337, %336 : vector<8x128xf32>
    %339 = arith.divf %337, %338 : vector<8x128xf32>
    %340 = vector.extract_strided_slice %329 {offsets = [0, 128], sizes = [8, 128], strides = [1, 1]} : vector<8x384xf32> to vector<8x128xf32>
    %341 = vector.extract_strided_slice %326 {offsets = [0, 128], sizes = [8, 128], strides = [1, 1]} : vector<8x768xf32> to vector<8x128xf32>
    %342 = arith.addf %340, %341 : vector<8x128xf32>
    %343 = arith.negf %342 : vector<8x128xf32>
    %344 = math.exp %343 : vector<8x128xf32>
    %cst_66 = arith.constant 1.000000e+00 : f32
    %345 = vector.broadcast %cst_66 : f32 to vector<8x128xf32>
    %346 = arith.addf %345, %344 : vector<8x128xf32>
    %347 = arith.divf %345, %346 : vector<8x128xf32>
    %348 = vector.extract_strided_slice %329 {offsets = [0, 256], sizes = [8, 128], strides = [1, 1]} : vector<8x384xf32> to vector<8x128xf32>
    %349 = vector.extract_strided_slice %326 {offsets = [0, 256], sizes = [8, 128], strides = [1, 1]} : vector<8x768xf32> to vector<8x128xf32>
    %350 = arith.mulf %339, %349 : vector<8x128xf32>
    %351 = arith.addf %348, %350 : vector<8x128xf32>
    %352 = math.tanh %351 : vector<8x128xf32>
    %353 = vector.extract_strided_slice %347 {offsets = [0, 0], sizes = [8, 32], strides = [1, 1]} : vector<8x128xf32> to vector<8x32xf32>
    %cst_67 = arith.constant 1.000000e+00 : f32
    %354 = vector.broadcast %cst_67 : f32 to vector<8x32xf32>
    %355 = arith.subf %354, %353 : vector<8x32xf32>
    %356 = vector.extract_strided_slice %352 {offsets = [0, 0], sizes = [8, 32], strides = [1, 1]} : vector<8x128xf32> to vector<8x32xf32>
    %357 = arith.mulf %355, %356 : vector<8x32xf32>
    %358 = vector.extract_strided_slice %347 {offsets = [0, 0], sizes = [8, 32], strides = [1, 1]} : vector<8x128xf32> to vector<8x32xf32>
    %359 = arith.mulf %358, %330 : vector<8x32xf32>
    %360 = arith.addf %357, %359 : vector<8x32xf32>
    %cst_68 = arith.constant dense<0.000000e+00> : vector<8x384xf32>
    %361 = tpu.matmul %360, %1, %cst_68 {dimension_numbers = #tpu.dot_dimension_numbers<[1], [0], [0], [1], [0, 0, 1, 1], [], []>} : vector<8x32xf32>, vector<32x384xf32>, vector<8x384xf32> -> vector<8x384xf32>
    %362 = vector.broadcast %3 : vector<1x384xf32> to vector<8x384xf32>
    %363 = arith.addf %361, %362 : vector<8x384xf32>
    %364 = vector.extract_strided_slice %363 {offsets = [0, 0], sizes = [8, 128], strides = [1, 1]} : vector<8x384xf32> to vector<8x128xf32>
    %365 = vector.extract_strided_slice %326 {offsets = [0, 384], sizes = [8, 128], strides = [1, 1]} : vector<8x768xf32> to vector<8x128xf32>
    %366 = arith.addf %364, %365 : vector<8x128xf32>
    %367 = arith.negf %366 : vector<8x128xf32>
    %368 = math.exp %367 : vector<8x128xf32>
    %cst_69 = arith.constant 1.000000e+00 : f32
    %369 = vector.broadcast %cst_69 : f32 to vector<8x128xf32>
    %370 = arith.addf %369, %368 : vector<8x128xf32>
    %371 = arith.divf %369, %370 : vector<8x128xf32>
    %372 = vector.extract_strided_slice %363 {offsets = [0, 128], sizes = [8, 128], strides = [1, 1]} : vector<8x384xf32> to vector<8x128xf32>
    %373 = vector.extract_strided_slice %326 {offsets = [0, 512], sizes = [8, 128], strides = [1, 1]} : vector<8x768xf32> to vector<8x128xf32>
    %374 = arith.addf %372, %373 : vector<8x128xf32>
    %375 = arith.negf %374 : vector<8x128xf32>
    %376 = math.exp %375 : vector<8x128xf32>
    %cst_70 = arith.constant 1.000000e+00 : f32
    %377 = vector.broadcast %cst_70 : f32 to vector<8x128xf32>
    %378 = arith.addf %377, %376 : vector<8x128xf32>
    %379 = arith.divf %377, %378 : vector<8x128xf32>
    %380 = vector.extract_strided_slice %363 {offsets = [0, 256], sizes = [8, 128], strides = [1, 1]} : vector<8x384xf32> to vector<8x128xf32>
    %381 = vector.extract_strided_slice %326 {offsets = [0, 640], sizes = [8, 128], strides = [1, 1]} : vector<8x768xf32> to vector<8x128xf32>
    %382 = arith.mulf %371, %381 : vector<8x128xf32>
    %383 = arith.addf %380, %382 : vector<8x128xf32>
    %384 = math.tanh %383 : vector<8x128xf32>
    %385 = vector.extract_strided_slice %379 {offsets = [0, 0], sizes = [8, 32], strides = [1, 1]} : vector<8x128xf32> to vector<8x32xf32>
    %cst_71 = arith.constant 1.000000e+00 : f32
    %386 = vector.broadcast %cst_71 : f32 to vector<8x32xf32>
    %387 = arith.subf %386, %385 : vector<8x32xf32>
    %388 = vector.extract_strided_slice %384 {offsets = [0, 0], sizes = [8, 32], strides = [1, 1]} : vector<8x128xf32> to vector<8x32xf32>
    %389 = arith.mulf %387, %388 : vector<8x32xf32>
    %390 = vector.extract_strided_slice %379 {offsets = [0, 0], sizes = [8, 32], strides = [1, 1]} : vector<8x128xf32> to vector<8x32xf32>
    %391 = arith.mulf %390, %331 : vector<8x32xf32>
    %392 = arith.addf %389, %391 : vector<8x32xf32>
    %393 = tpu.concatenate %360, %392 in 1 : vector<8x32xf32>, vector<8x32xf32> -> vector<8x64xf32>
    %394 = arith.index_cast %c4_i32 : i32 to index
    %c0_72 = arith.constant 0 : index
    %c0_73 = arith.constant 0 : index
    %395 = vector.load %arg1[%394, %c0_72, %c0_73] : memref<12x8x1xf32, #tpu.memory_space<vmem>>, vector<1x8x1xf32>
    %396 = vector.shape_cast %395 : vector<1x8x1xf32> to vector<8x1xf32>
    %397 = arith.subf %393, %323 : vector<8x64xf32>
    %398 = vector.broadcast %396 : vector<8x1xf32> to vector<8x64xf32>
    %399 = arith.mulf %398, %397 : vector<8x64xf32>
    %400 = arith.addf %323, %399 : vector<8x64xf32>
    %c5_i32 = arith.constant 5 : i32
    %cst_74 = arith.constant dense<0.000000e+00> : vector<8x768xf32>
    %401 = tpu.matmul %400, %0, %cst_74 {dimension_numbers = #tpu.dot_dimension_numbers<[1], [0], [0], [1], [0, 0, 1, 1], [], []>} : vector<8x64xf32>, vector<64x768xf32>, vector<8x768xf32> -> vector<8x768xf32>
    %402 = vector.broadcast %2 : vector<1x768xf32> to vector<8x768xf32>
    %403 = arith.addf %401, %402 : vector<8x768xf32>
    %404 = arith.index_cast %c5_i32 : i32 to index
    %c0_75 = arith.constant 0 : index
    %c0_76 = arith.constant 0 : index
    %405 = vector.load %arg7[%404, %c0_75, %c0_76] : memref<12x8x384xf32, #tpu.memory_space<vmem>>, vector<1x8x384xf32>
    %406 = vector.shape_cast %405 : vector<1x8x384xf32> to vector<8x384xf32>
    %407 = vector.extract_strided_slice %400 {offsets = [0, 0], sizes = [8, 32], strides = [1, 1]} : vector<8x64xf32> to vector<8x32xf32>
    %408 = vector.extract_strided_slice %400 {offsets = [0, 32], sizes = [8, 32], strides = [1, 1]} : vector<8x64xf32> to vector<8x32xf32>
    %409 = vector.extract_strided_slice %406 {offsets = [0, 0], sizes = [8, 128], strides = [1, 1]} : vector<8x384xf32> to vector<8x128xf32>
    %410 = vector.extract_strided_slice %403 {offsets = [0, 0], sizes = [8, 128], strides = [1, 1]} : vector<8x768xf32> to vector<8x128xf32>
    %411 = arith.addf %409, %410 : vector<8x128xf32>
    %412 = arith.negf %411 : vector<8x128xf32>
    %413 = math.exp %412 : vector<8x128xf32>
    %cst_77 = arith.constant 1.000000e+00 : f32
    %414 = vector.broadcast %cst_77 : f32 to vector<8x128xf32>
    %415 = arith.addf %414, %413 : vector<8x128xf32>
    %416 = arith.divf %414, %415 : vector<8x128xf32>
    %417 = vector.extract_strided_slice %406 {offsets = [0, 128], sizes = [8, 128], strides = [1, 1]} : vector<8x384xf32> to vector<8x128xf32>
    %418 = vector.extract_strided_slice %403 {offsets = [0, 128], sizes = [8, 128], strides = [1, 1]} : vector<8x768xf32> to vector<8x128xf32>
    %419 = arith.addf %417, %418 : vector<8x128xf32>
    %420 = arith.negf %419 : vector<8x128xf32>
    %421 = math.exp %420 : vector<8x128xf32>
    %cst_78 = arith.constant 1.000000e+00 : f32
    %422 = vector.broadcast %cst_78 : f32 to vector<8x128xf32>
    %423 = arith.addf %422, %421 : vector<8x128xf32>
    %424 = arith.divf %422, %423 : vector<8x128xf32>
    %425 = vector.extract_strided_slice %406 {offsets = [0, 256], sizes = [8, 128], strides = [1, 1]} : vector<8x384xf32> to vector<8x128xf32>
    %426 = vector.extract_strided_slice %403 {offsets = [0, 256], sizes = [8, 128], strides = [1, 1]} : vector<8x768xf32> to vector<8x128xf32>
    %427 = arith.mulf %416, %426 : vector<8x128xf32>
    %428 = arith.addf %425, %427 : vector<8x128xf32>
    %429 = math.tanh %428 : vector<8x128xf32>
    %430 = vector.extract_strided_slice %424 {offsets = [0, 0], sizes = [8, 32], strides = [1, 1]} : vector<8x128xf32> to vector<8x32xf32>
    %cst_79 = arith.constant 1.000000e+00 : f32
    %431 = vector.broadcast %cst_79 : f32 to vector<8x32xf32>
    %432 = arith.subf %431, %430 : vector<8x32xf32>
    %433 = vector.extract_strided_slice %429 {offsets = [0, 0], sizes = [8, 32], strides = [1, 1]} : vector<8x128xf32> to vector<8x32xf32>
    %434 = arith.mulf %432, %433 : vector<8x32xf32>
    %435 = vector.extract_strided_slice %424 {offsets = [0, 0], sizes = [8, 32], strides = [1, 1]} : vector<8x128xf32> to vector<8x32xf32>
    %436 = arith.mulf %435, %407 : vector<8x32xf32>
    %437 = arith.addf %434, %436 : vector<8x32xf32>
    %cst_80 = arith.constant dense<0.000000e+00> : vector<8x384xf32>
    %438 = tpu.matmul %437, %1, %cst_80 {dimension_numbers = #tpu.dot_dimension_numbers<[1], [0], [0], [1], [0, 0, 1, 1], [], []>} : vector<8x32xf32>, vector<32x384xf32>, vector<8x384xf32> -> vector<8x384xf32>
    %439 = vector.broadcast %3 : vector<1x384xf32> to vector<8x384xf32>
    %440 = arith.addf %438, %439 : vector<8x384xf32>
    %441 = vector.extract_strided_slice %440 {offsets = [0, 0], sizes = [8, 128], strides = [1, 1]} : vector<8x384xf32> to vector<8x128xf32>
    %442 = vector.extract_strided_slice %403 {offsets = [0, 384], sizes = [8, 128], strides = [1, 1]} : vector<8x768xf32> to vector<8x128xf32>
    %443 = arith.addf %441, %442 : vector<8x128xf32>
    %444 = arith.negf %443 : vector<8x128xf32>
    %445 = math.exp %444 : vector<8x128xf32>
    %cst_81 = arith.constant 1.000000e+00 : f32
    %446 = vector.broadcast %cst_81 : f32 to vector<8x128xf32>
    %447 = arith.addf %446, %445 : vector<8x128xf32>
    %448 = arith.divf %446, %447 : vector<8x128xf32>
    %449 = vector.extract_strided_slice %440 {offsets = [0, 128], sizes = [8, 128], strides = [1, 1]} : vector<8x384xf32> to vector<8x128xf32>
    %450 = vector.extract_strided_slice %403 {offsets = [0, 512], sizes = [8, 128], strides = [1, 1]} : vector<8x768xf32> to vector<8x128xf32>
    %451 = arith.addf %449, %450 : vector<8x128xf32>
    %452 = arith.negf %451 : vector<8x128xf32>
    %453 = math.exp %452 : vector<8x128xf32>
    %cst_82 = arith.constant 1.000000e+00 : f32
    %454 = vector.broadcast %cst_82 : f32 to vector<8x128xf32>
    %455 = arith.addf %454, %453 : vector<8x128xf32>
    %456 = arith.divf %454, %455 : vector<8x128xf32>
    %457 = vector.extract_strided_slice %440 {offsets = [0, 256], sizes = [8, 128], strides = [1, 1]} : vector<8x384xf32> to vector<8x128xf32>
    %458 = vector.extract_strided_slice %403 {offsets = [0, 640], sizes = [8, 128], strides = [1, 1]} : vector<8x768xf32> to vector<8x128xf32>
    %459 = arith.mulf %448, %458 : vector<8x128xf32>
    %460 = arith.addf %457, %459 : vector<8x128xf32>
    %461 = math.tanh %460 : vector<8x128xf32>
    %462 = vector.extract_strided_slice %456 {offsets = [0, 0], sizes = [8, 32], strides = [1, 1]} : vector<8x128xf32> to vector<8x32xf32>
    %cst_83 = arith.constant 1.000000e+00 : f32
    %463 = vector.broadcast %cst_83 : f32 to vector<8x32xf32>
    %464 = arith.subf %463, %462 : vector<8x32xf32>
    %465 = vector.extract_strided_slice %461 {offsets = [0, 0], sizes = [8, 32], strides = [1, 1]} : vector<8x128xf32> to vector<8x32xf32>
    %466 = arith.mulf %464, %465 : vector<8x32xf32>
    %467 = vector.extract_strided_slice %456 {offsets = [0, 0], sizes = [8, 32], strides = [1, 1]} : vector<8x128xf32> to vector<8x32xf32>
    %468 = arith.mulf %467, %408 : vector<8x32xf32>
    %469 = arith.addf %466, %468 : vector<8x32xf32>
    %470 = tpu.concatenate %437, %469 in 1 : vector<8x32xf32>, vector<8x32xf32> -> vector<8x64xf32>
    %471 = arith.index_cast %c5_i32 : i32 to index
    %c0_84 = arith.constant 0 : index
    %c0_85 = arith.constant 0 : index
    %472 = vector.load %arg1[%471, %c0_84, %c0_85] : memref<12x8x1xf32, #tpu.memory_space<vmem>>, vector<1x8x1xf32>
    %473 = vector.shape_cast %472 : vector<1x8x1xf32> to vector<8x1xf32>
    %474 = arith.subf %470, %400 : vector<8x64xf32>
    %475 = vector.broadcast %473 : vector<8x1xf32> to vector<8x64xf32>
    %476 = arith.mulf %475, %474 : vector<8x64xf32>
    %477 = arith.addf %400, %476 : vector<8x64xf32>
    %c6_i32 = arith.constant 6 : i32
    %cst_86 = arith.constant dense<0.000000e+00> : vector<8x768xf32>
    %478 = tpu.matmul %477, %0, %cst_86 {dimension_numbers = #tpu.dot_dimension_numbers<[1], [0], [0], [1], [0, 0, 1, 1], [], []>} : vector<8x64xf32>, vector<64x768xf32>, vector<8x768xf32> -> vector<8x768xf32>
    %479 = vector.broadcast %2 : vector<1x768xf32> to vector<8x768xf32>
    %480 = arith.addf %478, %479 : vector<8x768xf32>
    %481 = arith.index_cast %c6_i32 : i32 to index
    %c0_87 = arith.constant 0 : index
    %c0_88 = arith.constant 0 : index
    %482 = vector.load %arg7[%481, %c0_87, %c0_88] : memref<12x8x384xf32, #tpu.memory_space<vmem>>, vector<1x8x384xf32>
    %483 = vector.shape_cast %482 : vector<1x8x384xf32> to vector<8x384xf32>
    %484 = vector.extract_strided_slice %477 {offsets = [0, 0], sizes = [8, 32], strides = [1, 1]} : vector<8x64xf32> to vector<8x32xf32>
    %485 = vector.extract_strided_slice %477 {offsets = [0, 32], sizes = [8, 32], strides = [1, 1]} : vector<8x64xf32> to vector<8x32xf32>
    %486 = vector.extract_strided_slice %483 {offsets = [0, 0], sizes = [8, 128], strides = [1, 1]} : vector<8x384xf32> to vector<8x128xf32>
    %487 = vector.extract_strided_slice %480 {offsets = [0, 0], sizes = [8, 128], strides = [1, 1]} : vector<8x768xf32> to vector<8x128xf32>
    %488 = arith.addf %486, %487 : vector<8x128xf32>
    %489 = arith.negf %488 : vector<8x128xf32>
    %490 = math.exp %489 : vector<8x128xf32>
    %cst_89 = arith.constant 1.000000e+00 : f32
    %491 = vector.broadcast %cst_89 : f32 to vector<8x128xf32>
    %492 = arith.addf %491, %490 : vector<8x128xf32>
    %493 = arith.divf %491, %492 : vector<8x128xf32>
    %494 = vector.extract_strided_slice %483 {offsets = [0, 128], sizes = [8, 128], strides = [1, 1]} : vector<8x384xf32> to vector<8x128xf32>
    %495 = vector.extract_strided_slice %480 {offsets = [0, 128], sizes = [8, 128], strides = [1, 1]} : vector<8x768xf32> to vector<8x128xf32>
    %496 = arith.addf %494, %495 : vector<8x128xf32>
    %497 = arith.negf %496 : vector<8x128xf32>
    %498 = math.exp %497 : vector<8x128xf32>
    %cst_90 = arith.constant 1.000000e+00 : f32
    %499 = vector.broadcast %cst_90 : f32 to vector<8x128xf32>
    %500 = arith.addf %499, %498 : vector<8x128xf32>
    %501 = arith.divf %499, %500 : vector<8x128xf32>
    %502 = vector.extract_strided_slice %483 {offsets = [0, 256], sizes = [8, 128], strides = [1, 1]} : vector<8x384xf32> to vector<8x128xf32>
    %503 = vector.extract_strided_slice %480 {offsets = [0, 256], sizes = [8, 128], strides = [1, 1]} : vector<8x768xf32> to vector<8x128xf32>
    %504 = arith.mulf %493, %503 : vector<8x128xf32>
    %505 = arith.addf %502, %504 : vector<8x128xf32>
    %506 = math.tanh %505 : vector<8x128xf32>
    %507 = vector.extract_strided_slice %501 {offsets = [0, 0], sizes = [8, 32], strides = [1, 1]} : vector<8x128xf32> to vector<8x32xf32>
    %cst_91 = arith.constant 1.000000e+00 : f32
    %508 = vector.broadcast %cst_91 : f32 to vector<8x32xf32>
    %509 = arith.subf %508, %507 : vector<8x32xf32>
    %510 = vector.extract_strided_slice %506 {offsets = [0, 0], sizes = [8, 32], strides = [1, 1]} : vector<8x128xf32> to vector<8x32xf32>
    %511 = arith.mulf %509, %510 : vector<8x32xf32>
    %512 = vector.extract_strided_slice %501 {offsets = [0, 0], sizes = [8, 32], strides = [1, 1]} : vector<8x128xf32> to vector<8x32xf32>
    %513 = arith.mulf %512, %484 : vector<8x32xf32>
    %514 = arith.addf %511, %513 : vector<8x32xf32>
    %cst_92 = arith.constant dense<0.000000e+00> : vector<8x384xf32>
    %515 = tpu.matmul %514, %1, %cst_92 {dimension_numbers = #tpu.dot_dimension_numbers<[1], [0], [0], [1], [0, 0, 1, 1], [], []>} : vector<8x32xf32>, vector<32x384xf32>, vector<8x384xf32> -> vector<8x384xf32>
    %516 = vector.broadcast %3 : vector<1x384xf32> to vector<8x384xf32>
    %517 = arith.addf %515, %516 : vector<8x384xf32>
    %518 = vector.extract_strided_slice %517 {offsets = [0, 0], sizes = [8, 128], strides = [1, 1]} : vector<8x384xf32> to vector<8x128xf32>
    %519 = vector.extract_strided_slice %480 {offsets = [0, 384], sizes = [8, 128], strides = [1, 1]} : vector<8x768xf32> to vector<8x128xf32>
    %520 = arith.addf %518, %519 : vector<8x128xf32>
    %521 = arith.negf %520 : vector<8x128xf32>
    %522 = math.exp %521 : vector<8x128xf32>
    %cst_93 = arith.constant 1.000000e+00 : f32
    %523 = vector.broadcast %cst_93 : f32 to vector<8x128xf32>
    %524 = arith.addf %523, %522 : vector<8x128xf32>
    %525 = arith.divf %523, %524 : vector<8x128xf32>
    %526 = vector.extract_strided_slice %517 {offsets = [0, 128], sizes = [8, 128], strides = [1, 1]} : vector<8x384xf32> to vector<8x128xf32>
    %527 = vector.extract_strided_slice %480 {offsets = [0, 512], sizes = [8, 128], strides = [1, 1]} : vector<8x768xf32> to vector<8x128xf32>
    %528 = arith.addf %526, %527 : vector<8x128xf32>
    %529 = arith.negf %528 : vector<8x128xf32>
    %530 = math.exp %529 : vector<8x128xf32>
    %cst_94 = arith.constant 1.000000e+00 : f32
    %531 = vector.broadcast %cst_94 : f32 to vector<8x128xf32>
    %532 = arith.addf %531, %530 : vector<8x128xf32>
    %533 = arith.divf %531, %532 : vector<8x128xf32>
    %534 = vector.extract_strided_slice %517 {offsets = [0, 256], sizes = [8, 128], strides = [1, 1]} : vector<8x384xf32> to vector<8x128xf32>
    %535 = vector.extract_strided_slice %480 {offsets = [0, 640], sizes = [8, 128], strides = [1, 1]} : vector<8x768xf32> to vector<8x128xf32>
    %536 = arith.mulf %525, %535 : vector<8x128xf32>
    %537 = arith.addf %534, %536 : vector<8x128xf32>
    %538 = math.tanh %537 : vector<8x128xf32>
    %539 = vector.extract_strided_slice %533 {offsets = [0, 0], sizes = [8, 32], strides = [1, 1]} : vector<8x128xf32> to vector<8x32xf32>
    %cst_95 = arith.constant 1.000000e+00 : f32
    %540 = vector.broadcast %cst_95 : f32 to vector<8x32xf32>
    %541 = arith.subf %540, %539 : vector<8x32xf32>
    %542 = vector.extract_strided_slice %538 {offsets = [0, 0], sizes = [8, 32], strides = [1, 1]} : vector<8x128xf32> to vector<8x32xf32>
    %543 = arith.mulf %541, %542 : vector<8x32xf32>
    %544 = vector.extract_strided_slice %533 {offsets = [0, 0], sizes = [8, 32], strides = [1, 1]} : vector<8x128xf32> to vector<8x32xf32>
    %545 = arith.mulf %544, %485 : vector<8x32xf32>
    %546 = arith.addf %543, %545 : vector<8x32xf32>
    %547 = tpu.concatenate %514, %546 in 1 : vector<8x32xf32>, vector<8x32xf32> -> vector<8x64xf32>
    %548 = arith.index_cast %c6_i32 : i32 to index
    %c0_96 = arith.constant 0 : index
    %c0_97 = arith.constant 0 : index
    %549 = vector.load %arg1[%548, %c0_96, %c0_97] : memref<12x8x1xf32, #tpu.memory_space<vmem>>, vector<1x8x1xf32>
    %550 = vector.shape_cast %549 : vector<1x8x1xf32> to vector<8x1xf32>
    %551 = arith.subf %547, %477 : vector<8x64xf32>
    %552 = vector.broadcast %550 : vector<8x1xf32> to vector<8x64xf32>
    %553 = arith.mulf %552, %551 : vector<8x64xf32>
    %554 = arith.addf %477, %553 : vector<8x64xf32>
    %c7_i32 = arith.constant 7 : i32
    %cst_98 = arith.constant dense<0.000000e+00> : vector<8x768xf32>
    %555 = tpu.matmul %554, %0, %cst_98 {dimension_numbers = #tpu.dot_dimension_numbers<[1], [0], [0], [1], [0, 0, 1, 1], [], []>} : vector<8x64xf32>, vector<64x768xf32>, vector<8x768xf32> -> vector<8x768xf32>
    %556 = vector.broadcast %2 : vector<1x768xf32> to vector<8x768xf32>
    %557 = arith.addf %555, %556 : vector<8x768xf32>
    %558 = arith.index_cast %c7_i32 : i32 to index
    %c0_99 = arith.constant 0 : index
    %c0_100 = arith.constant 0 : index
    %559 = vector.load %arg7[%558, %c0_99, %c0_100] : memref<12x8x384xf32, #tpu.memory_space<vmem>>, vector<1x8x384xf32>
    %560 = vector.shape_cast %559 : vector<1x8x384xf32> to vector<8x384xf32>
    %561 = vector.extract_strided_slice %554 {offsets = [0, 0], sizes = [8, 32], strides = [1, 1]} : vector<8x64xf32> to vector<8x32xf32>
    %562 = vector.extract_strided_slice %554 {offsets = [0, 32], sizes = [8, 32], strides = [1, 1]} : vector<8x64xf32> to vector<8x32xf32>
    %563 = vector.extract_strided_slice %560 {offsets = [0, 0], sizes = [8, 128], strides = [1, 1]} : vector<8x384xf32> to vector<8x128xf32>
    %564 = vector.extract_strided_slice %557 {offsets = [0, 0], sizes = [8, 128], strides = [1, 1]} : vector<8x768xf32> to vector<8x128xf32>
    %565 = arith.addf %563, %564 : vector<8x128xf32>
    %566 = arith.negf %565 : vector<8x128xf32>
    %567 = math.exp %566 : vector<8x128xf32>
    %cst_101 = arith.constant 1.000000e+00 : f32
    %568 = vector.broadcast %cst_101 : f32 to vector<8x128xf32>
    %569 = arith.addf %568, %567 : vector<8x128xf32>
    %570 = arith.divf %568, %569 : vector<8x128xf32>
    %571 = vector.extract_strided_slice %560 {offsets = [0, 128], sizes = [8, 128], strides = [1, 1]} : vector<8x384xf32> to vector<8x128xf32>
    %572 = vector.extract_strided_slice %557 {offsets = [0, 128], sizes = [8, 128], strides = [1, 1]} : vector<8x768xf32> to vector<8x128xf32>
    %573 = arith.addf %571, %572 : vector<8x128xf32>
    %574 = arith.negf %573 : vector<8x128xf32>
    %575 = math.exp %574 : vector<8x128xf32>
    %cst_102 = arith.constant 1.000000e+00 : f32
    %576 = vector.broadcast %cst_102 : f32 to vector<8x128xf32>
    %577 = arith.addf %576, %575 : vector<8x128xf32>
    %578 = arith.divf %576, %577 : vector<8x128xf32>
    %579 = vector.extract_strided_slice %560 {offsets = [0, 256], sizes = [8, 128], strides = [1, 1]} : vector<8x384xf32> to vector<8x128xf32>
    %580 = vector.extract_strided_slice %557 {offsets = [0, 256], sizes = [8, 128], strides = [1, 1]} : vector<8x768xf32> to vector<8x128xf32>
    %581 = arith.mulf %570, %580 : vector<8x128xf32>
    %582 = arith.addf %579, %581 : vector<8x128xf32>
    %583 = math.tanh %582 : vector<8x128xf32>
    %584 = vector.extract_strided_slice %578 {offsets = [0, 0], sizes = [8, 32], strides = [1, 1]} : vector<8x128xf32> to vector<8x32xf32>
    %cst_103 = arith.constant 1.000000e+00 : f32
    %585 = vector.broadcast %cst_103 : f32 to vector<8x32xf32>
    %586 = arith.subf %585, %584 : vector<8x32xf32>
    %587 = vector.extract_strided_slice %583 {offsets = [0, 0], sizes = [8, 32], strides = [1, 1]} : vector<8x128xf32> to vector<8x32xf32>
    %588 = arith.mulf %586, %587 : vector<8x32xf32>
    %589 = vector.extract_strided_slice %578 {offsets = [0, 0], sizes = [8, 32], strides = [1, 1]} : vector<8x128xf32> to vector<8x32xf32>
    %590 = arith.mulf %589, %561 : vector<8x32xf32>
    %591 = arith.addf %588, %590 : vector<8x32xf32>
    %cst_104 = arith.constant dense<0.000000e+00> : vector<8x384xf32>
    %592 = tpu.matmul %591, %1, %cst_104 {dimension_numbers = #tpu.dot_dimension_numbers<[1], [0], [0], [1], [0, 0, 1, 1], [], []>} : vector<8x32xf32>, vector<32x384xf32>, vector<8x384xf32> -> vector<8x384xf32>
    %593 = vector.broadcast %3 : vector<1x384xf32> to vector<8x384xf32>
    %594 = arith.addf %592, %593 : vector<8x384xf32>
    %595 = vector.extract_strided_slice %594 {offsets = [0, 0], sizes = [8, 128], strides = [1, 1]} : vector<8x384xf32> to vector<8x128xf32>
    %596 = vector.extract_strided_slice %557 {offsets = [0, 384], sizes = [8, 128], strides = [1, 1]} : vector<8x768xf32> to vector<8x128xf32>
    %597 = arith.addf %595, %596 : vector<8x128xf32>
    %598 = arith.negf %597 : vector<8x128xf32>
    %599 = math.exp %598 : vector<8x128xf32>
    %cst_105 = arith.constant 1.000000e+00 : f32
    %600 = vector.broadcast %cst_105 : f32 to vector<8x128xf32>
    %601 = arith.addf %600, %599 : vector<8x128xf32>
    %602 = arith.divf %600, %601 : vector<8x128xf32>
    %603 = vector.extract_strided_slice %594 {offsets = [0, 128], sizes = [8, 128], strides = [1, 1]} : vector<8x384xf32> to vector<8x128xf32>
    %604 = vector.extract_strided_slice %557 {offsets = [0, 512], sizes = [8, 128], strides = [1, 1]} : vector<8x768xf32> to vector<8x128xf32>
    %605 = arith.addf %603, %604 : vector<8x128xf32>
    %606 = arith.negf %605 : vector<8x128xf32>
    %607 = math.exp %606 : vector<8x128xf32>
    %cst_106 = arith.constant 1.000000e+00 : f32
    %608 = vector.broadcast %cst_106 : f32 to vector<8x128xf32>
    %609 = arith.addf %608, %607 : vector<8x128xf32>
    %610 = arith.divf %608, %609 : vector<8x128xf32>
    %611 = vector.extract_strided_slice %594 {offsets = [0, 256], sizes = [8, 128], strides = [1, 1]} : vector<8x384xf32> to vector<8x128xf32>
    %612 = vector.extract_strided_slice %557 {offsets = [0, 640], sizes = [8, 128], strides = [1, 1]} : vector<8x768xf32> to vector<8x128xf32>
    %613 = arith.mulf %602, %612 : vector<8x128xf32>
    %614 = arith.addf %611, %613 : vector<8x128xf32>
    %615 = math.tanh %614 : vector<8x128xf32>
    %616 = vector.extract_strided_slice %610 {offsets = [0, 0], sizes = [8, 32], strides = [1, 1]} : vector<8x128xf32> to vector<8x32xf32>
    %cst_107 = arith.constant 1.000000e+00 : f32
    %617 = vector.broadcast %cst_107 : f32 to vector<8x32xf32>
    %618 = arith.subf %617, %616 : vector<8x32xf32>
    %619 = vector.extract_strided_slice %615 {offsets = [0, 0], sizes = [8, 32], strides = [1, 1]} : vector<8x128xf32> to vector<8x32xf32>
    %620 = arith.mulf %618, %619 : vector<8x32xf32>
    %621 = vector.extract_strided_slice %610 {offsets = [0, 0], sizes = [8, 32], strides = [1, 1]} : vector<8x128xf32> to vector<8x32xf32>
    %622 = arith.mulf %621, %562 : vector<8x32xf32>
    %623 = arith.addf %620, %622 : vector<8x32xf32>
    %624 = tpu.concatenate %591, %623 in 1 : vector<8x32xf32>, vector<8x32xf32> -> vector<8x64xf32>
    %625 = arith.index_cast %c7_i32 : i32 to index
    %c0_108 = arith.constant 0 : index
    %c0_109 = arith.constant 0 : index
    %626 = vector.load %arg1[%625, %c0_108, %c0_109] : memref<12x8x1xf32, #tpu.memory_space<vmem>>, vector<1x8x1xf32>
    %627 = vector.shape_cast %626 : vector<1x8x1xf32> to vector<8x1xf32>
    %628 = arith.subf %624, %554 : vector<8x64xf32>
    %629 = vector.broadcast %627 : vector<8x1xf32> to vector<8x64xf32>
    %630 = arith.mulf %629, %628 : vector<8x64xf32>
    %631 = arith.addf %554, %630 : vector<8x64xf32>
    %c8_i32 = arith.constant 8 : i32
    %cst_110 = arith.constant dense<0.000000e+00> : vector<8x768xf32>
    %632 = tpu.matmul %631, %0, %cst_110 {dimension_numbers = #tpu.dot_dimension_numbers<[1], [0], [0], [1], [0, 0, 1, 1], [], []>} : vector<8x64xf32>, vector<64x768xf32>, vector<8x768xf32> -> vector<8x768xf32>
    %633 = vector.broadcast %2 : vector<1x768xf32> to vector<8x768xf32>
    %634 = arith.addf %632, %633 : vector<8x768xf32>
    %635 = arith.index_cast %c8_i32 : i32 to index
    %c0_111 = arith.constant 0 : index
    %c0_112 = arith.constant 0 : index
    %636 = vector.load %arg7[%635, %c0_111, %c0_112] : memref<12x8x384xf32, #tpu.memory_space<vmem>>, vector<1x8x384xf32>
    %637 = vector.shape_cast %636 : vector<1x8x384xf32> to vector<8x384xf32>
    %638 = vector.extract_strided_slice %631 {offsets = [0, 0], sizes = [8, 32], strides = [1, 1]} : vector<8x64xf32> to vector<8x32xf32>
    %639 = vector.extract_strided_slice %631 {offsets = [0, 32], sizes = [8, 32], strides = [1, 1]} : vector<8x64xf32> to vector<8x32xf32>
    %640 = vector.extract_strided_slice %637 {offsets = [0, 0], sizes = [8, 128], strides = [1, 1]} : vector<8x384xf32> to vector<8x128xf32>
    %641 = vector.extract_strided_slice %634 {offsets = [0, 0], sizes = [8, 128], strides = [1, 1]} : vector<8x768xf32> to vector<8x128xf32>
    %642 = arith.addf %640, %641 : vector<8x128xf32>
    %643 = arith.negf %642 : vector<8x128xf32>
    %644 = math.exp %643 : vector<8x128xf32>
    %cst_113 = arith.constant 1.000000e+00 : f32
    %645 = vector.broadcast %cst_113 : f32 to vector<8x128xf32>
    %646 = arith.addf %645, %644 : vector<8x128xf32>
    %647 = arith.divf %645, %646 : vector<8x128xf32>
    %648 = vector.extract_strided_slice %637 {offsets = [0, 128], sizes = [8, 128], strides = [1, 1]} : vector<8x384xf32> to vector<8x128xf32>
    %649 = vector.extract_strided_slice %634 {offsets = [0, 128], sizes = [8, 128], strides = [1, 1]} : vector<8x768xf32> to vector<8x128xf32>
    %650 = arith.addf %648, %649 : vector<8x128xf32>
    %651 = arith.negf %650 : vector<8x128xf32>
    %652 = math.exp %651 : vector<8x128xf32>
    %cst_114 = arith.constant 1.000000e+00 : f32
    %653 = vector.broadcast %cst_114 : f32 to vector<8x128xf32>
    %654 = arith.addf %653, %652 : vector<8x128xf32>
    %655 = arith.divf %653, %654 : vector<8x128xf32>
    %656 = vector.extract_strided_slice %637 {offsets = [0, 256], sizes = [8, 128], strides = [1, 1]} : vector<8x384xf32> to vector<8x128xf32>
    %657 = vector.extract_strided_slice %634 {offsets = [0, 256], sizes = [8, 128], strides = [1, 1]} : vector<8x768xf32> to vector<8x128xf32>
    %658 = arith.mulf %647, %657 : vector<8x128xf32>
    %659 = arith.addf %656, %658 : vector<8x128xf32>
    %660 = math.tanh %659 : vector<8x128xf32>
    %661 = vector.extract_strided_slice %655 {offsets = [0, 0], sizes = [8, 32], strides = [1, 1]} : vector<8x128xf32> to vector<8x32xf32>
    %cst_115 = arith.constant 1.000000e+00 : f32
    %662 = vector.broadcast %cst_115 : f32 to vector<8x32xf32>
    %663 = arith.subf %662, %661 : vector<8x32xf32>
    %664 = vector.extract_strided_slice %660 {offsets = [0, 0], sizes = [8, 32], strides = [1, 1]} : vector<8x128xf32> to vector<8x32xf32>
    %665 = arith.mulf %663, %664 : vector<8x32xf32>
    %666 = vector.extract_strided_slice %655 {offsets = [0, 0], sizes = [8, 32], strides = [1, 1]} : vector<8x128xf32> to vector<8x32xf32>
    %667 = arith.mulf %666, %638 : vector<8x32xf32>
    %668 = arith.addf %665, %667 : vector<8x32xf32>
    %cst_116 = arith.constant dense<0.000000e+00> : vector<8x384xf32>
    %669 = tpu.matmul %668, %1, %cst_116 {dimension_numbers = #tpu.dot_dimension_numbers<[1], [0], [0], [1], [0, 0, 1, 1], [], []>} : vector<8x32xf32>, vector<32x384xf32>, vector<8x384xf32> -> vector<8x384xf32>
    %670 = vector.broadcast %3 : vector<1x384xf32> to vector<8x384xf32>
    %671 = arith.addf %669, %670 : vector<8x384xf32>
    %672 = vector.extract_strided_slice %671 {offsets = [0, 0], sizes = [8, 128], strides = [1, 1]} : vector<8x384xf32> to vector<8x128xf32>
    %673 = vector.extract_strided_slice %634 {offsets = [0, 384], sizes = [8, 128], strides = [1, 1]} : vector<8x768xf32> to vector<8x128xf32>
    %674 = arith.addf %672, %673 : vector<8x128xf32>
    %675 = arith.negf %674 : vector<8x128xf32>
    %676 = math.exp %675 : vector<8x128xf32>
    %cst_117 = arith.constant 1.000000e+00 : f32
    %677 = vector.broadcast %cst_117 : f32 to vector<8x128xf32>
    %678 = arith.addf %677, %676 : vector<8x128xf32>
    %679 = arith.divf %677, %678 : vector<8x128xf32>
    %680 = vector.extract_strided_slice %671 {offsets = [0, 128], sizes = [8, 128], strides = [1, 1]} : vector<8x384xf32> to vector<8x128xf32>
    %681 = vector.extract_strided_slice %634 {offsets = [0, 512], sizes = [8, 128], strides = [1, 1]} : vector<8x768xf32> to vector<8x128xf32>
    %682 = arith.addf %680, %681 : vector<8x128xf32>
    %683 = arith.negf %682 : vector<8x128xf32>
    %684 = math.exp %683 : vector<8x128xf32>
    %cst_118 = arith.constant 1.000000e+00 : f32
    %685 = vector.broadcast %cst_118 : f32 to vector<8x128xf32>
    %686 = arith.addf %685, %684 : vector<8x128xf32>
    %687 = arith.divf %685, %686 : vector<8x128xf32>
    %688 = vector.extract_strided_slice %671 {offsets = [0, 256], sizes = [8, 128], strides = [1, 1]} : vector<8x384xf32> to vector<8x128xf32>
    %689 = vector.extract_strided_slice %634 {offsets = [0, 640], sizes = [8, 128], strides = [1, 1]} : vector<8x768xf32> to vector<8x128xf32>
    %690 = arith.mulf %679, %689 : vector<8x128xf32>
    %691 = arith.addf %688, %690 : vector<8x128xf32>
    %692 = math.tanh %691 : vector<8x128xf32>
    %693 = vector.extract_strided_slice %687 {offsets = [0, 0], sizes = [8, 32], strides = [1, 1]} : vector<8x128xf32> to vector<8x32xf32>
    %cst_119 = arith.constant 1.000000e+00 : f32
    %694 = vector.broadcast %cst_119 : f32 to vector<8x32xf32>
    %695 = arith.subf %694, %693 : vector<8x32xf32>
    %696 = vector.extract_strided_slice %692 {offsets = [0, 0], sizes = [8, 32], strides = [1, 1]} : vector<8x128xf32> to vector<8x32xf32>
    %697 = arith.mulf %695, %696 : vector<8x32xf32>
    %698 = vector.extract_strided_slice %687 {offsets = [0, 0], sizes = [8, 32], strides = [1, 1]} : vector<8x128xf32> to vector<8x32xf32>
    %699 = arith.mulf %698, %639 : vector<8x32xf32>
    %700 = arith.addf %697, %699 : vector<8x32xf32>
    %701 = tpu.concatenate %668, %700 in 1 : vector<8x32xf32>, vector<8x32xf32> -> vector<8x64xf32>
    %702 = arith.index_cast %c8_i32 : i32 to index
    %c0_120 = arith.constant 0 : index
    %c0_121 = arith.constant 0 : index
    %703 = vector.load %arg1[%702, %c0_120, %c0_121] : memref<12x8x1xf32, #tpu.memory_space<vmem>>, vector<1x8x1xf32>
    %704 = vector.shape_cast %703 : vector<1x8x1xf32> to vector<8x1xf32>
    %705 = arith.subf %701, %631 : vector<8x64xf32>
    %706 = vector.broadcast %704 : vector<8x1xf32> to vector<8x64xf32>
    %707 = arith.mulf %706, %705 : vector<8x64xf32>
    %708 = arith.addf %631, %707 : vector<8x64xf32>
    %c9_i32 = arith.constant 9 : i32
    %cst_122 = arith.constant dense<0.000000e+00> : vector<8x768xf32>
    %709 = tpu.matmul %708, %0, %cst_122 {dimension_numbers = #tpu.dot_dimension_numbers<[1], [0], [0], [1], [0, 0, 1, 1], [], []>} : vector<8x64xf32>, vector<64x768xf32>, vector<8x768xf32> -> vector<8x768xf32>
    %710 = vector.broadcast %2 : vector<1x768xf32> to vector<8x768xf32>
    %711 = arith.addf %709, %710 : vector<8x768xf32>
    %712 = arith.index_cast %c9_i32 : i32 to index
    %c0_123 = arith.constant 0 : index
    %c0_124 = arith.constant 0 : index
    %713 = vector.load %arg7[%712, %c0_123, %c0_124] : memref<12x8x384xf32, #tpu.memory_space<vmem>>, vector<1x8x384xf32>
    %714 = vector.shape_cast %713 : vector<1x8x384xf32> to vector<8x384xf32>
    %715 = vector.extract_strided_slice %708 {offsets = [0, 0], sizes = [8, 32], strides = [1, 1]} : vector<8x64xf32> to vector<8x32xf32>
    %716 = vector.extract_strided_slice %708 {offsets = [0, 32], sizes = [8, 32], strides = [1, 1]} : vector<8x64xf32> to vector<8x32xf32>
    %717 = vector.extract_strided_slice %714 {offsets = [0, 0], sizes = [8, 128], strides = [1, 1]} : vector<8x384xf32> to vector<8x128xf32>
    %718 = vector.extract_strided_slice %711 {offsets = [0, 0], sizes = [8, 128], strides = [1, 1]} : vector<8x768xf32> to vector<8x128xf32>
    %719 = arith.addf %717, %718 : vector<8x128xf32>
    %720 = arith.negf %719 : vector<8x128xf32>
    %721 = math.exp %720 : vector<8x128xf32>
    %cst_125 = arith.constant 1.000000e+00 : f32
    %722 = vector.broadcast %cst_125 : f32 to vector<8x128xf32>
    %723 = arith.addf %722, %721 : vector<8x128xf32>
    %724 = arith.divf %722, %723 : vector<8x128xf32>
    %725 = vector.extract_strided_slice %714 {offsets = [0, 128], sizes = [8, 128], strides = [1, 1]} : vector<8x384xf32> to vector<8x128xf32>
    %726 = vector.extract_strided_slice %711 {offsets = [0, 128], sizes = [8, 128], strides = [1, 1]} : vector<8x768xf32> to vector<8x128xf32>
    %727 = arith.addf %725, %726 : vector<8x128xf32>
    %728 = arith.negf %727 : vector<8x128xf32>
    %729 = math.exp %728 : vector<8x128xf32>
    %cst_126 = arith.constant 1.000000e+00 : f32
    %730 = vector.broadcast %cst_126 : f32 to vector<8x128xf32>
    %731 = arith.addf %730, %729 : vector<8x128xf32>
    %732 = arith.divf %730, %731 : vector<8x128xf32>
    %733 = vector.extract_strided_slice %714 {offsets = [0, 256], sizes = [8, 128], strides = [1, 1]} : vector<8x384xf32> to vector<8x128xf32>
    %734 = vector.extract_strided_slice %711 {offsets = [0, 256], sizes = [8, 128], strides = [1, 1]} : vector<8x768xf32> to vector<8x128xf32>
    %735 = arith.mulf %724, %734 : vector<8x128xf32>
    %736 = arith.addf %733, %735 : vector<8x128xf32>
    %737 = math.tanh %736 : vector<8x128xf32>
    %738 = vector.extract_strided_slice %732 {offsets = [0, 0], sizes = [8, 32], strides = [1, 1]} : vector<8x128xf32> to vector<8x32xf32>
    %cst_127 = arith.constant 1.000000e+00 : f32
    %739 = vector.broadcast %cst_127 : f32 to vector<8x32xf32>
    %740 = arith.subf %739, %738 : vector<8x32xf32>
    %741 = vector.extract_strided_slice %737 {offsets = [0, 0], sizes = [8, 32], strides = [1, 1]} : vector<8x128xf32> to vector<8x32xf32>
    %742 = arith.mulf %740, %741 : vector<8x32xf32>
    %743 = vector.extract_strided_slice %732 {offsets = [0, 0], sizes = [8, 32], strides = [1, 1]} : vector<8x128xf32> to vector<8x32xf32>
    %744 = arith.mulf %743, %715 : vector<8x32xf32>
    %745 = arith.addf %742, %744 : vector<8x32xf32>
    %cst_128 = arith.constant dense<0.000000e+00> : vector<8x384xf32>
    %746 = tpu.matmul %745, %1, %cst_128 {dimension_numbers = #tpu.dot_dimension_numbers<[1], [0], [0], [1], [0, 0, 1, 1], [], []>} : vector<8x32xf32>, vector<32x384xf32>, vector<8x384xf32> -> vector<8x384xf32>
    %747 = vector.broadcast %3 : vector<1x384xf32> to vector<8x384xf32>
    %748 = arith.addf %746, %747 : vector<8x384xf32>
    %749 = vector.extract_strided_slice %748 {offsets = [0, 0], sizes = [8, 128], strides = [1, 1]} : vector<8x384xf32> to vector<8x128xf32>
    %750 = vector.extract_strided_slice %711 {offsets = [0, 384], sizes = [8, 128], strides = [1, 1]} : vector<8x768xf32> to vector<8x128xf32>
    %751 = arith.addf %749, %750 : vector<8x128xf32>
    %752 = arith.negf %751 : vector<8x128xf32>
    %753 = math.exp %752 : vector<8x128xf32>
    %cst_129 = arith.constant 1.000000e+00 : f32
    %754 = vector.broadcast %cst_129 : f32 to vector<8x128xf32>
    %755 = arith.addf %754, %753 : vector<8x128xf32>
    %756 = arith.divf %754, %755 : vector<8x128xf32>
    %757 = vector.extract_strided_slice %748 {offsets = [0, 128], sizes = [8, 128], strides = [1, 1]} : vector<8x384xf32> to vector<8x128xf32>
    %758 = vector.extract_strided_slice %711 {offsets = [0, 512], sizes = [8, 128], strides = [1, 1]} : vector<8x768xf32> to vector<8x128xf32>
    %759 = arith.addf %757, %758 : vector<8x128xf32>
    %760 = arith.negf %759 : vector<8x128xf32>
    %761 = math.exp %760 : vector<8x128xf32>
    %cst_130 = arith.constant 1.000000e+00 : f32
    %762 = vector.broadcast %cst_130 : f32 to vector<8x128xf32>
    %763 = arith.addf %762, %761 : vector<8x128xf32>
    %764 = arith.divf %762, %763 : vector<8x128xf32>
    %765 = vector.extract_strided_slice %748 {offsets = [0, 256], sizes = [8, 128], strides = [1, 1]} : vector<8x384xf32> to vector<8x128xf32>
    %766 = vector.extract_strided_slice %711 {offsets = [0, 640], sizes = [8, 128], strides = [1, 1]} : vector<8x768xf32> to vector<8x128xf32>
    %767 = arith.mulf %756, %766 : vector<8x128xf32>
    %768 = arith.addf %765, %767 : vector<8x128xf32>
    %769 = math.tanh %768 : vector<8x128xf32>
    %770 = vector.extract_strided_slice %764 {offsets = [0, 0], sizes = [8, 32], strides = [1, 1]} : vector<8x128xf32> to vector<8x32xf32>
    %cst_131 = arith.constant 1.000000e+00 : f32
    %771 = vector.broadcast %cst_131 : f32 to vector<8x32xf32>
    %772 = arith.subf %771, %770 : vector<8x32xf32>
    %773 = vector.extract_strided_slice %769 {offsets = [0, 0], sizes = [8, 32], strides = [1, 1]} : vector<8x128xf32> to vector<8x32xf32>
    %774 = arith.mulf %772, %773 : vector<8x32xf32>
    %775 = vector.extract_strided_slice %764 {offsets = [0, 0], sizes = [8, 32], strides = [1, 1]} : vector<8x128xf32> to vector<8x32xf32>
    %776 = arith.mulf %775, %716 : vector<8x32xf32>
    %777 = arith.addf %774, %776 : vector<8x32xf32>
    %778 = tpu.concatenate %745, %777 in 1 : vector<8x32xf32>, vector<8x32xf32> -> vector<8x64xf32>
    %779 = arith.index_cast %c9_i32 : i32 to index
    %c0_132 = arith.constant 0 : index
    %c0_133 = arith.constant 0 : index
    %780 = vector.load %arg1[%779, %c0_132, %c0_133] : memref<12x8x1xf32, #tpu.memory_space<vmem>>, vector<1x8x1xf32>
    %781 = vector.shape_cast %780 : vector<1x8x1xf32> to vector<8x1xf32>
    %782 = arith.subf %778, %708 : vector<8x64xf32>
    %783 = vector.broadcast %781 : vector<8x1xf32> to vector<8x64xf32>
    %784 = arith.mulf %783, %782 : vector<8x64xf32>
    %785 = arith.addf %708, %784 : vector<8x64xf32>
    %c10_i32 = arith.constant 10 : i32
    %cst_134 = arith.constant dense<0.000000e+00> : vector<8x768xf32>
    %786 = tpu.matmul %785, %0, %cst_134 {dimension_numbers = #tpu.dot_dimension_numbers<[1], [0], [0], [1], [0, 0, 1, 1], [], []>} : vector<8x64xf32>, vector<64x768xf32>, vector<8x768xf32> -> vector<8x768xf32>
    %787 = vector.broadcast %2 : vector<1x768xf32> to vector<8x768xf32>
    %788 = arith.addf %786, %787 : vector<8x768xf32>
    %789 = arith.index_cast %c10_i32 : i32 to index
    %c0_135 = arith.constant 0 : index
    %c0_136 = arith.constant 0 : index
    %790 = vector.load %arg7[%789, %c0_135, %c0_136] : memref<12x8x384xf32, #tpu.memory_space<vmem>>, vector<1x8x384xf32>
    %791 = vector.shape_cast %790 : vector<1x8x384xf32> to vector<8x384xf32>
    %792 = vector.extract_strided_slice %785 {offsets = [0, 0], sizes = [8, 32], strides = [1, 1]} : vector<8x64xf32> to vector<8x32xf32>
    %793 = vector.extract_strided_slice %785 {offsets = [0, 32], sizes = [8, 32], strides = [1, 1]} : vector<8x64xf32> to vector<8x32xf32>
    %794 = vector.extract_strided_slice %791 {offsets = [0, 0], sizes = [8, 128], strides = [1, 1]} : vector<8x384xf32> to vector<8x128xf32>
    %795 = vector.extract_strided_slice %788 {offsets = [0, 0], sizes = [8, 128], strides = [1, 1]} : vector<8x768xf32> to vector<8x128xf32>
    %796 = arith.addf %794, %795 : vector<8x128xf32>
    %797 = arith.negf %796 : vector<8x128xf32>
    %798 = math.exp %797 : vector<8x128xf32>
    %cst_137 = arith.constant 1.000000e+00 : f32
    %799 = vector.broadcast %cst_137 : f32 to vector<8x128xf32>
    %800 = arith.addf %799, %798 : vector<8x128xf32>
    %801 = arith.divf %799, %800 : vector<8x128xf32>
    %802 = vector.extract_strided_slice %791 {offsets = [0, 128], sizes = [8, 128], strides = [1, 1]} : vector<8x384xf32> to vector<8x128xf32>
    %803 = vector.extract_strided_slice %788 {offsets = [0, 128], sizes = [8, 128], strides = [1, 1]} : vector<8x768xf32> to vector<8x128xf32>
    %804 = arith.addf %802, %803 : vector<8x128xf32>
    %805 = arith.negf %804 : vector<8x128xf32>
    %806 = math.exp %805 : vector<8x128xf32>
    %cst_138 = arith.constant 1.000000e+00 : f32
    %807 = vector.broadcast %cst_138 : f32 to vector<8x128xf32>
    %808 = arith.addf %807, %806 : vector<8x128xf32>
    %809 = arith.divf %807, %808 : vector<8x128xf32>
    %810 = vector.extract_strided_slice %791 {offsets = [0, 256], sizes = [8, 128], strides = [1, 1]} : vector<8x384xf32> to vector<8x128xf32>
    %811 = vector.extract_strided_slice %788 {offsets = [0, 256], sizes = [8, 128], strides = [1, 1]} : vector<8x768xf32> to vector<8x128xf32>
    %812 = arith.mulf %801, %811 : vector<8x128xf32>
    %813 = arith.addf %810, %812 : vector<8x128xf32>
    %814 = math.tanh %813 : vector<8x128xf32>
    %815 = vector.extract_strided_slice %809 {offsets = [0, 0], sizes = [8, 32], strides = [1, 1]} : vector<8x128xf32> to vector<8x32xf32>
    %cst_139 = arith.constant 1.000000e+00 : f32
    %816 = vector.broadcast %cst_139 : f32 to vector<8x32xf32>
    %817 = arith.subf %816, %815 : vector<8x32xf32>
    %818 = vector.extract_strided_slice %814 {offsets = [0, 0], sizes = [8, 32], strides = [1, 1]} : vector<8x128xf32> to vector<8x32xf32>
    %819 = arith.mulf %817, %818 : vector<8x32xf32>
    %820 = vector.extract_strided_slice %809 {offsets = [0, 0], sizes = [8, 32], strides = [1, 1]} : vector<8x128xf32> to vector<8x32xf32>
    %821 = arith.mulf %820, %792 : vector<8x32xf32>
    %822 = arith.addf %819, %821 : vector<8x32xf32>
    %cst_140 = arith.constant dense<0.000000e+00> : vector<8x384xf32>
    %823 = tpu.matmul %822, %1, %cst_140 {dimension_numbers = #tpu.dot_dimension_numbers<[1], [0], [0], [1], [0, 0, 1, 1], [], []>} : vector<8x32xf32>, vector<32x384xf32>, vector<8x384xf32> -> vector<8x384xf32>
    %824 = vector.broadcast %3 : vector<1x384xf32> to vector<8x384xf32>
    %825 = arith.addf %823, %824 : vector<8x384xf32>
    %826 = vector.extract_strided_slice %825 {offsets = [0, 0], sizes = [8, 128], strides = [1, 1]} : vector<8x384xf32> to vector<8x128xf32>
    %827 = vector.extract_strided_slice %788 {offsets = [0, 384], sizes = [8, 128], strides = [1, 1]} : vector<8x768xf32> to vector<8x128xf32>
    %828 = arith.addf %826, %827 : vector<8x128xf32>
    %829 = arith.negf %828 : vector<8x128xf32>
    %830 = math.exp %829 : vector<8x128xf32>
    %cst_141 = arith.constant 1.000000e+00 : f32
    %831 = vector.broadcast %cst_141 : f32 to vector<8x128xf32>
    %832 = arith.addf %831, %830 : vector<8x128xf32>
    %833 = arith.divf %831, %832 : vector<8x128xf32>
    %834 = vector.extract_strided_slice %825 {offsets = [0, 128], sizes = [8, 128], strides = [1, 1]} : vector<8x384xf32> to vector<8x128xf32>
    %835 = vector.extract_strided_slice %788 {offsets = [0, 512], sizes = [8, 128], strides = [1, 1]} : vector<8x768xf32> to vector<8x128xf32>
    %836 = arith.addf %834, %835 : vector<8x128xf32>
    %837 = arith.negf %836 : vector<8x128xf32>
    %838 = math.exp %837 : vector<8x128xf32>
    %cst_142 = arith.constant 1.000000e+00 : f32
    %839 = vector.broadcast %cst_142 : f32 to vector<8x128xf32>
    %840 = arith.addf %839, %838 : vector<8x128xf32>
    %841 = arith.divf %839, %840 : vector<8x128xf32>
    %842 = vector.extract_strided_slice %825 {offsets = [0, 256], sizes = [8, 128], strides = [1, 1]} : vector<8x384xf32> to vector<8x128xf32>
    %843 = vector.extract_strided_slice %788 {offsets = [0, 640], sizes = [8, 128], strides = [1, 1]} : vector<8x768xf32> to vector<8x128xf32>
    %844 = arith.mulf %833, %843 : vector<8x128xf32>
    %845 = arith.addf %842, %844 : vector<8x128xf32>
    %846 = math.tanh %845 : vector<8x128xf32>
    %847 = vector.extract_strided_slice %841 {offsets = [0, 0], sizes = [8, 32], strides = [1, 1]} : vector<8x128xf32> to vector<8x32xf32>
    %cst_143 = arith.constant 1.000000e+00 : f32
    %848 = vector.broadcast %cst_143 : f32 to vector<8x32xf32>
    %849 = arith.subf %848, %847 : vector<8x32xf32>
    %850 = vector.extract_strided_slice %846 {offsets = [0, 0], sizes = [8, 32], strides = [1, 1]} : vector<8x128xf32> to vector<8x32xf32>
    %851 = arith.mulf %849, %850 : vector<8x32xf32>
    %852 = vector.extract_strided_slice %841 {offsets = [0, 0], sizes = [8, 32], strides = [1, 1]} : vector<8x128xf32> to vector<8x32xf32>
    %853 = arith.mulf %852, %793 : vector<8x32xf32>
    %854 = arith.addf %851, %853 : vector<8x32xf32>
    %855 = tpu.concatenate %822, %854 in 1 : vector<8x32xf32>, vector<8x32xf32> -> vector<8x64xf32>
    %856 = arith.index_cast %c10_i32 : i32 to index
    %c0_144 = arith.constant 0 : index
    %c0_145 = arith.constant 0 : index
    %857 = vector.load %arg1[%856, %c0_144, %c0_145] : memref<12x8x1xf32, #tpu.memory_space<vmem>>, vector<1x8x1xf32>
    %858 = vector.shape_cast %857 : vector<1x8x1xf32> to vector<8x1xf32>
    %859 = arith.subf %855, %785 : vector<8x64xf32>
    %860 = vector.broadcast %858 : vector<8x1xf32> to vector<8x64xf32>
    %861 = arith.mulf %860, %859 : vector<8x64xf32>
    %862 = arith.addf %785, %861 : vector<8x64xf32>
    %c11_i32 = arith.constant 11 : i32
    %cst_146 = arith.constant dense<0.000000e+00> : vector<8x768xf32>
    %863 = tpu.matmul %862, %0, %cst_146 {dimension_numbers = #tpu.dot_dimension_numbers<[1], [0], [0], [1], [0, 0, 1, 1], [], []>} : vector<8x64xf32>, vector<64x768xf32>, vector<8x768xf32> -> vector<8x768xf32>
    %864 = vector.broadcast %2 : vector<1x768xf32> to vector<8x768xf32>
    %865 = arith.addf %863, %864 : vector<8x768xf32>
    %866 = arith.index_cast %c11_i32 : i32 to index
    %c0_147 = arith.constant 0 : index
    %c0_148 = arith.constant 0 : index
    %867 = vector.load %arg7[%866, %c0_147, %c0_148] : memref<12x8x384xf32, #tpu.memory_space<vmem>>, vector<1x8x384xf32>
    %868 = vector.shape_cast %867 : vector<1x8x384xf32> to vector<8x384xf32>
    %869 = vector.extract_strided_slice %862 {offsets = [0, 0], sizes = [8, 32], strides = [1, 1]} : vector<8x64xf32> to vector<8x32xf32>
    %870 = vector.extract_strided_slice %862 {offsets = [0, 32], sizes = [8, 32], strides = [1, 1]} : vector<8x64xf32> to vector<8x32xf32>
    %871 = vector.extract_strided_slice %868 {offsets = [0, 0], sizes = [8, 128], strides = [1, 1]} : vector<8x384xf32> to vector<8x128xf32>
    %872 = vector.extract_strided_slice %865 {offsets = [0, 0], sizes = [8, 128], strides = [1, 1]} : vector<8x768xf32> to vector<8x128xf32>
    %873 = arith.addf %871, %872 : vector<8x128xf32>
    %874 = arith.negf %873 : vector<8x128xf32>
    %875 = math.exp %874 : vector<8x128xf32>
    %cst_149 = arith.constant 1.000000e+00 : f32
    %876 = vector.broadcast %cst_149 : f32 to vector<8x128xf32>
    %877 = arith.addf %876, %875 : vector<8x128xf32>
    %878 = arith.divf %876, %877 : vector<8x128xf32>
    %879 = vector.extract_strided_slice %868 {offsets = [0, 128], sizes = [8, 128], strides = [1, 1]} : vector<8x384xf32> to vector<8x128xf32>
    %880 = vector.extract_strided_slice %865 {offsets = [0, 128], sizes = [8, 128], strides = [1, 1]} : vector<8x768xf32> to vector<8x128xf32>
    %881 = arith.addf %879, %880 : vector<8x128xf32>
    %882 = arith.negf %881 : vector<8x128xf32>
    %883 = math.exp %882 : vector<8x128xf32>
    %cst_150 = arith.constant 1.000000e+00 : f32
    %884 = vector.broadcast %cst_150 : f32 to vector<8x128xf32>
    %885 = arith.addf %884, %883 : vector<8x128xf32>
    %886 = arith.divf %884, %885 : vector<8x128xf32>
    %887 = vector.extract_strided_slice %868 {offsets = [0, 256], sizes = [8, 128], strides = [1, 1]} : vector<8x384xf32> to vector<8x128xf32>
    %888 = vector.extract_strided_slice %865 {offsets = [0, 256], sizes = [8, 128], strides = [1, 1]} : vector<8x768xf32> to vector<8x128xf32>
    %889 = arith.mulf %878, %888 : vector<8x128xf32>
    %890 = arith.addf %887, %889 : vector<8x128xf32>
    %891 = math.tanh %890 : vector<8x128xf32>
    %892 = vector.extract_strided_slice %886 {offsets = [0, 0], sizes = [8, 32], strides = [1, 1]} : vector<8x128xf32> to vector<8x32xf32>
    %cst_151 = arith.constant 1.000000e+00 : f32
    %893 = vector.broadcast %cst_151 : f32 to vector<8x32xf32>
    %894 = arith.subf %893, %892 : vector<8x32xf32>
    %895 = vector.extract_strided_slice %891 {offsets = [0, 0], sizes = [8, 32], strides = [1, 1]} : vector<8x128xf32> to vector<8x32xf32>
    %896 = arith.mulf %894, %895 : vector<8x32xf32>
    %897 = vector.extract_strided_slice %886 {offsets = [0, 0], sizes = [8, 32], strides = [1, 1]} : vector<8x128xf32> to vector<8x32xf32>
    %898 = arith.mulf %897, %869 : vector<8x32xf32>
    %899 = arith.addf %896, %898 : vector<8x32xf32>
    %cst_152 = arith.constant dense<0.000000e+00> : vector<8x384xf32>
    %900 = tpu.matmul %899, %1, %cst_152 {dimension_numbers = #tpu.dot_dimension_numbers<[1], [0], [0], [1], [0, 0, 1, 1], [], []>} : vector<8x32xf32>, vector<32x384xf32>, vector<8x384xf32> -> vector<8x384xf32>
    %901 = vector.broadcast %3 : vector<1x384xf32> to vector<8x384xf32>
    %902 = arith.addf %900, %901 : vector<8x384xf32>
    %903 = vector.extract_strided_slice %902 {offsets = [0, 0], sizes = [8, 128], strides = [1, 1]} : vector<8x384xf32> to vector<8x128xf32>
    %904 = vector.extract_strided_slice %865 {offsets = [0, 384], sizes = [8, 128], strides = [1, 1]} : vector<8x768xf32> to vector<8x128xf32>
    %905 = arith.addf %903, %904 : vector<8x128xf32>
    %906 = arith.negf %905 : vector<8x128xf32>
    %907 = math.exp %906 : vector<8x128xf32>
    %cst_153 = arith.constant 1.000000e+00 : f32
    %908 = vector.broadcast %cst_153 : f32 to vector<8x128xf32>
    %909 = arith.addf %908, %907 : vector<8x128xf32>
    %910 = arith.divf %908, %909 : vector<8x128xf32>
    %911 = vector.extract_strided_slice %902 {offsets = [0, 128], sizes = [8, 128], strides = [1, 1]} : vector<8x384xf32> to vector<8x128xf32>
    %912 = vector.extract_strided_slice %865 {offsets = [0, 512], sizes = [8, 128], strides = [1, 1]} : vector<8x768xf32> to vector<8x128xf32>
    %913 = arith.addf %911, %912 : vector<8x128xf32>
    %914 = arith.negf %913 : vector<8x128xf32>
    %915 = math.exp %914 : vector<8x128xf32>
    %cst_154 = arith.constant 1.000000e+00 : f32
    %916 = vector.broadcast %cst_154 : f32 to vector<8x128xf32>
    %917 = arith.addf %916, %915 : vector<8x128xf32>
    %918 = arith.divf %916, %917 : vector<8x128xf32>
    %919 = vector.extract_strided_slice %902 {offsets = [0, 256], sizes = [8, 128], strides = [1, 1]} : vector<8x384xf32> to vector<8x128xf32>
    %920 = vector.extract_strided_slice %865 {offsets = [0, 640], sizes = [8, 128], strides = [1, 1]} : vector<8x768xf32> to vector<8x128xf32>
    %921 = arith.mulf %910, %920 : vector<8x128xf32>
    %922 = arith.addf %919, %921 : vector<8x128xf32>
    %923 = math.tanh %922 : vector<8x128xf32>
    %924 = vector.extract_strided_slice %918 {offsets = [0, 0], sizes = [8, 32], strides = [1, 1]} : vector<8x128xf32> to vector<8x32xf32>
    %cst_155 = arith.constant 1.000000e+00 : f32
    %925 = vector.broadcast %cst_155 : f32 to vector<8x32xf32>
    %926 = arith.subf %925, %924 : vector<8x32xf32>
    %927 = vector.extract_strided_slice %923 {offsets = [0, 0], sizes = [8, 32], strides = [1, 1]} : vector<8x128xf32> to vector<8x32xf32>
    %928 = arith.mulf %926, %927 : vector<8x32xf32>
    %929 = vector.extract_strided_slice %918 {offsets = [0, 0], sizes = [8, 32], strides = [1, 1]} : vector<8x128xf32> to vector<8x32xf32>
    %930 = arith.mulf %929, %870 : vector<8x32xf32>
    %931 = arith.addf %928, %930 : vector<8x32xf32>
    %932 = tpu.concatenate %899, %931 in 1 : vector<8x32xf32>, vector<8x32xf32> -> vector<8x64xf32>
    %933 = arith.index_cast %c11_i32 : i32 to index
    %c0_156 = arith.constant 0 : index
    %c0_157 = arith.constant 0 : index
    %934 = vector.load %arg1[%933, %c0_156, %c0_157] : memref<12x8x1xf32, #tpu.memory_space<vmem>>, vector<1x8x1xf32>
    %935 = vector.shape_cast %934 : vector<1x8x1xf32> to vector<8x1xf32>
    %936 = arith.subf %932, %862 : vector<8x64xf32>
    %937 = vector.broadcast %935 : vector<8x1xf32> to vector<8x64xf32>
    %938 = arith.mulf %937, %936 : vector<8x64xf32>
    %939 = arith.addf %862, %938 : vector<8x64xf32>
    %c12_i32 = arith.constant 12 : i32
    %940 = vector.extract_strided_slice %939 {offsets = [0, 32], sizes = [8, 32], strides = [1, 1]} : vector<8x64xf32> to vector<8x32xf32>
    %c8 = arith.constant 8 : index
    %c0_158 = arith.constant 0 : index
    %941 = vector.load %arg5[%c8, %c0_158] : memref<16x768xf32, #tpu.memory_space<vmem>>, vector<1x32xf32>
    %c10 = arith.constant 10 : index
    %c0_159 = arith.constant 0 : index
    %942 = vector.load %arg5[%c10, %c0_159] : memref<16x768xf32, #tpu.memory_space<vmem>>, vector<1x1xf32>
    %943 = vector.broadcast %941 : vector<1x32xf32> to vector<8x32xf32>
    %944 = arith.mulf %940, %943 : vector<8x32xf32>
    %cst_160 = arith.constant dense<0.000000e+00> : vector<8xf32>
    %945 = vector.multi_reduction <add>, %944, %cst_160 [1] : vector<8x32xf32> to vector<8xf32>
    %946 = vector.shape_cast %945 : vector<8xf32> to vector<8x1xf32>
    %947 = vector.broadcast %942 : vector<1x1xf32> to vector<8x1xf32>
    %948 = arith.addf %946, %947 : vector<8x1xf32>
    %cst_161 = arith.constant 0.000000e+00 : f32
    %949 = vector.broadcast %cst_161 : f32 to vector<8x1xf32>
    %950 = arith.maximumf %948, %949 : vector<8x1xf32>
    %c4 = arith.constant 4 : index
    %c0_162 = arith.constant 0 : index
    %951 = vector.load %arg5[%c4, %c0_162] : memref<16x768xf32, #tpu.memory_space<vmem>>, vector<1x384xf32>
    %c5 = arith.constant 5 : index
    %c0_163 = arith.constant 0 : index
    %952 = vector.load %arg5[%c5, %c0_163] : memref<16x768xf32, #tpu.memory_space<vmem>>, vector<1x384xf32>
    %c6 = arith.constant 6 : index
    %c0_164 = arith.constant 0 : index
    %953 = vector.load %arg5[%c6, %c0_164] : memref<16x768xf32, #tpu.memory_space<vmem>>, vector<1x384xf32>
    %c7 = arith.constant 7 : index
    %c0_165 = arith.constant 0 : index
    %954 = vector.load %arg5[%c7, %c0_165] : memref<16x768xf32, #tpu.memory_space<vmem>>, vector<1x384xf32>
    %955 = vector.broadcast %950 : vector<8x1xf32> to vector<8x384xf32>
    %956 = vector.broadcast %951 : vector<1x384xf32> to vector<8x384xf32>
    %957 = arith.mulf %955, %956 : vector<8x384xf32>
    %c0_166 = arith.constant 0 : index
    %c0_167 = arith.constant 0 : index
    %958 = vector.load %arg2[%c0_166, %c0_167] : memref<8x2xf32, #tpu.memory_space<vmem>>, vector<8x1xf32>
    %959 = vector.broadcast %958 : vector<8x1xf32> to vector<8x384xf32>
    %960 = vector.broadcast %952 : vector<1x384xf32> to vector<8x384xf32>
    %961 = arith.mulf %959, %960 : vector<8x384xf32>
    %962 = arith.addf %957, %961 : vector<8x384xf32>
    %c0_168 = arith.constant 0 : index
    %c1_169 = arith.constant 1 : index
    %963 = vector.load %arg2[%c0_168, %c1_169] : memref<8x2xf32, #tpu.memory_space<vmem>>, vector<8x1xf32>
    %964 = vector.broadcast %963 : vector<8x1xf32> to vector<8x384xf32>
    %965 = vector.broadcast %953 : vector<1x384xf32> to vector<8x384xf32>
    %966 = arith.mulf %964, %965 : vector<8x384xf32>
    %967 = arith.addf %962, %966 : vector<8x384xf32>
    %968 = vector.broadcast %954 : vector<1x384xf32> to vector<8x384xf32>
    %969 = arith.addf %967, %968 : vector<8x384xf32>
    %970 = vector.extract_strided_slice %969 {offsets = [0, 0], sizes = [8, 128], strides = [1, 1]} : vector<8x384xf32> to vector<8x128xf32>
    %971 = arith.negf %970 : vector<8x128xf32>
    %972 = math.exp %971 : vector<8x128xf32>
    %cst_170 = arith.constant 1.000000e+00 : f32
    %973 = vector.broadcast %cst_170 : f32 to vector<8x128xf32>
    %974 = arith.addf %973, %972 : vector<8x128xf32>
    %975 = arith.divf %973, %974 : vector<8x128xf32>
    %976 = vector.extract_strided_slice %969 {offsets = [0, 128], sizes = [8, 128], strides = [1, 1]} : vector<8x384xf32> to vector<8x128xf32>
    %977 = math.tanh %976 : vector<8x128xf32>
    %978 = vector.extract_strided_slice %969 {offsets = [0, 256], sizes = [8, 128], strides = [1, 1]} : vector<8x384xf32> to vector<8x128xf32>
    %979 = arith.negf %978 : vector<8x128xf32>
    %980 = math.exp %979 : vector<8x128xf32>
    %cst_171 = arith.constant 1.000000e+00 : f32
    %981 = vector.broadcast %cst_171 : f32 to vector<8x128xf32>
    %982 = arith.addf %981, %980 : vector<8x128xf32>
    %983 = arith.divf %981, %982 : vector<8x128xf32>
    %984 = arith.mulf %975, %977 : vector<8x128xf32>
    %985 = math.tanh %984 : vector<8x128xf32>
    %986 = arith.mulf %983, %985 : vector<8x128xf32>
    %c9 = arith.constant 9 : index
    %c0_172 = arith.constant 0 : index
    %987 = vector.load %arg5[%c9, %c0_172] : memref<16x768xf32, #tpu.memory_space<vmem>>, vector<1x128xf32>
    %c11 = arith.constant 11 : index
    %c0_173 = arith.constant 0 : index
    %988 = vector.load %arg5[%c11, %c0_173] : memref<16x768xf32, #tpu.memory_space<vmem>>, vector<1x1xf32>
    %989 = vector.broadcast %987 : vector<1x128xf32> to vector<8x128xf32>
    %990 = arith.mulf %986, %989 : vector<8x128xf32>
    %cst_174 = arith.constant dense<0.000000e+00> : vector<8xf32>
    %991 = vector.multi_reduction <add>, %990, %cst_174 [1] : vector<8x128xf32> to vector<8xf32>
    %992 = vector.shape_cast %991 : vector<8xf32> to vector<8x1xf32>
    %993 = vector.broadcast %988 : vector<1x1xf32> to vector<8x1xf32>
    %994 = arith.addf %992, %993 : vector<8x1xf32>
    %cst_175 = arith.constant 1.000000e-01 : f32
    %995 = vector.broadcast %cst_175 : f32 to vector<8x1xf32>
    %996 = arith.mulf %995, %994 : vector<8x1xf32>
    %997 = arith.addf %950, %996 : vector<8x1xf32>
    %c0_176 = arith.constant 0 : index
    %c0_177 = arith.constant 0 : index
    %998 = vector.load %arg6[%c0_176, %c0_177] : memref<8x1xf32, #tpu.memory_space<vmem>>, vector<8x1xf32>
    tpu.vector_store %arg6[%c0_176, %c0_177], %997 {strides = array<i32>} : memref<8x1xf32, #tpu.memory_space<vmem>>, vector<8x1xf32>,
    return
  }
}

</mosaic_0001>

<bundles_post_ra>
// kernel: lstm_v2b_forward.1
= control target key start
LH: loop header
LB: loop body
LE: loop exit
PB: predicated region body
PF: predicated region fallthrough
CT: control target
= control target key end

     0   :  { %v8239_v3 = vmov 0.0   ;;  %v6911_v8 = vmov 0   ;;  %vm592_vm0 = vcmask 261120   ;;  %vm6913_vm1 = vmmov 0   ;;  %s6914_s9 = smov 32   ;;  %s6915_s28 = smov 96   ;;  %s8230_s3 = inlined_call_operand.vmem [shape: f32[64,768], index: 3, kind: input, shape index: {}]   ;;  %s8231_s0 = inlined_call_operand.vmem [shape: f32[12,8,1], index: 0, kind: input, shape index: {}]   ;;  %s8232_s1 = inlined_call_operand.vmem [shape: f32[12,8,1], index: 1, kind: input, shape index: {}]   ;;  %s8233_s4 = inlined_call_operand.vmem [shape: f32[32,384], index: 4, kind: input, shape index: {}]   ;;  %s8234_s5 = inlined_call_operand.vmem [shape: f32[16,768], index: 5, kind: input, shape index: {}]   ;;  %s8235_s2 = inlined_call_operand.vmem [shape: f32[8,2], index: 2, kind: input, shape index: {}]   ;;  %s8236_s6 = inlined_call_operand.vmem [shape: f32[8,1], index: 6, kind: output, shape index: {}]  }
   0x1   :  { %v24_v0 = vld [vmem:[%s8230_s3 + $0x8] sm:$0xff]  ;;  %v30_v1 = vld [vmem:[%s8230_s3 + $0x38] sm:$0xff]  ;;  %v23_v2 = vld [vmem:[%s8230_s3] sm:$0xff]  ;;  %403 = vmatprep.mubr.f32.mxu0 %v8239_v3  ;;  %474 = vmatprep.mubr.f32.mxu1 %v8239_v3  ;;  %vm335_vm2 = vcmask 523264   ;;  %vm5580_vm3 = vcmask 7168  }
   0x2   :  { %v6963_v4 = vpack.c.bf16 %v30_v1, %v24_v0  ;;  %v29_v5 = vld [vmem:[%s8230_s3 + $0x30] sm:$0xff]  ;;  %v36_v6 = vld [vmem:[%s8230_s3 + $0x68] sm:$0xff]  ;;  %v42_v7 = vld [vmem:[%s8230_s3 + $0x98] sm:$0xff]  ;;  %6655 = vset.pattern.permute.xlu0 %v6911_v8  ;;  %6656 = vset.pattern.permute.xlu1 %v6911_v8 }
   0x3   :  { %v6974_v9 = vpack.c.bf16 %v29_v5, %v23_v2  ;;  %v6976_v10 = vpack.c.bf16 %v42_v7, %v36_v6  ;;  %v35_v11 = vld [vmem:[%s8230_s3 + $0x60] sm:$0xff]  ;;  %v41_v12 = vld [vmem:[%s8230_s3 + $0x90] sm:$0xff]  ;;  %v48_v13 = vld [vmem:[%s8230_s3 + $0xc8] sm:$0xff] }
   0x4   :  { %5905 = vmatprep.subr.bf16.mxu0 %v6963_v4  ;;  %v54_v14 = vld [vmem:[%s8230_s3 + $0xf8] sm:$0xff]  ;;  %v6992_v15 = vpack.c.bf16 %v41_v12, %v35_v11  ;;  %v47_v16 = vld [vmem:[%s8230_s3 + $0xc0] sm:$0xff]  ;;  %v53_v17 = vld [vmem:[%s8230_s3 + $0xf0] sm:$0xff] }
   0x5   :  { %5907 = vmatpush1.bf16.msra.mxu0 %v6974_v9  ;;  %v60_v18 = vld [vmem:[%s8230_s3 + $0x128] sm:$0xff]  ;;  %v7004_v19 = vpack.c.bf16 %v54_v14, %v48_v13  ;;  %v66_v20 = vld [vmem:[%s8230_s3 + $0x158] sm:$0xff]  ;;  %v25_v24 = vld [vmem:[%s8230_s3 + $0x10] sm:$0xff]  ;;  %v7038_v31 = vpack.c.bf16 %v53_v17, %v47_v16 }
   0x6   :  { %5909 = vmatprep.subr.bf16.mxu0 %v6976_v10  ;;  %v26_v21 = vld [vmem:[%s8230_s3 + $0x18] sm:$0xff]  ;;  %v32_v22 = vld [vmem:[%s8230_s3 + $0x48] sm:$0xff]  ;;  %v31_v25 = vld [vmem:[%s8230_s3 + $0x40] sm:$0xff]  ;;  %v7050_v35 = vpack.c.bf16 %v66_v20, %v60_v18 }
   0x7   :  { %v7015_v23 = vpack.c.bf16 %v32_v22, %v26_v21  ;;  %v38_v26 = vld [vmem:[%s8230_s3 + $0x78] sm:$0xff]  ;;  %v7026_v27 = vpack.c.bf16 %v31_v25, %v25_v24  ;;  %v44_v28 = vld [vmem:[%s8230_s3 + $0xa8] sm:$0xff]  ;;  %v37_v29 = vld [vmem:[%s8230_s3 + $0x70] sm:$0xff] }
   0x8   :  { %v43_v30 = vld [vmem:[%s8230_s3 + $0xa0] sm:$0xff]  ;;  %v7041_v32 = vpack.c.bf16 %v44_v28, %v38_v26  ;;  %v50_v33 = vld [vmem:[%s8230_s3 + $0xd8] sm:$0xff]  ;;  %v56_v34 = vld [vmem:[%s8230_s3 + $0x108] sm:$0xff] }
   0x9   :  { %5911 = vmatpush1.bf16.msra.mxu0 %v6992_v15  ;;  %5921 = vmatprep.subr.bf16.mxu1 %v7015_v23  ;;  %v59_v36 = vld [vmem:[%s8230_s3 + $0x120] sm:$0xff]  ;;  %v65_v37 = vld [vmem:[%s8230_s3 + $0x150] sm:$0xff]  ;;  %v7059_v38 = vpack.c.bf16 %v43_v30, %v37_v29  ;;  %v7062_v39 = vpack.c.bf16 %v56_v34, %v50_v33  ;;  %v62_v43 = vld [vmem:[%s8230_s3 + $0x138] sm:$0xff]  ;;  %v8237_v34 = vmov 0.0|0.0  }
   0xa   :  { %5913 = vmatprep.subr.bf16.mxu0 %v7004_v19  ;;  %5923 = vmatpush1.bf16.msra.mxu1 %v7026_v27  ;;  %v49_v40 = vld [vmem:[%s8230_s3 + $0xd0] sm:$0xff]  ;;  %v55_v41 = vld [vmem:[%s8230_s3 + $0x100] sm:$0xff]  ;;  %v68_v44 = vld [vmem:[%s8230_s3 + $0x168] sm:$0xff]  ;;  %v7080_v45 = vpack.c.bf16 %v65_v37, %v59_v36  ;;  %v165_v36 = vlaneseq }
   0xb   :  { %5925 = vmatprep.subr.bf16.mxu1 %v7041_v32  ;;  %v92_v42 = vld [vmem:[%s8231_s0] sm:$0xff]  ;;  %v7087_v47 = vpack.c.bf16 %v55_v41, %v49_v40  ;;  %v7090_v48 = vpack.c.bf16 %v68_v44, %v62_v43  ;;  %v61_v49 = vld [vmem:[%s8230_s3 + $0x130] sm:$0xff]  ;;  %v28_v52 = vld [vmem:[%s8230_s3 + $0x28] sm:$0xff] }
   0xc   :  { %106 = vperm.xlu0 %6655, %v92_v42   ;;  %v763_v46 = vld [vmem:[%s8232_s1] sm:$0xff]  ;;  %v34_v53 = vld [vmem:[%s8230_s3 + $0x58] sm:$0xff]  ;;  %v33_v56 = vld [vmem:[%s8230_s3 + $0x50] sm:$0xff]  ;;  %v7228_v37 = vshrl.u32 %v165_v36, 7 }
   0xd   :  { %5915 = vmatpush1.bf16.msra.mxu0 %v7038_v31  ;;  %v67_v50 = vld [vmem:[%s8230_s3 + $0x160] sm:$0xff]  ;;  %v7114_v54 = vpack.c.bf16 %v34_v53, %v28_v52  ;;  %v40_v58 = vld [vmem:[%s8230_s3 + $0x88] sm:$0xff]  ;;  %v46_v59 = vld [vmem:[%s8230_s3 + $0xb8] sm:$0xff] }
   0xe   :  { %5917 = vmatprep.subr.bf16.mxu0 %v7050_v35  ;;  %5927 = vmatpush1.bf16.msra.mxu1 %v7059_v38  ;;  %v7100_v51 = vpack.c.bf16 %v67_v50, %v61_v49  ;;  %v27_v55 = vld [vmem:[%s8230_s3 + $0x20] sm:$0xff]  ;;  %v7135_v61 = vpack.c.bf16 %v46_v59, %v40_v58  ;;  %v45_v62 = vld [vmem:[%s8230_s3 + $0xb0] sm:$0xff]  ;;  %v72_v63 = vld [vmem:[%s8233_s4 + $0x8] sm:$0xff]  ;;  %v7231_v40 = vsub.s32 0, %v7228_v37  ;;  %v7237_v42 = vsub.s32 1, %v7228_v37 }
   0xf   :  { %5929 = vmatprep.subr.bf16.mxu1 %v7062_v39  ;;  %8267 = vst [vmem:[#allocation3_spill] sm:$0xff] %v7114_v54  ;;  %v7122_v57 = vpack.c.bf16 %v33_v56, %v27_v55  ;;  %v39_v60 = vld [vmem:[%s8230_s3 + $0x80] sm:$0xff]  ;;  %v74_v5 = vld [vmem:[%s8233_s4 + $0x18] sm:$0xff]  ;;  %v52_v6 = vld [vmem:[%s8230_s3 + $0xe8] sm:$0xff] }
  0x10   :  { %766 = vperm.xlu0 %6655, %v763_v46   ;;  %v75_v0 = vld [vmem:[%s8233_s4 + $0x20] sm:$0xff]  ;;  %v7146_v1 = vpack.c.bf16 %v45_v62, %v39_v60  ;;  %v58_v11 = vld [vmem:[%s8230_s3 + $0x118] sm:$0xff]  ;;  %v57_v13 = vld [vmem:[%s8230_s3 + $0x110] sm:$0xff]  ;;  %8269 = vst [vmem:[#allocation5_spill] sm:$0xff] %v7231_v40 }
  0x11   :  { %5919 = vmatpush1.bf16.msra.mxu0 %v7080_v45  ;;  %v71_v2 = vld [vmem:[%s8233_s4] sm:$0xff]  ;;  %v7158_v7 = vpack.c.bf16 %v75_v0, %v72_v63  ;;  %v7171_v14 = vpack.c.bf16 %v58_v11, %v52_v6  ;;  %v78_v16 = vld [vmem:[%s8233_s4 + $0x38] sm:$0xff]  ;;  %v81_v17 = vld [vmem:[%s8233_s4 + $0x50] sm:$0xff]  ;;  %8270 = vst [vmem:[#allocation6_spill] sm:$0xff] %v7237_v42 }
  0x12   :  { %5931 = vmatpush1.bf16.msra.mxu1 %v7087_v47  ;;  %5937 = vmatprep.subr.bf16.mxu0 %v7114_v54  ;;  %v7160_v8 = vpack.c.bf16 %v74_v5, %v71_v2  ;;  %v51_v12 = vld [vmem:[%s8230_s3 + $0xe0] sm:$0xff]  ;;  %v77_v18 = vld [vmem:[%s8233_s4 + $0x30] sm:$0xff]  ;;  %v7186_v21 = vpack.c.bf16 %v81_v17, %v78_v16  ;;  %v80_v22 = vld [vmem:[%s8233_s4 + $0x48] sm:$0xff] }
  0x13   :  { %5933 = vmatprep.subr.bf16.mxu1 %v7090_v48  ;;  %8268 = vst [vmem:[#allocation4_spill] sm:$0xff] %v7158_v7  ;;  %v7184_v20 = vpack.c.bf16 %v57_v13, %v51_v12  ;;  %v64_v24 = vld [vmem:[%s8230_s3 + $0x148] sm:$0xff]  ;;  %v70_v25 = vld [vmem:[%s8230_s3 + $0x178] sm:$0xff]  ;;  %v7199_v26 = vpack.c.bf16 %v80_v22, %v77_v18  ;;  %v63_v29 = vld [vmem:[%s8230_s3 + $0x140] sm:$0xff] }
  0x14   :  { %404 = vmatmul.mubr.f32.vlgmr.msra.gmra.mrb[0].mxu0 %v8239_v3  ;;  %v7201_v28 = vpack.c.bf16 %v70_v25, %v64_v24  ;;  %v69_v30 = vld [vmem:[%s8230_s3 + $0x170] sm:$0xff]  ;;  %v5587_v44 = vld [vmem:[%s8234_s5 + $0x3] ss:$8 sm:$0x30] }
  0x15   :  { %545 = vmatprep.mubr.f32.mxu0 %v8239_v3  ;;  %5939 = vmatpush1.bf16.msra.mxu0 %v7122_v57  ;;  %v7211_v33 = vpack.c.bf16 %v69_v30, %v63_v29  ;;  %v89_v41 = vld [vmem:[%s8234_s5] ss:$8 sm:$0x7]  ;;  %v5586_v43 = vld [vmem:[%s8234_s5 + $0x3] ss:$8 sm:$0xf] }
  0x16   :  { %5935 = vmatpush1.bf16.msra.mxu1 %v7100_v51  ;;  %5941 = vmatprep.subr.bf16.mxu0 %v7135_v61  ;;  %v7246_v46 = vrot.slane %v89_v41, %v7231_v40  ;;  %v5589_v49 = vld [vmem:[%s8234_s5 + $0x1] ss:$8 sm:$0x7]  ;;  %v7251_v50 = vor.u32 %v5587_v44, %v5586_v43  ;;  %v7254_v52 = vrot.slane %v89_v41, %v7237_v42  ;;  %v7277_v29 = vsub.s32 2, %v7228_v37 }
  0x17   :  { %5953 = vmatprep.subr.bf16.mxu1 %v7158_v7  ;;  %v7258_v56 = vrot.slane %v5589_v49, %v7231_v40  ;;  %v7266_v60 = vrot.slane %v5589_v49, %v7237_v42 }
  0x18   :  { %8271 = vst [vmem:[#allocation7_spill] sm:$0xff] %v7246_v46  ;;  %8272 = vst [vmem:[#allocation8_spill] sm:$0xff] %v7254_v52  ;;  %v7262_v58 = vrot.slane %v7251_v50, %v7231_v40  ;;  %v7270_v62 = vrot.slane %v7251_v50, %v7237_v42  ;;  %v7280_v30 = vrot.slane %v89_v41, %v7277_v29 }
  0x19   :  { %475 = vmatmul.mubr.f32.vlgmr.msra.gmra.mrb[0].mxu1 %v8239_v3  ;;  %5943 = vmatpush1.bf16.msra.mxu0 %v7146_v1  ;;  %8273 = vst [vmem:[#allocation9_spill] sm:$0xff] %v7258_v56  ;;  %8275 = vst [vmem:[#allocation11_spill] sm:$0xff] %v7266_v60  ;;  %v7284_v36 = vrot.slane %v7251_v50, %v7277_v29  ;;  %v7287_v44 = vrot.slane %v5589_v49, %v7277_v29  ;;  %v76_v49 = vld [vmem:[%s8233_s4 + $0x28] sm:$0xff] }
  0x1a   :  { %660 = vmatprep.mubr.f32.mxu1 %v8239_v3  ;;  %5955 = vmatpush1.bf16.msra.mxu1 %v7160_v8  ;;  %8274 = vst [vmem:[#allocation10_spill] sm:$0xff] %v7262_v58  ;;  %8276 = vst [vmem:[#allocation12_spill] sm:$0xff] %v7270_v62 }
  0x1b   :  { %5945 = vmatprep.subr.bf16.mxu0 %v7171_v14  ;;  %5957 = vmatprep.subr.bf16.mxu1 %v7186_v21  ;;  %8277 = vst [vmem:[#allocation13_spill] sm:$0xff] %v7277_v29 }
  0x1d   :  { %5947 = vmatpush1.bf16.msra.mxu0 %v7184_v20 }
  0x1e   :  { %5959 = vmatpush1.bf16.msra.mxu1 %v7199_v26  ;;  %5949 = vmatprep.subr.bf16.mxu0 %v7201_v28 }
  0x1f   :  { %5960 = vmatprep.subr.bf16.mxu1 %v8237_v34 }
  0x21   :  { %5951 = vmatpush1.bf16.msra.mxu0 %v7211_v33 }
  0x22   :  { %5967 = vmatprep.subr.bf16.mxu0 %v6963_v4 }
  0x24   :  { %546 = vmatmul.mubr.f32.vlgmr.msra.gmra.mrb[2].mxu0 %v8239_v3 }
  0x25   :  { %5969 = vmatpush1.bf16.msra.mxu0 %v6974_v9  ;;  %838 = vmatprep.mubr.f32.mxu0 %v8239_v3 }
  0x26   :  { %5971 = vmatprep.subr.bf16.mxu0 %v6976_v10 }
  0x29   :  { %5973 = vmatpush1.bf16.msra.mxu0 %v6992_v15 }
  0x2a   :  { %5975 = vmatprep.subr.bf16.mxu0 %v7004_v19 }
  0x2d   :  { %5977 = vmatpush1.bf16.msra.mxu0 %v7038_v31 }
  0x2e   :  { %5979 = vmatprep.subr.bf16.mxu0 %v7050_v35 }
  0x31   :  { %5981 = vmatpush1.bf16.msra.mxu0 %v7080_v45 }
  0x32   :  { %5999 = vmatprep.subr.bf16.mxu0 %v7114_v54 }
  0x8b   :  { %v107_v53 = vpop.permute.xlu0 %106 }
  0x8c   :  { %v180_v55 = vmul.f32 %v7246_v46, %v107_v53  ;;  %v181_v59 = vmul.f32 %v7254_v52, %v107_v53 }
  0x8e   :  { %v232_v63 = vadd.f32 %v7258_v56, %v180_v55  ;;  %v233_v6 = vadd.f32 %v7266_v60, %v181_v59  ;;  %v182_v55 = vmul.f32 %v7280_v30, %v107_v53 }
  0xe7   :  { %v405_v0 = vpop.f32.mrb[0].mxu0 }
  0xe8   :  { %v406_v2 = vadd.f32 %v405_v0, %v7262_v58  ;;  %v407_v5 = vpop.f32.mrb[1].mxu0 }
  0xe9   :  { %v408_v11 = vadd.f32 %v407_v5, %v7270_v62 }
  0xea   :  { %v555_v12 = vadd.f32 %v406_v2, %v232_v63  ;;  %v234_v2 = vadd.f32 %v7287_v44, %v182_v55 }
  0xeb   :  { %v562_v17 = vadd.f32 %v408_v11, %v233_v6 }
  0xec   :  { %v5590_v13 = vmul.f32 -1.442695, %v555_v12  ;;  %v476_v16 = vpop.f32.mrb[0].mxu1  ;;  %v73_v12 = vld [vmem:[%s8233_s4 + $0x10] sm:$0xff] }
  0xed   :  { %v478_v18 = vpop.f32.mrb[1].mxu1  ;;  %v5591_v22 = vmul.f32 -1.442695, %v562_v17  ;;  %v477_v63 = vadd.f32 %v476_v16, %v7284_v36  ;;  %v7298_v17 = vpack.c.bf16 %v76_v49, %v73_v12 }
  0xee   :  { %6658 = vpow2.f32 %v5590_v13 }
  0xef   :  { %6660 = vpow2.f32 %v5591_v22 }
  0xf7   :  { %v547_v55 = vpop.f32.mrb[2].mxu0 }
  0xf8   :  { %v6659_v24 = vpop.eup %6658 }
  0xf9   :  { %v559_v25 = vadd.f32 1.0, %v6659_v24  ;;  %v6661_v43 = vpop.eup %6660  ;;  %v79_v24 = vld [vmem:[%s8233_s4 + $0x40] sm:$0xff] }
  0xfa   :  { %v566_v59 = vadd.f32 1.0, %v6661_v43 }
  0xfb   :  { %6662 = vrcp.f32 %v559_v25  ;;  %v82_v25 = vld [vmem:[%s8233_s4 + $0x58] sm:$0xff] }
  0xfc   :  { %6664 = vrcp.f32 %v566_v59  ;;  %v7311_v43 = vpack.c.bf16 %v82_v25, %v79_v24  ;;  %v549_v59 = vpop.f32.mrb[3].mxu0 }
 0x105   :  { %v6663_v0 = vpop.eup %6662 }
 0x106   :  { %v569_v5 = vmul.f32 %v6663_v0, %v477_v63  ;;  %v6665_v6 = vpop.eup %6664  ;;  %v323_v63 = vsub.s32 4, %v7228_v37  ;;  %v319_v0 = vsub.s32 3, %v7228_v37 }
 0x107   :  { %v572_v11 = vsub.f32 1.0, %v6665_v6  ;;  %v574_v16 = vmul.f32 0.0, %v6665_v6 }
 0x108   :  { %v570_v41 = vadd.f32 %v569_v5, %v234_v2  ;;  %v5588_v2 = vld [vmem:[%s8234_s5 + $0x2] ss:$8 sm:$0x7]  ;;  %v7335_v5 = vrot.slane %v7251_v50, %v323_v63 }
 0x109   :  { %v7341_v6 = vrot.slane %v5588_v2, %v7231_v40 }
 0x10a   :  { %6666 = vtanh.f32 %v570_v41  ;;  %8278 = vst [vmem:[#allocation14_spill] sm:$0xff] %v7335_v5  ;;  %v7338_v41 = vrot.slane %v7251_v50, %v319_v0  ;;  %v548_v49 = vadd.f32 %v547_v55, %v7335_v5  ;;  %v327_v55 = vsub.s32 5, %v7228_v37 }
 0x10b   :  { %8279 = vst [vmem:[#allocation15_spill] sm:$0xff] %v7341_v6 }
 0x114   :  { %v6667_v53 = vpop.eup %6666 }
 0x115   :  { %v573_v13 = vmul.f32 %v6667_v53, %v572_v11  ;;  %v7344_v11 = vrot.slane %v5588_v2, %v7237_v42  ;;  %v479_v53 = vadd.f32 %v478_v18, %v7338_v41  ;;  %v7352_v18 = vrot.slane %v7251_v50, %v327_v55  ;;  %v96_v55 = vld [vmem:[%s8231_s0 + $0x20] sm:$0xff] }
 0x117   :  { %v7300_v22 = vadd.f32 %v574_v16, %v573_v13 }
 0x119   :  { %5592 = vmatmul.mubr.msk.f32.vlgmr.msra.gmra.mrb[2].mxu1 %vm592_vm0, %v7300_v22 }
 0x11a   :  { %5962 = vmatpush3.bf16.msra.mxu1 %v7298_v17  ;;  %5780 = vmatprep.mubr.msk.f32.mxu1 %vm6913_vm1, %v8239_v3 }
 0x11b   :  { %5963 = vmatprep.subr.bf16.mxu1 %v8237_v34 }
 0x11e   :  { %5965 = vmatpush3.bf16.msra.mxu1 %v7311_v43 }
 0x11f   :  { %5983 = vmatprep.subr.bf16.mxu1 %v7015_v23 }
 0x121   :  { %5781 = vmatmul.mubr.msk.f32.vlgmr.msra.gmra.mrb[4].mxu1 %vm592_vm0, %v7300_v22 }
 0x122   :  { %5985 = vmatpush1.bf16.msra.mxu1 %v7026_v27  ;;  %909 = vmatprep.mubr.f32.mxu1 %v8239_v3 }
 0x123   :  { %5987 = vmatprep.subr.bf16.mxu1 %v7041_v32 }
 0x126   :  { %5989 = vmatpush1.bf16.msra.mxu1 %v7059_v38 }
 0x127   :  { %5991 = vmatprep.subr.bf16.mxu1 %v7062_v39 }
 0x12a   :  { %5993 = vmatpush1.bf16.msra.mxu1 %v7087_v47 }
 0x12b   :  { %5995 = vmatprep.subr.bf16.mxu1 %v7090_v48 }
 0x12e   :  { %5997 = vmatpush1.bf16.msra.mxu1 %v7100_v51 }
 0x12f   :  { %6015 = vmatprep.subr.bf16.mxu1 %v7158_v7 }
 0x1ec   :  { %v662_v12 = vpop.f32.mrb[2].mxu1 }
 0x1ed   :  { %v663_v13 = vadd.f32 %v662_v12, %v7341_v6  ;;  %v664_v16 = vpop.f32.mrb[3].mxu1 }
 0x1ee   :  { %v665_v24 = vadd.f32 %v664_v16, %v7344_v11  ;;  %v7355_v16 = vrot.slane %v5588_v2, %v7277_v29  ;;  %v94_v2 = vld [vmem:[%s8231_s0 + $0x10] sm:$0xff] }
 0x1ef   :  { %v737_v25 = vadd.f32 %v663_v13, %v479_v53 }
 0x1f0   :  { %v744_v63 = vadd.f32 %v665_v24, %v548_v49  ;;  %v550_v49 = vadd.f32 %v549_v59, %v7352_v18  ;;  %v93_v59 = vld [vmem:[%s8231_s0 + $0x8] sm:$0xff] }
 0x1f1   :  { %v5594_v0 = vmul.f32 -1.442695, %v737_v25 }
 0x1f2   :  { %v5595_v40 = vmul.f32 -1.442695, %v744_v63  ;;  %v95_v63 = vld [vmem:[%s8231_s0 + $0x18] sm:$0xff] }
 0x1f3   :  { %6668 = vpow2.f32 %v5594_v0  ;;  %v5625_v0 = vld [vmem:[%s8232_s1 + $0x18] sm:$0xff] }
 0x1f4   :  { %v733_v34 = vpop.f32.mrb[4].mxu1  ;;  %6670 = vpow2.f32 %v5595_v40 }
 0x1f5   :  { %v5782_v3 = vpop.f32.mrb[5].mxu1 }
 0x1f6   :  { %v734_v3 = vadd.f32 %v733_v34, %v7355_v16  ;;  %v5605_v34 = vld [vmem:[%s8232_s1 + $0x8] sm:$0xff] }
 0x1fd   :  { %v6669_v42 = vpop.eup %6668 }
 0x1fe   :  { %v741_v7 = vadd.f32 1.0, %v6669_v42  ;;  %v6671_v5 = vpop.eup %6670 }
 0x1ff   :  { %v748_v12 = vadd.f32 1.0, %v6671_v5  ;;  %v5615_v5 = vld [vmem:[%s8232_s1 + $0x10] sm:$0xff] }
 0x200   :  { %6672 = vrcp.f32 %v741_v7 }
 0x201   :  { %6674 = vrcp.f32 %v748_v12  ;;  %v5635_v12 = vld [vmem:[%s8232_s1 + $0x20] sm:$0xff] }
 0x20a   :  { %v6673_v53 = vpop.eup %6672 }
 0x20b   :  { %v751_v40 = vmul.f32 %v6673_v53, %v550_v49  ;;  %v6675_v7 = vpop.eup %6674  ;;  %v97_v49 = vld [vmem:[%s8231_s0 + $0x28] sm:$0xff] }
 0x20c   :  { %v754_v42 = vsub.f32 1.0, %v6675_v7  ;;  %v756_v25 = vmul.f32 0.0, %v6675_v7  ;;  %v5645_v53 = vld [vmem:[%s8232_s1 + $0x28] sm:$0xff]  ;;  %v5665_v7 = vld [vmem:[%s8232_s1 + $0x38] sm:$0xff] }
 0x20d   :  { %v752_v13 = vadd.f32 %v751_v40, %v734_v3  ;;  %v98_v3 = vld [vmem:[%s8231_s0 + $0x30] sm:$0xff] }
 0x20e   :  { %v5655_v40 = vld [vmem:[%s8232_s1 + $0x30] sm:$0xff] }
 0x20f   :  { %6676 = vtanh.f32 %v752_v13  ;;  %v99_v13 = vld [vmem:[%s8231_s0 + $0x38] sm:$0xff] }
 0x219   :  { %v6677_v37 = vpop.eup %6676 }
 0x21a   :  { %v755_v24 = vmul.f32 %v6677_v37, %v754_v42  ;;  %v100_v42 = vld [vmem:[%s8231_s0 + $0x40] sm:$0xff] }
 0x21b   :  { %v5675_v37 = vld [vmem:[%s8232_s1 + $0x40] sm:$0xff] }
 0x21c   :  { %v757_v50 = vadd.f32 %v756_v25, %v755_v24  ;;  %v101_v24 = vld [vmem:[%s8231_s0 + $0x48] sm:$0xff] }
 0x21d   :  { %v5685_v25 = vld [vmem:[%s8232_s1 + $0x48] sm:$0xff] }
 0x21e   :  { %759 = vrot.lane.b32.xlu1 %v757_v50, %s6914_s9  ;;  %v102_v50 = vld [vmem:[%s8231_s0 + $0x50] sm:$0xff] }
 0x222   :  { %111 = vperm.xlu1 %6656, %v93_v59   ;;  %v5695_v59 = vld [vmem:[%s8232_s1 + $0x50] sm:$0xff] }
 0x226   :  { %1190 = vperm.xlu1 %6656, %v5605_v34   ;;  %v103_v34 = vld [vmem:[%s8231_s0 + $0x58] sm:$0xff] }
 0x22a   :  { %116 = vperm.xlu1 %6656, %v94_v2   ;;  %v5705_v2 = vld [vmem:[%s8232_s1 + $0x58] sm:$0xff] }
 0x22e   :  { %1614 = vperm.xlu1 %6656, %v5615_v5  }
 0x232   :  { %121 = vperm.xlu1 %6656, %v95_v63   ;;  %v767_v63 = vpop.permute.xlu0 %766 }
 0x236   :  { %2038 = vperm.xlu1 %6656, %v5625_v0  }
 0x23a   :  { %126 = vperm.xlu1 %6656, %v96_v55  }
 0x23e   :  { %2462 = vperm.xlu1 %6656, %v5635_v12   ;;  %v8280_v12 = vmov 0.0  }
 0x242   :  { %131 = vperm.xlu1 %6656, %v97_v49  }
 0x246   :  { %2886 = vperm.xlu1 %6656, %v5645_v53  }
 0x24a   :  { %136 = vperm.xlu1 %6656, %v98_v3  }
 0x24e   :  { %3310 = vperm.xlu1 %6656, %v5655_v40  }
 0x252   :  { %141 = vperm.xlu1 %6656, %v99_v13  }
 0x256   :  { %3734 = vperm.xlu1 %6656, %v5665_v7  }
 0x25a   :  { %146 = vperm.xlu1 %6656, %v100_v42  }
 0x25e   :  { %4158 = vperm.xlu1 %6656, %v5675_v37  }
 0x262   :  { %151 = vperm.xlu1 %6656, %v101_v24  }
 0x266   :  { %4582 = vperm.xlu1 %6656, %v5685_v25  }
 0x26a   :  { %156 = vperm.xlu1 %6656, %v102_v50  }
 0x26e   :  { %5006 = vperm.xlu1 %6656, %v5695_v59  }
 0x272   :  { %161 = vperm.xlu1 %6656, %v103_v34  }
 0x276   :  { %5430 = vperm.xlu1 %6656, %v5705_v2  }
 0x290   :  { %v760_v5 = vpop.permute.xlu1 %759 }
 0x291   :  { %v762_v0 = vsel %vm592_vm0, %v7300_v22, %v760_v5  ;;  %v8281_v22 = vmov 0.0|0.0  }
 0x292   :  { %v7428_v55 = vmul.f32 %v767_v63, %v762_v0 }
 0x294   :  { %1175 = vrot.lane.b32.xlu0 %v7428_v55, %s6915_s28  ;;  %5596 = vmatmul.mubr.msk.f32.vlgmr.msra.gmra.mrb[4].mxu0 %vm335_vm2, %v7428_v55 }
 0x295   :  { %5597 = vmatmul.mubr.msk.f32.vlgmr.msra.gmra.mrb[6].mxu1 %vm335_vm2, %v7428_v55  ;;  %6001 = vmatpush1.bf16.msra.mxu0 %v7122_v57 }
 0x296   :  { %6003 = vmatprep.subr.bf16.mxu0 %v7135_v61  ;;  %980 = vmatprep.mubr.f32.mxu0 %v8280_v12 }
 0x297   :  { %6017 = vmatpush1.bf16.msra.mxu1 %v7160_v8  ;;  %1079 = vmatprep.mubr.f32.mxu1 %v8280_v12 }
 0x298   :  { %6019 = vmatprep.subr.bf16.mxu1 %v7186_v21 }
 0x299   :  { %6005 = vmatpush1.bf16.msra.mxu0 %v7146_v1 }
 0x29a   :  { %6007 = vmatprep.subr.bf16.mxu0 %v7171_v14 }
 0x29b   :  { %6021 = vmatpush1.bf16.msra.mxu1 %v7199_v26 }
 0x29c   :  { %6022 = vmatprep.subr.bf16.mxu1 %v8281_v22 }
 0x29d   :  { %6009 = vmatpush1.bf16.msra.mxu0 %v7184_v20 }
 0x29e   :  { %6011 = vmatprep.subr.bf16.mxu0 %v7201_v28 }
 0x2a1   :  { %6013 = vmatpush1.bf16.msra.mxu0 %v7211_v33  ;;  %v112_v49 = vpop.permute.xlu1 %111 }
 0x2a2   :  { %6029 = vmatprep.subr.bf16.mxu0 %v6963_v4  ;;  %v183_v53 = vmul.f32 %v7246_v46, %v112_v49  ;;  %v184_v3 = vmul.f32 %v7254_v52, %v112_v49 }
 0x2a4   :  { %5598 = vmatmul.mubr.msk.f32.vlgmr.msra.gmra.mrb[6].mxu0 %vm335_vm2, %v7428_v55  ;;  %v235_v40 = vadd.f32 %v7258_v56, %v183_v53  ;;  %v236_v24 = vadd.f32 %v7266_v60, %v184_v3 }
 0x2a5   :  { %6031 = vmatpush1.bf16.msra.mxu0 %v6974_v9  ;;  %1262 = vmatprep.mubr.f32.mxu0 %v8280_v12 }
 0x2a6   :  { %6033 = vmatprep.subr.bf16.mxu0 %v6976_v10 }
 0x2a9   :  { %6035 = vmatpush1.bf16.msra.mxu0 %v6992_v15 }
 0x2aa   :  { %6037 = vmatprep.subr.bf16.mxu0 %v7004_v19 }
 0x2ad   :  { %6039 = vmatpush1.bf16.msra.mxu0 %v7038_v31 }
 0x2ae   :  { %6041 = vmatprep.subr.bf16.mxu0 %v7050_v35 }
 0x2b1   :  { %6043 = vmatpush1.bf16.msra.mxu0 %v7080_v45 }
 0x2b2   :  { %6061 = vmatprep.subr.bf16.mxu0 %v7114_v54 }
 0x367   :  { %v840_v13 = vpop.f32.mrb[4].mxu0 }
 0x368   :  { %v841_v7 = vadd.f32 %v840_v13, %v7262_v58  ;;  %v911_v42 = vpop.f32.mrb[6].mxu1  ;;  %v842_v37 = vpop.f32.mrb[5].mxu0  ;;  %v185_v13 = vmul.f32 %v7280_v30, %v112_v49 }
 0x369   :  { %v843_v25 = vadd.f32 %v842_v37, %v7270_v62  ;;  %v913_v50 = vpop.f32.mrb[7].mxu1  ;;  %v912_v3 = vadd.f32 %v911_v42, %v7284_v36 }
 0x36a   :  { %v991_v59 = vadd.f32 %v841_v7, %v235_v40  ;;  %v237_v37 = vadd.f32 %v7287_v44, %v185_v13 }
 0x36b   :  { %v998_v2 = vadd.f32 %v843_v25, %v236_v24 }
 0x36c   :  { %v5599_v34 = vmul.f32 -1.442695, %v991_v59 }
 0x36d   :  { %v5600_v5 = vmul.f32 -1.442695, %v998_v2 }
 0x36e   :  { %6678 = vpow2.f32 %v5599_v34 }
 0x36f   :  { %6680 = vpow2.f32 %v5600_v5 }
 0x377   :  { %v982_v63 = vpop.f32.mrb[6].mxu0 }
 0x378   :  { %v6679_v0 = vpop.eup %6678  ;;  %v984_v29 = vpop.f32.mrb[7].mxu0 }
 0x379   :  { %v995_v53 = vadd.f32 1.0, %v6679_v0  ;;  %v6681_v56 = vpop.eup %6680  ;;  %v8283_v0 = vld [vmem:[#allocation14_spill] sm:$0xff] }
 0x37a   :  { %v1002_v58 = vadd.f32 1.0, %v6681_v56  ;;  %v8282_v56 = vld [vmem:[#allocation4_spill] sm:$0xff] }
 0x37b   :  { %6682 = vrcp.f32 %v995_v53  ;;  %v983_v53 = vadd.f32 %v982_v63, %v8283_v0 }
 0x37c   :  { %6684 = vrcp.f32 %v1002_v58 }
 0x385   :  { %v6683_v60 = vpop.eup %6682 }
 0x386   :  { %v1005_v40 = vmul.f32 %v6683_v60, %v912_v3  ;;  %v6685_v24 = vpop.eup %6684  ;;  %v914_v60 = vadd.f32 %v913_v50, %v7338_v41 }
 0x387   :  { %v1008_v25 = vsub.f32 1.0, %v6685_v24  ;;  %v1010_v2 = vmul.f32 %v6685_v24, %v7428_v55 }
 0x388   :  { %v1006_v7 = vadd.f32 %v1005_v40, %v237_v37 }
 0x38a   :  { %6686 = vtanh.f32 %v1006_v7 }
 0x394   :  { %v6687_v59 = vpop.eup %6686 }
 0x395   :  { %v1009_v34 = vmul.f32 %v6687_v59, %v1008_v25 }
 0x397   :  { %v1011_v5 = vadd.f32 %v1010_v2, %v1009_v34 }
 0x399   :  { %5601 = vmatmul.mubr.msk.f32.vlgmr.msra.gmra.mrb[8].mxu1 %vm592_vm0, %v1011_v5 }
 0x39a   :  { %6024 = vmatpush3.bf16.msra.mxu1 %v7298_v17  ;;  %5791 = vmatprep.mubr.msk.f32.mxu1 %vm6913_vm1, %v8280_v12 }
 0x39b   :  { %6025 = vmatprep.subr.bf16.mxu1 %v8281_v22 }
 0x39e   :  { %6027 = vmatpush3.bf16.msra.mxu1 %v7311_v43 }
 0x39f   :  { %6045 = vmatprep.subr.bf16.mxu1 %v7015_v23 }
 0x3a1   :  { %5792 = vmatmul.mubr.msk.f32.vlgmr.msra.gmra.mrb[10].mxu1 %vm592_vm0, %v1011_v5 }
 0x3a2   :  { %6047 = vmatpush1.bf16.msra.mxu1 %v7026_v27  ;;  %1333 = vmatprep.mubr.f32.mxu1 %v8280_v12 }
 0x3a3   :  { %6049 = vmatprep.subr.bf16.mxu1 %v7041_v32 }
 0x3a6   :  { %6051 = vmatpush1.bf16.msra.mxu1 %v7059_v38 }
 0x3a7   :  { %6053 = vmatprep.subr.bf16.mxu1 %v7062_v39 }
 0x3aa   :  { %6055 = vmatpush1.bf16.msra.mxu1 %v7087_v47 }
 0x3ab   :  { %6057 = vmatprep.subr.bf16.mxu1 %v7090_v48 }
 0x3ae   :  { %6059 = vmatpush1.bf16.msra.mxu1 %v7100_v51 }
 0x3af   :  { %6077 = vmatprep.subr.bf16.mxu1 %v8282_v56 }
 0x46c   :  { %v1081_v58 = vpop.f32.mrb[8].mxu1 }
 0x46d   :  { %v1082_v49 = vadd.f32 %v1081_v58, %v7341_v6  ;;  %v1083_v42 = vpop.f32.mrb[9].mxu1  ;;  %v985_v58 = vadd.f32 %v984_v29, %v7352_v18 }
 0x46e   :  { %v1084_v13 = vadd.f32 %v1083_v42, %v7344_v11 }
 0x46f   :  { %v1156_v3 = vadd.f32 %v1082_v49, %v914_v60 }
 0x470   :  { %v1163_v37 = vadd.f32 %v1084_v13, %v983_v53 }
 0x471   :  { %v5603_v40 = vmul.f32 -1.442695, %v1156_v3  ;;  %v1176_v3 = vpop.permute.xlu0 %1175 }
 0x472   :  { %v5604_v25 = vmul.f32 -1.442695, %v1163_v37 }
 0x473   :  { %6688 = vpow2.f32 %v5603_v40 }
 0x474   :  { %v1152_v7 = vpop.f32.mrb[10].mxu1  ;;  %6690 = vpow2.f32 %v5604_v25 }
 0x475   :  { %v5793_v24 = vpop.f32.mrb[11].mxu1  ;;  %v1153_v63 = vadd.f32 %v1152_v7, %v7355_v16 }
 0x47d   :  { %v6689_v59 = vpop.eup %6688 }
 0x47e   :  { %v1160_v34 = vadd.f32 1.0, %v6689_v59  ;;  %v6691_v2 = vpop.eup %6690 }
 0x47f   :  { %v1167_v50 = vadd.f32 1.0, %v6691_v2 }
 0x480   :  { %6692 = vrcp.f32 %v1160_v34  ;;  %v1191_v34 = vpop.permute.xlu1 %1190 }
 0x481   :  { %6694 = vrcp.f32 %v1167_v50 }
 0x48a   :  { %v6693_v6 = vpop.eup %6692 }
 0x48b   :  { %v1170_v42 = vmul.f32 %v6693_v6, %v985_v58  ;;  %v6695_v49 = vpop.eup %6694  ;;  %v8284_v58 = vld [vmem:[#allocation9_spill] sm:$0xff] }
 0x48c   :  { %v1173_v53 = vsub.f32 1.0, %v6695_v49  ;;  %v1178_v40 = vmul.f32 %v6695_v49, %v1176_v3 }
 0x48d   :  { %v1171_v60 = vadd.f32 %v1170_v42, %v1153_v63  ;;  %v8285_v42 = vld [vmem:[#allocation10_spill] sm:$0xff] }
 0x48f   :  { %6696 = vtanh.f32 %v1171_v60 }
 0x499   :  { %v6697_v13 = vpop.eup %6696 }
 0x49a   :  { %v1174_v37 = vmul.f32 %v6697_v13, %v1173_v53 }
 0x49c   :  { %v1179_v24 = vadd.f32 %v1178_v40, %v1174_v37  ;;  %v8286_v40 = vld [vmem:[#allocation11_spill] sm:$0xff] }
 0x49e   :  { %1181 = vrot.lane.b32.xlu0 %v1179_v24, %s6914_s9 }
 0x510   :  { %v1182_v25 = vpop.permute.xlu0 %1181 }
 0x511   :  { %v1184_v59 = vsel %vm592_vm0, %v1011_v5, %v1182_v25 }
 0x512   :  { %v1187_v29 = vsub.f32 %v1184_v59, %v7428_v55 }
 0x514   :  { %v1193_v2 = vmul.f32 %v1191_v34, %v1187_v29 }
 0x516   :  { %v7498_v6 = vadd.f32 %v1193_v2, %v7428_v55  ;;  %v117_v55 = vpop.permute.xlu1 %116 }
 0x517   :  { %v186_v5 = vmul.f32 %v7246_v46, %v117_v55  ;;  %v187_v7 = vmul.f32 %v7254_v52, %v117_v55 }
 0x518   :  { %1599 = vrot.lane.b32.xlu0 %v7498_v6, %s6915_s28  ;;  %5606 = vmatmul.mubr.msk.f32.vlgmr.msra.gmra.mrb[8].mxu0 %vm335_vm2, %v7498_v6 }
 0x519   :  { %5607 = vmatmul.mubr.msk.f32.vlgmr.msra.gmra.mrb[12].mxu1 %vm335_vm2, %v7498_v6  ;;  %6063 = vmatpush1.bf16.msra.mxu0 %v7122_v57  ;;  %v238_v63 = vadd.f32 %v8284_v58, %v186_v5  ;;  %v239_v24 = vadd.f32 %v8286_v40, %v187_v7 }
 0x51a   :  { %6065 = vmatprep.subr.bf16.mxu0 %v7135_v61  ;;  %1404 = vmatprep.mubr.f32.mxu0 %v8280_v12 }
 0x51b   :  { %6079 = vmatpush1.bf16.msra.mxu1 %v7160_v8  ;;  %1503 = vmatprep.mubr.f32.mxu1 %v8280_v12 }
 0x51c   :  { %6081 = vmatprep.subr.bf16.mxu1 %v7186_v21 }
 0x51d   :  { %6067 = vmatpush1.bf16.msra.mxu0 %v7146_v1 }
 0x51e   :  { %6069 = vmatprep.subr.bf16.mxu0 %v7171_v14 }
 0x51f   :  { %6083 = vmatpush1.bf16.msra.mxu1 %v7199_v26 }
 0x520   :  { %6084 = vmatprep.subr.bf16.mxu1 %v8281_v22 }
 0x521   :  { %6071 = vmatpush1.bf16.msra.mxu0 %v7184_v20 }
 0x522   :  { %6073 = vmatprep.subr.bf16.mxu0 %v7201_v28 }
 0x525   :  { %6075 = vmatpush1.bf16.msra.mxu0 %v7211_v33 }
 0x526   :  { %6091 = vmatprep.subr.bf16.mxu0 %v6963_v4 }
 0x528   :  { %5608 = vmatmul.mubr.msk.f32.vlgmr.msra.gmra.mrb[10].mxu0 %vm335_vm2, %v7498_v6 }
 0x529   :  { %6093 = vmatpush1.bf16.msra.mxu0 %v6974_v9  ;;  %1686 = vmatprep.mubr.f32.mxu0 %v8280_v12 }
 0x52a   :  { %6095 = vmatprep.subr.bf16.mxu0 %v6976_v10 }
 0x52d   :  { %6097 = vmatpush1.bf16.msra.mxu0 %v6992_v15 }
 0x52e   :  { %6099 = vmatprep.subr.bf16.mxu0 %v7004_v19 }
 0x531   :  { %6101 = vmatpush1.bf16.msra.mxu0 %v7038_v31 }
 0x532   :  { %6103 = vmatprep.subr.bf16.mxu0 %v7050_v35 }
 0x535   :  { %6105 = vmatpush1.bf16.msra.mxu0 %v7080_v45 }
 0x536   :  { %6123 = vmatprep.subr.bf16.mxu0 %v7114_v54 }
 0x5eb   :  { %v1264_v50 = vpop.f32.mrb[8].mxu0 }
 0x5ec   :  { %v1265_v60 = vadd.f32 %v1264_v50, %v8285_v42  ;;  %v1335_v49 = vpop.f32.mrb[12].mxu1  ;;  %v1266_v53 = vpop.f32.mrb[9].mxu0  ;;  %v188_v50 = vmul.f32 %v7280_v30, %v117_v55 }
 0x5ed   :  { %v1267_v13 = vadd.f32 %v1266_v53, %v7270_v62  ;;  %v1337_v3 = vpop.f32.mrb[13].mxu1  ;;  %v1336_v53 = vadd.f32 %v1335_v49, %v7284_v36 }
 0x5ee   :  { %v1415_v37 = vadd.f32 %v1265_v60, %v238_v63  ;;  %v240_v63 = vadd.f32 %v7287_v44, %v188_v50  ;;  %v1338_v55 = vadd.f32 %v1337_v3, %v7338_v41 }
 0x5ef   :  { %v1422_v59 = vadd.f32 %v1267_v13, %v239_v24 }
 0x5f0   :  { %v5609_v25 = vmul.f32 -1.442695, %v1415_v37 }
 0x5f1   :  { %v5610_v29 = vmul.f32 -1.442695, %v1422_v59 }
 0x5f2   :  { %6698 = vpow2.f32 %v5609_v25 }
 0x5f3   :  { %6700 = vpow2.f32 %v5610_v29 }
 0x5fb   :  { %v1406_v34 = vpop.f32.mrb[10].mxu0 }
 0x5fc   :  { %v6699_v2 = vpop.eup %6698  ;;  %v1408_v52 = vpop.f32.mrb[11].mxu0 }
 0x5fd   :  { %v1419_v46 = vadd.f32 1.0, %v6699_v2  ;;  %v6701_v5 = vpop.eup %6700  ;;  %v1407_v2 = vadd.f32 %v1406_v34, %v8283_v0 }
 0x5fe   :  { %v1426_v42 = vadd.f32 1.0, %v6701_v5 }
 0x5ff   :  { %6702 = vrcp.f32 %v1419_v46 }
 0x600   :  { %6704 = vrcp.f32 %v1426_v42  ;;  %v8287_v42 = vld [vmem:[#allocation15_spill] sm:$0xff] }
 0x609   :  { %v6703_v62 = vpop.eup %6702 }
 0x60a   :  { %v1429_v7 = vmul.f32 %v6703_v62, %v1336_v53  ;;  %v6705_v13 = vpop.eup %6704 }
 0x60b   :  { %v1432_v37 = vsub.f32 1.0, %v6705_v13  ;;  %v1434_v59 = vmul.f32 %v6705_v13, %v7498_v6 }
 0x60c   :  { %v1430_v60 = vadd.f32 %v1429_v7, %v240_v63 }
 0x60e   :  { %6706 = vtanh.f32 %v1430_v60 }
 0x618   :  { %v6707_v24 = vpop.eup %6706 }
 0x619   :  { %v1433_v25 = vmul.f32 %v6707_v24, %v1432_v37 }
 0x61b   :  { %v1435_v46 = vadd.f32 %v1434_v59, %v1433_v25  ;;  %v1409_v59 = vadd.f32 %v1408_v52, %v7352_v18 }
 0x61d   :  { %5611 = vmatmul.mubr.msk.f32.vlgmr.msra.gmra.mrb[14].mxu1 %vm592_vm0, %v1435_v46 }
 0x61e   :  { %6086 = vmatpush3.bf16.msra.mxu1 %v7298_v17  ;;  %5802 = vmatprep.mubr.msk.f32.mxu1 %vm6913_vm1, %v8280_v12 }
 0x61f   :  { %6087 = vmatprep.subr.bf16.mxu1 %v8281_v22 }
 0x622   :  { %6089 = vmatpush3.bf16.msra.mxu1 %v7311_v43 }
 0x623   :  { %6107 = vmatprep.subr.bf16.mxu1 %v7015_v23 }
 0x625   :  { %5803 = vmatmul.mubr.msk.f32.vlgmr.msra.gmra.mrb[16].mxu1 %vm592_vm0, %v1435_v46 }
 0x626   :  { %6109 = vmatpush1.bf16.msra.mxu1 %v7026_v27  ;;  %1757 = vmatprep.mubr.f32.mxu1 %v8280_v12 }
 0x627   :  { %6111 = vmatprep.subr.bf16.mxu1 %v7041_v32 }
 0x62a   :  { %6113 = vmatpush1.bf16.msra.mxu1 %v7059_v38 }
 0x62b   :  { %6115 = vmatprep.subr.bf16.mxu1 %v7062_v39 }
 0x62e   :  { %6117 = vmatpush1.bf16.msra.mxu1 %v7087_v47 }
 0x62f   :  { %6119 = vmatprep.subr.bf16.mxu1 %v7090_v48 }
 0x632   :  { %6121 = vmatpush1.bf16.msra.mxu1 %v7100_v51 }
 0x633   :  { %6139 = vmatprep.subr.bf16.mxu1 %v8282_v56 }
 0x6f0   :  { %v1505_v62 = vpop.f32.mrb[14].mxu1 }
 0x6f1   :  { %v1506_v49 = vadd.f32 %v1505_v62, %v8287_v42  ;;  %v1507_v29 = vpop.f32.mrb[15].mxu1 }
 0x6f2   :  { %v1508_v5 = vadd.f32 %v1507_v29, %v7344_v11 }
 0x6f3   :  { %v1580_v50 = vadd.f32 %v1506_v49, %v1338_v55 }
 0x6f4   :  { %v1587_v53 = vadd.f32 %v1508_v5, %v1407_v2 }
 0x6f5   :  { %v5613_v63 = vmul.f32 -1.442695, %v1580_v50  ;;  %v1600_v50 = vpop.permute.xlu0 %1599 }
 0x6f6   :  { %v5614_v13 = vmul.f32 -1.442695, %v1587_v53 }
 0x6f7   :  { %6708 = vpow2.f32 %v5613_v63 }
 0x6f8   :  { %v1576_v7 = vpop.f32.mrb[16].mxu1  ;;  %6710 = vpow2.f32 %v5614_v13 }
 0x6f9   :  { %v5804_v60 = vpop.f32.mrb[17].mxu1  ;;  %v1577_v34 = vadd.f32 %v1576_v7, %v7355_v16 }
 0x701   :  { %v6709_v37 = vpop.eup %6708 }
 0x702   :  { %v1584_v24 = vadd.f32 1.0, %v6709_v37  ;;  %v6711_v25 = vpop.eup %6710 }
 0x703   :  { %v1591_v3 = vadd.f32 1.0, %v6711_v25 }
 0x704   :  { %6712 = vrcp.f32 %v1584_v24  ;;  %v1615_v24 = vpop.permute.xlu1 %1614 }
 0x705   :  { %6714 = vrcp.f32 %v1591_v3 }
 0x70e   :  { %v6713_v62 = vpop.eup %6712 }
 0x70f   :  { %v1594_v29 = vmul.f32 %v6713_v62, %v1409_v59  ;;  %v6715_v49 = vpop.eup %6714  ;;  %v8289_v59 = vld [vmem:[#allocation8_spill] sm:$0xff] }
 0x710   :  { %v1597_v2 = vsub.f32 1.0, %v6715_v49  ;;  %v1602_v63 = vmul.f32 %v6715_v49, %v1600_v50  ;;  %v8291_v50 = vld [vmem:[#allocation12_spill] sm:$0xff] }
 0x711   :  { %v1595_v55 = vadd.f32 %v1594_v29, %v1577_v34 }
 0x713   :  { %6716 = vtanh.f32 %v1595_v55  ;;  %v8290_v55 = vld [vmem:[#allocation10_spill] sm:$0xff] }
 0x71d   :  { %v6717_v5 = vpop.eup %6716 }
 0x71e   :  { %v1598_v53 = vmul.f32 %v6717_v5, %v1597_v2 }
 0x720   :  { %v1603_v60 = vadd.f32 %v1602_v63, %v1598_v53 }
 0x722   :  { %1605 = vrot.lane.b32.xlu0 %v1603_v60, %s6914_s9 }
 0x794   :  { %v1606_v13 = vpop.permute.xlu0 %1605 }
 0x795   :  { %v1608_v37 = vsel %vm592_vm0, %v1435_v46, %v1606_v13  ;;  %v8288_v46 = vld [vmem:[#allocation7_spill] sm:$0xff] }
 0x796   :  { %v1611_v52 = vsub.f32 %v1608_v37, %v7498_v6 }
 0x798   :  { %v1617_v25 = vmul.f32 %v1615_v24, %v1611_v52 }
 0x79a   :  { %v7568_v7 = vadd.f32 %v1617_v25, %v7498_v6  ;;  %v122_v6 = vpop.permute.xlu1 %121 }
 0x79b   :  { %v189_v3 = vmul.f32 %v8288_v46, %v122_v6  ;;  %v190_v62 = vmul.f32 %v8289_v59, %v122_v6 }
 0x79c   :  { %2023 = vrot.lane.b32.xlu0 %v7568_v7, %s6915_s28  ;;  %5616 = vmatmul.mubr.msk.f32.vlgmr.msra.gmra.mrb[12].mxu0 %vm335_vm2, %v7568_v7 }
 0x79d   :  { %5617 = vmatmul.mubr.msk.f32.vlgmr.msra.gmra.mrb[18].mxu1 %vm335_vm2, %v7568_v7  ;;  %6125 = vmatpush1.bf16.msra.mxu0 %v7122_v57  ;;  %v241_v29 = vadd.f32 %v8284_v58, %v189_v3  ;;  %v242_v13 = vadd.f32 %v8286_v40, %v190_v62 }
 0x79e   :  { %6127 = vmatprep.subr.bf16.mxu0 %v7135_v61  ;;  %1828 = vmatprep.mubr.f32.mxu0 %v8280_v12 }
 0x79f   :  { %6141 = vmatpush1.bf16.msra.mxu1 %v7160_v8  ;;  %1927 = vmatprep.mubr.f32.mxu1 %v8280_v12 }
 0x7a0   :  { %6143 = vmatprep.subr.bf16.mxu1 %v7186_v21 }
 0x7a1   :  { %6129 = vmatpush1.bf16.msra.mxu0 %v7146_v1 }
 0x7a2   :  { %6131 = vmatprep.subr.bf16.mxu0 %v7171_v14 }
 0x7a3   :  { %6145 = vmatpush1.bf16.msra.mxu1 %v7199_v26 }
 0x7a4   :  { %6146 = vmatprep.subr.bf16.mxu1 %v8281_v22 }
 0x7a5   :  { %6133 = vmatpush1.bf16.msra.mxu0 %v7184_v20 }
 0x7a6   :  { %6135 = vmatprep.subr.bf16.mxu0 %v7201_v28 }
 0x7a9   :  { %6137 = vmatpush1.bf16.msra.mxu0 %v7211_v33 }
 0x7aa   :  { %6153 = vmatprep.subr.bf16.mxu0 %v6963_v4 }
 0x7ac   :  { %5618 = vmatmul.mubr.msk.f32.vlgmr.msra.gmra.mrb[14].mxu0 %vm335_vm2, %v7568_v7 }
 0x7ad   :  { %6155 = vmatpush1.bf16.msra.mxu0 %v6974_v9  ;;  %2110 = vmatprep.mubr.f32.mxu0 %v8280_v12 }
 0x7ae   :  { %6157 = vmatprep.subr.bf16.mxu0 %v6976_v10 }
 0x7b1   :  { %6159 = vmatpush1.bf16.msra.mxu0 %v6992_v15 }
 0x7b2   :  { %6161 = vmatprep.subr.bf16.mxu0 %v7004_v19 }
 0x7b5   :  { %6163 = vmatpush1.bf16.msra.mxu0 %v7038_v31 }
 0x7b6   :  { %6165 = vmatprep.subr.bf16.mxu0 %v7050_v35 }
 0x7b9   :  { %6167 = vmatpush1.bf16.msra.mxu0 %v7080_v45 }
 0x7ba   :  { %6185 = vmatprep.subr.bf16.mxu0 %v7114_v54 }
 0x86f   :  { %v1688_v34 = vpop.f32.mrb[12].mxu0 }
 0x870   :  { %v1689_v49 = vadd.f32 %v1688_v34, %v8290_v55  ;;  %v1759_v2 = vpop.f32.mrb[18].mxu1  ;;  %v1690_v5 = vpop.f32.mrb[13].mxu0  ;;  %v191_v34 = vmul.f32 %v7280_v30, %v122_v6 }
 0x871   :  { %v1691_v53 = vadd.f32 %v1690_v5, %v8291_v50  ;;  %v1761_v63 = vpop.f32.mrb[19].mxu1  ;;  %v1760_v5 = vadd.f32 %v1759_v2, %v7284_v36 }
 0x872   :  { %v1839_v60 = vadd.f32 %v1689_v49, %v241_v29  ;;  %v243_v29 = vadd.f32 %v7287_v44, %v191_v34 }
 0x873   :  { %v1846_v52 = vadd.f32 %v1691_v53, %v242_v13 }
 0x874   :  { %v5619_v37 = vmul.f32 -1.442695, %v1839_v60 }
 0x875   :  { %v5620_v24 = vmul.f32 -1.442695, %v1846_v52 }
 0x876   :  { %6718 = vpow2.f32 %v5619_v37 }
 0x877   :  { %6720 = vpow2.f32 %v5620_v24 }
 0x87f   :  { %v1830_v25 = vpop.f32.mrb[14].mxu0 }
 0x880   :  { %v6719_v59 = vpop.eup %6718  ;;  %v1832_v46 = vpop.f32.mrb[15].mxu0  ;;  %v1831_v52 = vadd.f32 %v1830_v25, %v8283_v0 }
 0x881   :  { %v1843_v54 = vadd.f32 1.0, %v6719_v59  ;;  %v6721_v3 = vpop.eup %6720 }
 0x882   :  { %v1850_v55 = vadd.f32 1.0, %v6721_v3 }
 0x883   :  { %6722 = vrcp.f32 %v1843_v54 }
 0x884   :  { %6724 = vrcp.f32 %v1850_v55  ;;  %v1762_v55 = vadd.f32 %v1761_v63, %v7338_v41 }
 0x88d   :  { %v6723_v50 = vpop.eup %6722 }
 0x88e   :  { %v1853_v62 = vmul.f32 %v6723_v50, %v1760_v5  ;;  %v6725_v53 = vpop.eup %6724 }
 0x88f   :  { %v1856_v60 = vsub.f32 1.0, %v6725_v53  ;;  %v1858_v59 = vmul.f32 %v6725_v53, %v7568_v7 }
 0x890   :  { %v1854_v49 = vadd.f32 %v1853_v62, %v243_v29 }
 0x892   :  { %6726 = vtanh.f32 %v1854_v49 }
 0x89c   :  { %v6727_v13 = vpop.eup %6726 }
 0x89d   :  { %v1857_v37 = vmul.f32 %v6727_v13, %v1856_v60 }
 0x89f   :  { %v1859_v54 = vadd.f32 %v1858_v59, %v1857_v37  ;;  %v1833_v37 = vadd.f32 %v1832_v46, %v7352_v18 }
 0x8a1   :  { %5621 = vmatmul.mubr.msk.f32.vlgmr.msra.gmra.mrb[20].mxu1 %vm592_vm0, %v1859_v54 }
 0x8a2   :  { %6148 = vmatpush3.bf16.msra.mxu1 %v7298_v17  ;;  %5813 = vmatprep.mubr.msk.f32.mxu1 %vm6913_vm1, %v8280_v12 }
 0x8a3   :  { %6149 = vmatprep.subr.bf16.mxu1 %v8281_v22 }
 0x8a6   :  { %6151 = vmatpush3.bf16.msra.mxu1 %v7311_v43 }
 0x8a7   :  { %6169 = vmatprep.subr.bf16.mxu1 %v7015_v23 }
 0x8a9   :  { %5814 = vmatmul.mubr.msk.f32.vlgmr.msra.gmra.mrb[22].mxu1 %vm592_vm0, %v1859_v54 }
 0x8aa   :  { %6171 = vmatpush1.bf16.msra.mxu1 %v7026_v27  ;;  %2181 = vmatprep.mubr.f32.mxu1 %v8280_v12 }
 0x8ab   :  { %6173 = vmatprep.subr.bf16.mxu1 %v7041_v32 }
 0x8ae   :  { %6175 = vmatpush1.bf16.msra.mxu1 %v7059_v38 }
 0x8af   :  { %6177 = vmatprep.subr.bf16.mxu1 %v7062_v39 }
 0x8b2   :  { %6179 = vmatpush1.bf16.msra.mxu1 %v7087_v47 }
 0x8b3   :  { %6181 = vmatprep.subr.bf16.mxu1 %v7090_v48 }
 0x8b6   :  { %6183 = vmatpush1.bf16.msra.mxu1 %v7100_v51 }
 0x8b7   :  { %6201 = vmatprep.subr.bf16.mxu1 %v8282_v56 }
 0x974   :  { %v1929_v6 = vpop.f32.mrb[20].mxu1 }
 0x975   :  { %v1930_v2 = vadd.f32 %v1929_v6, %v8287_v42  ;;  %v1931_v50 = vpop.f32.mrb[21].mxu1 }
 0x976   :  { %v1932_v24 = vadd.f32 %v1931_v50, %v7344_v11 }
 0x977   :  { %v2004_v3 = vadd.f32 %v1930_v2, %v1762_v55 }
 0x978   :  { %v2011_v34 = vadd.f32 %v1932_v24, %v1831_v52  ;;  %v2024_v24 = vpop.permute.xlu0 %2023 }
 0x979   :  { %v5623_v5 = vmul.f32 -1.442695, %v2004_v3 }
 0x97a   :  { %v5624_v49 = vmul.f32 -1.442695, %v2011_v34 }
 0x97b   :  { %6728 = vpow2.f32 %v5623_v5 }
 0x97c   :  { %v2000_v29 = vpop.f32.mrb[22].mxu1  ;;  %6730 = vpow2.f32 %v5624_v49 }
 0x97d   :  { %v5815_v62 = vpop.f32.mrb[23].mxu1  ;;  %v2001_v25 = vadd.f32 %v2000_v29, %v7355_v16 }
 0x985   :  { %v6729_v53 = vpop.eup %6728 }
 0x986   :  { %v2008_v60 = vadd.f32 1.0, %v6729_v53  ;;  %v6731_v13 = vpop.eup %6730  ;;  %v2039_v53 = vpop.permute.xlu1 %2038 }
 0x987   :  { %v2015_v63 = vadd.f32 1.0, %v6731_v13  ;;  %v8293_v13 = vld [vmem:[#allocation7_spill] sm:$0xff] }
 0x988   :  { %6732 = vrcp.f32 %v2008_v60 }
 0x989   :  { %6734 = vrcp.f32 %v2015_v63 }
 0x992   :  { %v6733_v59 = vpop.eup %6732 }
 0x993   :  { %v2018_v6 = vmul.f32 %v6733_v59, %v1833_v37  ;;  %v6735_v2 = vpop.eup %6734  ;;  %v8294_v37 = vld [vmem:[#allocation8_spill] sm:$0xff] }
 0x994   :  { %v2021_v50 = vsub.f32 1.0, %v6735_v2  ;;  %v2026_v34 = vmul.f32 %v6735_v2, %v2024_v24  ;;  %v8296_v24 = vld [vmem:[#allocation12_spill] sm:$0xff] }
 0x995   :  { %v2019_v55 = vadd.f32 %v2018_v6, %v2001_v25 }
 0x997   :  { %6736 = vtanh.f32 %v2019_v55  ;;  %v8295_v55 = vld [vmem:[#allocation10_spill] sm:$0xff] }
 0x9a1   :  { %v6737_v52 = vpop.eup %6736 }
 0x9a2   :  { %v2022_v3 = vmul.f32 %v6737_v52, %v2021_v50 }
 0x9a4   :  { %v2027_v5 = vadd.f32 %v2026_v34, %v2022_v3 }
 0x9a6   :  { %2029 = vrot.lane.b32.xlu0 %v2027_v5, %s6914_s9 }
 0xa18   :  { %v2030_v62 = vpop.permute.xlu0 %2029 }
 0xa19   :  { %v2032_v49 = vsel %vm592_vm0, %v1859_v54, %v2030_v62  ;;  %v127_v54 = vpop.permute.xlu1 %126 }
 0xa1a   :  { %v2035_v46 = vsub.f32 %v2032_v49, %v7568_v7  ;;  %v192_v63 = vmul.f32 %v8293_v13, %v127_v54  ;;  %v193_v59 = vmul.f32 %v8294_v37, %v127_v54 }
 0xa1c   :  { %v2041_v60 = vmul.f32 %v2039_v53, %v2035_v46  ;;  %v244_v6 = vadd.f32 %v8284_v58, %v192_v63  ;;  %v245_v62 = vadd.f32 %v8286_v40, %v193_v59 }
 0xa1e   :  { %v7638_v29 = vadd.f32 %v2041_v60, %v7568_v7  ;;  %v8292_v7 = vld [vmem:[#allocation3_spill] sm:$0xff] }
 0xa20   :  { %2447 = vrot.lane.b32.xlu0 %v7638_v29, %s6915_s28  ;;  %5626 = vmatmul.mubr.msk.f32.vlgmr.msra.gmra.mrb[16].mxu0 %vm335_vm2, %v7638_v29 }
 0xa21   :  { %5627 = vmatmul.mubr.msk.f32.vlgmr.msra.gmra.mrb[24].mxu1 %vm335_vm2, %v7638_v29  ;;  %6187 = vmatpush1.bf16.msra.mxu0 %v7122_v57 }
 0xa22   :  { %6189 = vmatprep.subr.bf16.mxu0 %v7135_v61  ;;  %2252 = vmatprep.mubr.f32.mxu0 %v8280_v12 }
 0xa23   :  { %6203 = vmatpush1.bf16.msra.mxu1 %v7160_v8  ;;  %2351 = vmatprep.mubr.f32.mxu1 %v8280_v12 }
 0xa24   :  { %6205 = vmatprep.subr.bf16.mxu1 %v7186_v21 }
 0xa25   :  { %6191 = vmatpush1.bf16.msra.mxu0 %v7146_v1 }
 0xa26   :  { %6193 = vmatprep.subr.bf16.mxu0 %v7171_v14 }
 0xa27   :  { %6207 = vmatpush1.bf16.msra.mxu1 %v7199_v26 }
 0xa28   :  { %6208 = vmatprep.subr.bf16.mxu1 %v8281_v22 }
 0xa29   :  { %6195 = vmatpush1.bf16.msra.mxu0 %v7184_v20 }
 0xa2a   :  { %6197 = vmatprep.subr.bf16.mxu0 %v7201_v28 }
 0xa2d   :  { %6199 = vmatpush1.bf16.msra.mxu0 %v7211_v33 }
 0xa2e   :  { %6215 = vmatprep.subr.bf16.mxu0 %v6963_v4 }
 0xa30   :  { %5628 = vmatmul.mubr.msk.f32.vlgmr.msra.gmra.mrb[18].mxu0 %vm335_vm2, %v7638_v29 }
 0xa31   :  { %6217 = vmatpush1.bf16.msra.mxu0 %v6974_v9  ;;  %2534 = vmatprep.mubr.f32.mxu0 %v8280_v12 }
 0xa32   :  { %6219 = vmatprep.subr.bf16.mxu0 %v6976_v10 }
 0xa35   :  { %6221 = vmatpush1.bf16.msra.mxu0 %v6992_v15 }
 0xa36   :  { %6223 = vmatprep.subr.bf16.mxu0 %v7004_v19 }
 0xa39   :  { %6225 = vmatpush1.bf16.msra.mxu0 %v7038_v31 }
 0xa3a   :  { %6227 = vmatprep.subr.bf16.mxu0 %v7050_v35 }
 0xa3d   :  { %6229 = vmatpush1.bf16.msra.mxu0 %v7080_v45 }
 0xa3e   :  { %6247 = vmatprep.subr.bf16.mxu0 %v8292_v7 }
 0xaf3   :  { %v2112_v25 = vpop.f32.mrb[16].mxu0 }
 0xaf4   :  { %v2113_v2 = vadd.f32 %v2112_v25, %v8295_v55  ;;  %v2183_v50 = vpop.f32.mrb[24].mxu1  ;;  %v2114_v52 = vpop.f32.mrb[17].mxu0  ;;  %v194_v25 = vmul.f32 %v7280_v30, %v127_v54 }
 0xaf5   :  { %v2115_v3 = vadd.f32 %v2114_v52, %v8296_v24  ;;  %v2185_v34 = vpop.f32.mrb[25].mxu1  ;;  %v2184_v52 = vadd.f32 %v2183_v50, %v7284_v36 }
 0xaf6   :  { %v2263_v5 = vadd.f32 %v2113_v2, %v244_v6  ;;  %v246_v6 = vadd.f32 %v7287_v44, %v194_v25 }
 0xaf7   :  { %v2270_v46 = vadd.f32 %v2115_v3, %v245_v62 }
 0xaf8   :  { %v5629_v49 = vmul.f32 -1.442695, %v2263_v5 }
 0xaf9   :  { %v5630_v53 = vmul.f32 -1.442695, %v2270_v46 }
 0xafa   :  { %6738 = vpow2.f32 %v5629_v49 }
 0xafb   :  { %6740 = vpow2.f32 %v5630_v53 }
 0xb03   :  { %v2254_v60 = vpop.f32.mrb[18].mxu0 }
 0xb04   :  { %v6739_v37 = vpop.eup %6738  ;;  %v2256_v13 = vpop.f32.mrb[19].mxu0  ;;  %v2255_v46 = vadd.f32 %v2254_v60, %v8283_v0 }
 0xb05   :  { %v2267_v7 = vadd.f32 1.0, %v6739_v37  ;;  %v6741_v63 = vpop.eup %6740 }
 0xb06   :  { %v2274_v55 = vadd.f32 1.0, %v6741_v63 }
 0xb07   :  { %6742 = vrcp.f32 %v2267_v7 }
 0xb08   :  { %6744 = vrcp.f32 %v2274_v55  ;;  %v2186_v55 = vadd.f32 %v2185_v34, %v7338_v41 }
 0xb11   :  { %v6743_v24 = vpop.eup %6742 }
 0xb12   :  { %v2277_v59 = vmul.f32 %v6743_v24, %v2184_v52  ;;  %v6745_v3 = vpop.eup %6744 }
 0xb13   :  { %v2280_v5 = vsub.f32 1.0, %v6745_v3  ;;  %v2282_v37 = vmul.f32 %v6745_v3, %v7638_v29 }
 0xb14   :  { %v2278_v2 = vadd.f32 %v2277_v59, %v246_v6 }
 0xb16   :  { %6746 = vtanh.f32 %v2278_v2 }
 0xb20   :  { %v6747_v62 = vpop.eup %6746 }
 0xb21   :  { %v2281_v49 = vmul.f32 %v6747_v62, %v2280_v5 }
 0xb23   :  { %v2283_v7 = vadd.f32 %v2282_v37, %v2281_v49  ;;  %v2257_v49 = vadd.f32 %v2256_v13, %v7352_v18 }
 0xb25   :  { %5631 = vmatmul.mubr.msk.f32.vlgmr.msra.gmra.mrb[26].mxu1 %vm592_vm0, %v2283_v7 }
 0xb26   :  { %6210 = vmatpush3.bf16.msra.mxu1 %v7298_v17  ;;  %5824 = vmatprep.mubr.msk.f32.mxu1 %vm6913_vm1, %v8280_v12 }
 0xb27   :  { %6211 = vmatprep.subr.bf16.mxu1 %v8281_v22 }
 0xb2a   :  { %6213 = vmatpush3.bf16.msra.mxu1 %v7311_v43 }
 0xb2b   :  { %6231 = vmatprep.subr.bf16.mxu1 %v7015_v23 }
 0xb2d   :  { %5825 = vmatmul.mubr.msk.f32.vlgmr.msra.gmra.mrb[28].mxu1 %vm592_vm0, %v2283_v7 }
 0xb2e   :  { %6233 = vmatpush1.bf16.msra.mxu1 %v7026_v27  ;;  %2605 = vmatprep.mubr.f32.mxu1 %v8280_v12 }
 0xb2f   :  { %6235 = vmatprep.subr.bf16.mxu1 %v7041_v32 }
 0xb32   :  { %6237 = vmatpush1.bf16.msra.mxu1 %v7059_v38 }
 0xb33   :  { %6239 = vmatprep.subr.bf16.mxu1 %v7062_v39 }
 0xb36   :  { %6241 = vmatpush1.bf16.msra.mxu1 %v7087_v47 }
 0xb37   :  { %6243 = vmatprep.subr.bf16.mxu1 %v7090_v48 }
 0xb3a   :  { %6245 = vmatpush1.bf16.msra.mxu1 %v7100_v51 }
 0xb3b   :  { %6263 = vmatprep.subr.bf16.mxu1 %v8282_v56 }
 0xbf8   :  { %v2353_v54 = vpop.f32.mrb[26].mxu1 }
 0xbf9   :  { %v2354_v50 = vadd.f32 %v2353_v54, %v8287_v42  ;;  %v2355_v24 = vpop.f32.mrb[27].mxu1 }
 0xbfa   :  { %v2356_v53 = vadd.f32 %v2355_v24, %v7344_v11 }
 0xbfb   :  { %v2428_v63 = vadd.f32 %v2354_v50, %v2186_v55 }
 0xbfc   :  { %v2435_v25 = vadd.f32 %v2356_v53, %v2255_v46  ;;  %v2448_v53 = vpop.permute.xlu0 %2447 }
 0xbfd   :  { %v5633_v52 = vmul.f32 -1.442695, %v2428_v63 }
 0xbfe   :  { %v5634_v2 = vmul.f32 -1.442695, %v2435_v25 }
 0xbff   :  { %6748 = vpow2.f32 %v5633_v52 }
 0xc00   :  { %v2424_v6 = vpop.f32.mrb[28].mxu1  ;;  %6750 = vpow2.f32 %v5634_v2 }
 0xc01   :  { %v5826_v59 = vpop.f32.mrb[29].mxu1  ;;  %v2425_v60 = vadd.f32 %v2424_v6, %v7355_v16 }
 0xc09   :  { %v6749_v3 = vpop.eup %6748 }
 0xc0a   :  { %v2432_v5 = vadd.f32 1.0, %v6749_v3  ;;  %v6751_v62 = vpop.eup %6750  ;;  %v2463_v3 = vpop.permute.xlu1 %2462 }
 0xc0b   :  { %v2439_v34 = vadd.f32 1.0, %v6751_v62  ;;  %v8298_v62 = vld [vmem:[#allocation7_spill] sm:$0xff] }
 0xc0c   :  { %6752 = vrcp.f32 %v2432_v5 }
 0xc0d   :  { %6754 = vrcp.f32 %v2439_v34 }
 0xc16   :  { %v6753_v37 = vpop.eup %6752 }
 0xc17   :  { %v2442_v54 = vmul.f32 %v6753_v37, %v2257_v49  ;;  %v6755_v50 = vpop.eup %6754  ;;  %v8299_v49 = vld [vmem:[#allocation8_spill] sm:$0xff] }
 0xc18   :  { %v2445_v24 = vsub.f32 1.0, %v6755_v50  ;;  %v2450_v25 = vmul.f32 %v6755_v50, %v2448_v53  ;;  %v8301_v53 = vld [vmem:[#allocation12_spill] sm:$0xff] }
 0xc19   :  { %v2443_v55 = vadd.f32 %v2442_v54, %v2425_v60 }
 0xc1b   :  { %6756 = vtanh.f32 %v2443_v55  ;;  %v8300_v55 = vld [vmem:[#allocation10_spill] sm:$0xff] }
 0xc25   :  { %v6757_v46 = vpop.eup %6756 }
 0xc26   :  { %v2446_v63 = vmul.f32 %v6757_v46, %v2445_v24 }
 0xc28   :  { %v2451_v52 = vadd.f32 %v2450_v25, %v2446_v63 }
 0xc2a   :  { %2453 = vrot.lane.b32.xlu0 %v2451_v52, %s6914_s9 }
 0xc9c   :  { %v2454_v59 = vpop.permute.xlu0 %2453 }
 0xc9d   :  { %v2456_v2 = vsel %vm592_vm0, %v2283_v7, %v2454_v59  ;;  %v132_v7 = vpop.permute.xlu1 %131 }
 0xc9e   :  { %v2459_v13 = vsub.f32 %v2456_v2, %v7638_v29  ;;  %v195_v34 = vmul.f32 %v8298_v62, %v132_v7  ;;  %v196_v37 = vmul.f32 %v8299_v49, %v132_v7 }
 0xca0   :  { %v2465_v5 = vmul.f32 %v2463_v3, %v2459_v13  ;;  %v247_v54 = vadd.f32 %v8284_v58, %v195_v34  ;;  %v248_v59 = vadd.f32 %v8286_v40, %v196_v37 }
 0xca2   :  { %v7708_v6 = vadd.f32 %v2465_v5, %v7638_v29  ;;  %v8297_v29 = vld [vmem:[#allocation3_spill] sm:$0xff] }
 0xca4   :  { %2871 = vrot.lane.b32.xlu0 %v7708_v6, %s6915_s28  ;;  %5636 = vmatmul.mubr.msk.f32.vlgmr.msra.gmra.mrb[20].mxu0 %vm335_vm2, %v7708_v6 }
 0xca5   :  { %5637 = vmatmul.mubr.msk.f32.vlgmr.msra.gmra.mrb[30].mxu1 %vm335_vm2, %v7708_v6  ;;  %6249 = vmatpush1.bf16.msra.mxu0 %v7122_v57 }
 0xca6   :  { %6251 = vmatprep.subr.bf16.mxu0 %v7135_v61  ;;  %2676 = vmatprep.mubr.f32.mxu0 %v8280_v12 }
 0xca7   :  { %6265 = vmatpush1.bf16.msra.mxu1 %v7160_v8  ;;  %2775 = vmatprep.mubr.f32.mxu1 %v8280_v12 }
 0xca8   :  { %6267 = vmatprep.subr.bf16.mxu1 %v7186_v21 }
 0xca9   :  { %6253 = vmatpush1.bf16.msra.mxu0 %v7146_v1 }
 0xcaa   :  { %6255 = vmatprep.subr.bf16.mxu0 %v7171_v14 }
 0xcab   :  { %6269 = vmatpush1.bf16.msra.mxu1 %v7199_v26 }
 0xcac   :  { %6270 = vmatprep.subr.bf16.mxu1 %v8281_v22 }
 0xcad   :  { %6257 = vmatpush1.bf16.msra.mxu0 %v7184_v20 }
 0xcae   :  { %6259 = vmatprep.subr.bf16.mxu0 %v7201_v28 }
 0xcb1   :  { %6261 = vmatpush1.bf16.msra.mxu0 %v7211_v33 }
 0xcb2   :  { %6277 = vmatprep.subr.bf16.mxu0 %v6963_v4 }
 0xcb4   :  { %5638 = vmatmul.mubr.msk.f32.vlgmr.msra.gmra.mrb[22].mxu0 %vm335_vm2, %v7708_v6 }
 0xcb5   :  { %6279 = vmatpush1.bf16.msra.mxu0 %v6974_v9  ;;  %2958 = vmatprep.mubr.f32.mxu0 %v8280_v12 }
 0xcb6   :  { %6281 = vmatprep.subr.bf16.mxu0 %v6976_v10 }
 0xcb9   :  { %6283 = vmatpush1.bf16.msra.mxu0 %v6992_v15 }
 0xcba   :  { %6285 = vmatprep.subr.bf16.mxu0 %v7004_v19 }
 0xcbd   :  { %6287 = vmatpush1.bf16.msra.mxu0 %v7038_v31 }
 0xcbe   :  { %6289 = vmatprep.subr.bf16.mxu0 %v7050_v35 }
 0xcc1   :  { %6291 = vmatpush1.bf16.msra.mxu0 %v7080_v45 }
 0xcc2   :  { %6309 = vmatprep.subr.bf16.mxu0 %v8297_v29 }
 0xd77   :  { %v2536_v60 = vpop.f32.mrb[20].mxu0 }
 0xd78   :  { %v2537_v50 = vadd.f32 %v2536_v60, %v8300_v55  ;;  %v2607_v24 = vpop.f32.mrb[30].mxu1  ;;  %v2538_v46 = vpop.f32.mrb[21].mxu0  ;;  %v197_v60 = vmul.f32 %v7280_v30, %v132_v7 }
 0xd79   :  { %v2539_v63 = vadd.f32 %v2538_v46, %v8301_v53  ;;  %v2609_v25 = vpop.f32.mrb[31].mxu1  ;;  %v2608_v46 = vadd.f32 %v2607_v24, %v7284_v36 }
 0xd7a   :  { %v2687_v52 = vadd.f32 %v2537_v50, %v247_v54  ;;  %v249_v54 = vadd.f32 %v7287_v44, %v197_v60 }
 0xd7b   :  { %v2694_v13 = vadd.f32 %v2539_v63, %v248_v59 }
 0xd7c   :  { %v5639_v2 = vmul.f32 -1.442695, %v2687_v52 }
 0xd7d   :  { %v5640_v3 = vmul.f32 -1.442695, %v2694_v13 }
 0xd7e   :  { %6758 = vpow2.f32 %v5639_v2 }
 0xd7f   :  { %6760 = vpow2.f32 %v5640_v3 }
 0xd87   :  { %v2678_v5 = vpop.f32.mrb[22].mxu0 }
 0xd88   :  { %v6759_v49 = vpop.eup %6758  ;;  %v2680_v62 = vpop.f32.mrb[23].mxu0  ;;  %v2679_v13 = vadd.f32 %v2678_v5, %v8283_v0 }
 0xd89   :  { %v2691_v29 = vadd.f32 1.0, %v6759_v49  ;;  %v6761_v34 = vpop.eup %6760 }
 0xd8a   :  { %v2698_v55 = vadd.f32 1.0, %v6761_v34 }
 0xd8b   :  { %6762 = vrcp.f32 %v2691_v29 }
 0xd8c   :  { %6764 = vrcp.f32 %v2698_v55  ;;  %v2610_v55 = vadd.f32 %v2609_v25, %v7338_v41 }
 0xd95   :  { %v6763_v53 = vpop.eup %6762 }
 0xd96   :  { %v2701_v37 = vmul.f32 %v6763_v53, %v2608_v46  ;;  %v6765_v63 = vpop.eup %6764 }
 0xd97   :  { %v2704_v52 = vsub.f32 1.0, %v6765_v63  ;;  %v2706_v49 = vmul.f32 %v6765_v63, %v7708_v6 }
 0xd98   :  { %v2702_v50 = vadd.f32 %v2701_v37, %v249_v54 }
 0xd9a   :  { %6766 = vtanh.f32 %v2702_v50 }
 0xda4   :  { %v6767_v59 = vpop.eup %6766 }
 0xda5   :  { %v2705_v2 = vmul.f32 %v6767_v59, %v2704_v52 }
 0xda7   :  { %v2707_v29 = vadd.f32 %v2706_v49, %v2705_v2  ;;  %v2681_v2 = vadd.f32 %v2680_v62, %v7352_v18 }
 0xda9   :  { %5641 = vmatmul.mubr.msk.f32.vlgmr.msra.gmra.mrb[32].mxu1 %vm592_vm0, %v2707_v29 }
 0xdaa   :  { %6272 = vmatpush3.bf16.msra.mxu1 %v7298_v17  ;;  %5835 = vmatprep.mubr.msk.f32.mxu1 %vm6913_vm1, %v8280_v12 }
 0xdab   :  { %6273 = vmatprep.subr.bf16.mxu1 %v8281_v22 }
 0xdae   :  { %6275 = vmatpush3.bf16.msra.mxu1 %v7311_v43 }
 0xdaf   :  { %6293 = vmatprep.subr.bf16.mxu1 %v7015_v23 }
 0xdb1   :  { %5836 = vmatmul.mubr.msk.f32.vlgmr.msra.gmra.mrb[34].mxu1 %vm592_vm0, %v2707_v29 }
 0xdb2   :  { %6295 = vmatpush1.bf16.msra.mxu1 %v7026_v27  ;;  %3029 = vmatprep.mubr.f32.mxu1 %v8280_v12 }
 0xdb3   :  { %6297 = vmatprep.subr.bf16.mxu1 %v7041_v32 }
 0xdb6   :  { %6299 = vmatpush1.bf16.msra.mxu1 %v7059_v38 }
 0xdb7   :  { %6301 = vmatprep.subr.bf16.mxu1 %v7062_v39 }
 0xdba   :  { %6303 = vmatpush1.bf16.msra.mxu1 %v7087_v47 }
 0xdbb   :  { %6305 = vmatprep.subr.bf16.mxu1 %v7090_v48 }
 0xdbe   :  { %6307 = vmatpush1.bf16.msra.mxu1 %v7100_v51 }
 0xdbf   :  { %6325 = vmatprep.subr.bf16.mxu1 %v8282_v56 }
 0xe7c   :  { %v2777_v7 = vpop.f32.mrb[32].mxu1 }
 0xe7d   :  { %v2778_v24 = vadd.f32 %v2777_v7, %v8287_v42  ;;  %v2779_v53 = vpop.f32.mrb[33].mxu1 }
 0xe7e   :  { %v2780_v3 = vadd.f32 %v2779_v53, %v7344_v11 }
 0xe7f   :  { %v2852_v34 = vadd.f32 %v2778_v24, %v2610_v55 }
 0xe80   :  { %v2859_v60 = vadd.f32 %v2780_v3, %v2679_v13  ;;  %v2872_v3 = vpop.permute.xlu0 %2871 }
 0xe81   :  { %v5643_v46 = vmul.f32 -1.442695, %v2852_v34 }
 0xe82   :  { %v5644_v50 = vmul.f32 -1.442695, %v2859_v60 }
 0xe83   :  { %6768 = vpow2.f32 %v5643_v46 }
 0xe84   :  { %v2848_v54 = vpop.f32.mrb[34].mxu1  ;;  %6770 = vpow2.f32 %v5644_v50 }
 0xe85   :  { %v5837_v37 = vpop.f32.mrb[35].mxu1  ;;  %v2849_v5 = vadd.f32 %v2848_v54, %v7355_v16 }
 0xe8d   :  { %v6769_v63 = vpop.eup %6768 }
 0xe8e   :  { %v2856_v52 = vadd.f32 1.0, %v6769_v63  ;;  %v6771_v59 = vpop.eup %6770  ;;  %v2887_v63 = vpop.permute.xlu1 %2886 }
 0xe8f   :  { %v2863_v25 = vadd.f32 1.0, %v6771_v59  ;;  %v8303_v59 = vld [vmem:[#allocation7_spill] sm:$0xff] }
 0xe90   :  { %6772 = vrcp.f32 %v2856_v52 }
 0xe91   :  { %6774 = vrcp.f32 %v2863_v25 }
 0xe9a   :  { %v6773_v49 = vpop.eup %6772 }
 0xe9b   :  { %v2866_v7 = vmul.f32 %v6773_v49, %v2681_v2  ;;  %v6775_v24 = vpop.eup %6774  ;;  %v8304_v2 = vld [vmem:[#allocation8_spill] sm:$0xff] }
 0xe9c   :  { %v2869_v53 = vsub.f32 1.0, %v6775_v24  ;;  %v2874_v60 = vmul.f32 %v6775_v24, %v2872_v3  ;;  %v8306_v3 = vld [vmem:[#allocation12_spill] sm:$0xff] }
 0xe9d   :  { %v2867_v55 = vadd.f32 %v2866_v7, %v2849_v5 }
 0xe9f   :  { %6776 = vtanh.f32 %v2867_v55  ;;  %v8305_v55 = vld [vmem:[#allocation10_spill] sm:$0xff] }
 0xea9   :  { %v6777_v13 = vpop.eup %6776 }
 0xeaa   :  { %v2870_v34 = vmul.f32 %v6777_v13, %v2869_v53 }
 0xeac   :  { %v2875_v46 = vadd.f32 %v2874_v60, %v2870_v34 }
 0xeae   :  { %2877 = vrot.lane.b32.xlu0 %v2875_v46, %s6914_s9 }
 0xf20   :  { %v2878_v37 = vpop.permute.xlu0 %2877 }
 0xf21   :  { %v2880_v50 = vsel %vm592_vm0, %v2707_v29, %v2878_v37  ;;  %v137_v29 = vpop.permute.xlu1 %136 }
 0xf22   :  { %v2883_v62 = vsub.f32 %v2880_v50, %v7708_v6  ;;  %v198_v25 = vmul.f32 %v8303_v59, %v137_v29  ;;  %v199_v49 = vmul.f32 %v8304_v2, %v137_v29 }
 0xf24   :  { %v2889_v52 = vmul.f32 %v2887_v63, %v2883_v62  ;;  %v250_v7 = vadd.f32 %v8284_v58, %v198_v25  ;;  %v251_v37 = vadd.f32 %v8286_v40, %v199_v49 }
 0xf26   :  { %v7778_v54 = vadd.f32 %v2889_v52, %v7708_v6  ;;  %v8302_v6 = vld [vmem:[#allocation3_spill] sm:$0xff] }
 0xf28   :  { %3295 = vrot.lane.b32.xlu0 %v7778_v54, %s6915_s28  ;;  %5646 = vmatmul.mubr.msk.f32.vlgmr.msra.gmra.mrb[24].mxu0 %vm335_vm2, %v7778_v54 }
 0xf29   :  { %5647 = vmatmul.mubr.msk.f32.vlgmr.msra.gmra.mrb[36].mxu1 %vm335_vm2, %v7778_v54  ;;  %6311 = vmatpush1.bf16.msra.mxu0 %v7122_v57 }
 0xf2a   :  { %6313 = vmatprep.subr.bf16.mxu0 %v7135_v61  ;;  %3100 = vmatprep.mubr.f32.mxu0 %v8280_v12 }
 0xf2b   :  { %6327 = vmatpush1.bf16.msra.mxu1 %v7160_v8  ;;  %3199 = vmatprep.mubr.f32.mxu1 %v8280_v12 }
 0xf2c   :  { %6329 = vmatprep.subr.bf16.mxu1 %v7186_v21 }
 0xf2d   :  { %6315 = vmatpush1.bf16.msra.mxu0 %v7146_v1 }
 0xf2e   :  { %6317 = vmatprep.subr.bf16.mxu0 %v7171_v14 }
 0xf2f   :  { %6331 = vmatpush1.bf16.msra.mxu1 %v7199_v26 }
 0xf30   :  { %6332 = vmatprep.subr.bf16.mxu1 %v8281_v22 }
 0xf31   :  { %6319 = vmatpush1.bf16.msra.mxu0 %v7184_v20 }
 0xf32   :  { %6321 = vmatprep.subr.bf16.mxu0 %v7201_v28 }
 0xf35   :  { %6323 = vmatpush1.bf16.msra.mxu0 %v7211_v33 }
 0xf36   :  { %6339 = vmatprep.subr.bf16.mxu0 %v6963_v4 }
 0xf38   :  { %5648 = vmatmul.mubr.msk.f32.vlgmr.msra.gmra.mrb[26].mxu0 %vm335_vm2, %v7778_v54 }
 0xf39   :  { %6341 = vmatpush1.bf16.msra.mxu0 %v6974_v9  ;;  %3382 = vmatprep.mubr.f32.mxu0 %v8280_v12 }
 0xf3a   :  { %6343 = vmatprep.subr.bf16.mxu0 %v6976_v10 }
 0xf3d   :  { %6345 = vmatpush1.bf16.msra.mxu0 %v6992_v15 }
 0xf3e   :  { %6347 = vmatprep.subr.bf16.mxu0 %v7004_v19 }
 0xf41   :  { %6349 = vmatpush1.bf16.msra.mxu0 %v7038_v31 }
 0xf42   :  { %6351 = vmatprep.subr.bf16.mxu0 %v7050_v35 }
 0xf45   :  { %6353 = vmatpush1.bf16.msra.mxu0 %v7080_v45 }
 0xf46   :  { %6371 = vmatprep.subr.bf16.mxu0 %v8302_v6 }
 0xffb   :  { %v2960_v5 = vpop.f32.mrb[24].mxu0 }
 0xffc   :  { %v2961_v24 = vadd.f32 %v2960_v5, %v8305_v55  ;;  %v3031_v53 = vpop.f32.mrb[36].mxu1  ;;  %v2962_v13 = vpop.f32.mrb[25].mxu0  ;;  %v200_v5 = vmul.f32 %v7280_v30, %v137_v29 }
 0xffd   :  { %v2963_v34 = vadd.f32 %v2962_v13, %v8306_v3  ;;  %v3033_v60 = vpop.f32.mrb[37].mxu1  ;;  %v3032_v13 = vadd.f32 %v3031_v53, %v7284_v36 }
 0xffe   :  { %v3111_v46 = vadd.f32 %v2961_v24, %v250_v7  ;;  %v252_v7 = vadd.f32 %v7287_v44, %v200_v5 }
 0xfff   :  { %v3118_v62 = vadd.f32 %v2963_v34, %v251_v37 }
0x1000   :  { %v5649_v50 = vmul.f32 -1.442695, %v3111_v46 }
0x1001   :  { %v5650_v63 = vmul.f32 -1.442695, %v3118_v62 }
0x1002   :  { %6778 = vpow2.f32 %v5649_v50 }
0x1003   :  { %6780 = vpow2.f32 %v5650_v63 }
0x100b   :  { %v3102_v52 = vpop.f32.mrb[26].mxu0 }
0x100c   :  { %v6779_v2 = vpop.eup %6778  ;;  %v3104_v59 = vpop.f32.mrb[27].mxu0  ;;  %v3103_v62 = vadd.f32 %v3102_v52, %v8283_v0 }
0x100d   :  { %v3115_v6 = vadd.f32 1.0, %v6779_v2  ;;  %v6781_v25 = vpop.eup %6780 }
0x100e   :  { %v3122_v55 = vadd.f32 1.0, %v6781_v25 }
0x100f   :  { %6782 = vrcp.f32 %v3115_v6 }
0x1010   :  { %6784 = vrcp.f32 %v3122_v55  ;;  %v3034_v55 = vadd.f32 %v3033_v60, %v7338_v41 }
0x1019   :  { %v6783_v3 = vpop.eup %6782 }
0x101a   :  { %v3125_v49 = vmul.f32 %v6783_v3, %v3032_v13  ;;  %v6785_v34 = vpop.eup %6784 }
0x101b   :  { %v3128_v46 = vsub.f32 1.0, %v6785_v34  ;;  %v3130_v2 = vmul.f32 %v6785_v34, %v7778_v54 }
0x101c   :  { %v3126_v24 = vadd.f32 %v3125_v49, %v252_v7 }
0x101e   :  { %6786 = vtanh.f32 %v3126_v24 }
0x1028   :  { %v6787_v37 = vpop.eup %6786 }
0x1029   :  { %v3129_v50 = vmul.f32 %v6787_v37, %v3128_v46 }
0x102b   :  { %v3131_v6 = vadd.f32 %v3130_v2, %v3129_v50  ;;  %v3105_v50 = vadd.f32 %v3104_v59, %v7352_v18 }
0x102d   :  { %5651 = vmatmul.mubr.msk.f32.vlgmr.msra.gmra.mrb[38].mxu1 %vm592_vm0, %v3131_v6 }
0x102e   :  { %6334 = vmatpush3.bf16.msra.mxu1 %v7298_v17  ;;  %5846 = vmatprep.mubr.msk.f32.mxu1 %vm6913_vm1, %v8280_v12 }
0x102f   :  { %6335 = vmatprep.subr.bf16.mxu1 %v8281_v22 }
0x1032   :  { %6337 = vmatpush3.bf16.msra.mxu1 %v7311_v43 }
0x1033   :  { %6355 = vmatprep.subr.bf16.mxu1 %v7015_v23 }
0x1035   :  { %5847 = vmatmul.mubr.msk.f32.vlgmr.msra.gmra.mrb[40].mxu1 %vm592_vm0, %v3131_v6 }
0x1036   :  { %6357 = vmatpush1.bf16.msra.mxu1 %v7026_v27  ;;  %3453 = vmatprep.mubr.f32.mxu1 %v8280_v12 }
0x1037   :  { %6359 = vmatprep.subr.bf16.mxu1 %v7041_v32 }
0x103a   :  { %6361 = vmatpush1.bf16.msra.mxu1 %v7059_v38 }
0x103b   :  { %6363 = vmatprep.subr.bf16.mxu1 %v7062_v39 }
0x103e   :  { %6365 = vmatpush1.bf16.msra.mxu1 %v7087_v47 }
0x103f   :  { %6367 = vmatprep.subr.bf16.mxu1 %v7090_v48 }
0x1042   :  { %6369 = vmatpush1.bf16.msra.mxu1 %v7100_v51 }
0x1043   :  { %6387 = vmatprep.subr.bf16.mxu1 %v8282_v56 }
0x1100   :  { %v3201_v29 = vpop.f32.mrb[38].mxu1 }
0x1101   :  { %v3202_v53 = vadd.f32 %v3201_v29, %v8287_v42  ;;  %v3203_v3 = vpop.f32.mrb[39].mxu1 }
0x1102   :  { %v3204_v63 = vadd.f32 %v3203_v3, %v7344_v11 }
0x1103   :  { %v3276_v25 = vadd.f32 %v3202_v53, %v3034_v55 }
0x1104   :  { %v3283_v5 = vadd.f32 %v3204_v63, %v3103_v62  ;;  %v3296_v63 = vpop.permute.xlu0 %3295 }
0x1105   :  { %v5653_v13 = vmul.f32 -1.442695, %v3276_v25 }
0x1106   :  { %v5654_v24 = vmul.f32 -1.442695, %v3283_v5 }
0x1107   :  { %6788 = vpow2.f32 %v5653_v13 }
0x1108   :  { %v3272_v7 = vpop.f32.mrb[40].mxu1  ;;  %6790 = vpow2.f32 %v5654_v24 }
0x1109   :  { %v5848_v49 = vpop.f32.mrb[41].mxu1  ;;  %v3273_v52 = vadd.f32 %v3272_v7, %v7355_v16 }
0x1111   :  { %v6789_v34 = vpop.eup %6788 }
0x1112   :  { %v3280_v46 = vadd.f32 1.0, %v6789_v34  ;;  %v6791_v37 = vpop.eup %6790  ;;  %v3311_v34 = vpop.permute.xlu1 %3310 }
0x1113   :  { %v3287_v60 = vadd.f32 1.0, %v6791_v37  ;;  %v8308_v37 = vld [vmem:[#allocation7_spill] sm:$0xff] }
0x1114   :  { %6792 = vrcp.f32 %v3280_v46 }
0x1115   :  { %6794 = vrcp.f32 %v3287_v60 }
0x111e   :  { %v6793_v2 = vpop.eup %6792 }
0x111f   :  { %v3290_v29 = vmul.f32 %v6793_v2, %v3105_v50  ;;  %v6795_v53 = vpop.eup %6794  ;;  %v8309_v50 = vld [vmem:[#allocation8_spill] sm:$0xff] }
0x1120   :  { %v3293_v3 = vsub.f32 1.0, %v6795_v53  ;;  %v3298_v5 = vmul.f32 %v6795_v53, %v3296_v63  ;;  %v8311_v63 = vld [vmem:[#allocation12_spill] sm:$0xff] }
0x1121   :  { %v3291_v55 = vadd.f32 %v3290_v29, %v3273_v52 }
0x1123   :  { %6796 = vtanh.f32 %v3291_v55  ;;  %v8310_v55 = vld [vmem:[#allocation10_spill] sm:$0xff] }
0x112d   :  { %v6797_v62 = vpop.eup %6796 }
0x112e   :  { %v3294_v25 = vmul.f32 %v6797_v62, %v3293_v3 }
0x1130   :  { %v3299_v13 = vadd.f32 %v3298_v5, %v3294_v25 }
0x1132   :  { %3301 = vrot.lane.b32.xlu0 %v3299_v13, %s6914_s9 }
0x11a4   :  { %v3302_v49 = vpop.permute.xlu0 %3301 }
0x11a5   :  { %v3304_v24 = vsel %vm592_vm0, %v3131_v6, %v3302_v49  ;;  %v142_v6 = vpop.permute.xlu1 %141 }
0x11a6   :  { %v3307_v59 = vsub.f32 %v3304_v24, %v7778_v54  ;;  %v201_v60 = vmul.f32 %v8308_v37, %v142_v6  ;;  %v202_v2 = vmul.f32 %v8309_v50, %v142_v6 }
0x11a8   :  { %v3313_v46 = vmul.f32 %v3311_v34, %v3307_v59  ;;  %v253_v29 = vadd.f32 %v8284_v58, %v201_v60  ;;  %v254_v49 = vadd.f32 %v8286_v40, %v202_v2 }
0x11aa   :  { %v7848_v7 = vadd.f32 %v3313_v46, %v7778_v54  ;;  %v8307_v54 = vld [vmem:[#allocation3_spill] sm:$0xff] }
0x11ac   :  { %3719 = vrot.lane.b32.xlu0 %v7848_v7, %s6915_s28  ;;  %5656 = vmatmul.mubr.msk.f32.vlgmr.msra.gmra.mrb[28].mxu0 %vm335_vm2, %v7848_v7 }
0x11ad   :  { %5657 = vmatmul.mubr.msk.f32.vlgmr.msra.gmra.mrb[42].mxu1 %vm335_vm2, %v7848_v7  ;;  %6373 = vmatpush1.bf16.msra.mxu0 %v7122_v57 }
0x11ae   :  { %6375 = vmatprep.subr.bf16.mxu0 %v7135_v61  ;;  %3524 = vmatprep.mubr.f32.mxu0 %v8280_v12 }
0x11af   :  { %6389 = vmatpush1.bf16.msra.mxu1 %v7160_v8  ;;  %3623 = vmatprep.mubr.f32.mxu1 %v8280_v12 }
0x11b0   :  { %6391 = vmatprep.subr.bf16.mxu1 %v7186_v21 }
0x11b1   :  { %6377 = vmatpush1.bf16.msra.mxu0 %v7146_v1 }
0x11b2   :  { %6379 = vmatprep.subr.bf16.mxu0 %v7171_v14 }
0x11b3   :  { %6393 = vmatpush1.bf16.msra.mxu1 %v7199_v26 }
0x11b4   :  { %6394 = vmatprep.subr.bf16.mxu1 %v8281_v22 }
0x11b5   :  { %6381 = vmatpush1.bf16.msra.mxu0 %v7184_v20 }
0x11b6   :  { %6383 = vmatprep.subr.bf16.mxu0 %v7201_v28 }
0x11b9   :  { %6385 = vmatpush1.bf16.msra.mxu0 %v7211_v33 }
0x11ba   :  { %6401 = vmatprep.subr.bf16.mxu0 %v6963_v4 }
0x11bc   :  { %5658 = vmatmul.mubr.msk.f32.vlgmr.msra.gmra.mrb[30].mxu0 %vm335_vm2, %v7848_v7 }
0x11bd   :  { %6403 = vmatpush1.bf16.msra.mxu0 %v6974_v9  ;;  %3806 = vmatprep.mubr.f32.mxu0 %v8280_v12 }
0x11be   :  { %6405 = vmatprep.subr.bf16.mxu0 %v6976_v10 }
0x11c1   :  { %6407 = vmatpush1.bf16.msra.mxu0 %v6992_v15 }
0x11c2   :  { %6409 = vmatprep.subr.bf16.mxu0 %v7004_v19 }
0x11c5   :  { %6411 = vmatpush1.bf16.msra.mxu0 %v7038_v31 }
0x11c6   :  { %6413 = vmatprep.subr.bf16.mxu0 %v7050_v35 }
0x11c9   :  { %6415 = vmatpush1.bf16.msra.mxu0 %v7080_v45 }
0x11ca   :  { %6433 = vmatprep.subr.bf16.mxu0 %v8307_v54 }
0x127f   :  { %v3384_v52 = vpop.f32.mrb[28].mxu0 }
0x1280   :  { %v3385_v53 = vadd.f32 %v3384_v52, %v8310_v55  ;;  %v3455_v3 = vpop.f32.mrb[42].mxu1  ;;  %v3386_v62 = vpop.f32.mrb[29].mxu0  ;;  %v203_v52 = vmul.f32 %v7280_v30, %v142_v6 }
0x1281   :  { %v3387_v25 = vadd.f32 %v3386_v62, %v8311_v63  ;;  %v3457_v5 = vpop.f32.mrb[43].mxu1  ;;  %v3456_v62 = vadd.f32 %v3455_v3, %v7284_v36 }
0x1282   :  { %v3535_v13 = vadd.f32 %v3385_v53, %v253_v29  ;;  %v255_v29 = vadd.f32 %v7287_v44, %v203_v52 }
0x1283   :  { %v3542_v59 = vadd.f32 %v3387_v25, %v254_v49 }
0x1284   :  { %v5659_v24 = vmul.f32 -1.442695, %v3535_v13 }
0x1285   :  { %v5660_v34 = vmul.f32 -1.442695, %v3542_v59 }
0x1286   :  { %6798 = vpow2.f32 %v5659_v24 }
0x1287   :  { %6800 = vpow2.f32 %v5660_v34 }
0x128f   :  { %v3526_v46 = vpop.f32.mrb[30].mxu0 }
0x1290   :  { %v6799_v50 = vpop.eup %6798  ;;  %v3528_v37 = vpop.f32.mrb[31].mxu0  ;;  %v3527_v59 = vadd.f32 %v3526_v46, %v8283_v0 }
0x1291   :  { %v3539_v54 = vadd.f32 1.0, %v6799_v50  ;;  %v6801_v60 = vpop.eup %6800 }
0x1292   :  { %v3546_v55 = vadd.f32 1.0, %v6801_v60 }
0x1293   :  { %6802 = vrcp.f32 %v3539_v54 }
0x1294   :  { %6804 = vrcp.f32 %v3546_v55  ;;  %v3458_v55 = vadd.f32 %v3457_v5, %v7338_v41 }
0x129d   :  { %v6803_v63 = vpop.eup %6802 }
0x129e   :  { %v3549_v2 = vmul.f32 %v6803_v63, %v3456_v62  ;;  %v6805_v25 = vpop.eup %6804 }
0x129f   :  { %v3552_v13 = vsub.f32 1.0, %v6805_v25  ;;  %v3554_v50 = vmul.f32 %v6805_v25, %v7848_v7 }
0x12a0   :  { %v3550_v53 = vadd.f32 %v3549_v2, %v255_v29 }
0x12a2   :  { %6806 = vtanh.f32 %v3550_v53 }
0x12ac   :  { %v6807_v49 = vpop.eup %6806 }
0x12ad   :  { %v3553_v24 = vmul.f32 %v6807_v49, %v3552_v13 }
0x12af   :  { %v3555_v54 = vadd.f32 %v3554_v50, %v3553_v24  ;;  %v3529_v24 = vadd.f32 %v3528_v37, %v7352_v18 }
0x12b1   :  { %5661 = vmatmul.mubr.msk.f32.vlgmr.msra.gmra.mrb[44].mxu1 %vm592_vm0, %v3555_v54 }
0x12b2   :  { %6396 = vmatpush3.bf16.msra.mxu1 %v7298_v17  ;;  %5857 = vmatprep.mubr.msk.f32.mxu1 %vm6913_vm1, %v8280_v12 }
0x12b3   :  { %6397 = vmatprep.subr.bf16.mxu1 %v8281_v22 }
0x12b6   :  { %6399 = vmatpush3.bf16.msra.mxu1 %v7311_v43 }
0x12b7   :  { %6417 = vmatprep.subr.bf16.mxu1 %v7015_v23 }
0x12b9   :  { %5858 = vmatmul.mubr.msk.f32.vlgmr.msra.gmra.mrb[46].mxu1 %vm592_vm0, %v3555_v54 }
0x12ba   :  { %6419 = vmatpush1.bf16.msra.mxu1 %v7026_v27  ;;  %3877 = vmatprep.mubr.f32.mxu1 %v8280_v12 }
0x12bb   :  { %6421 = vmatprep.subr.bf16.mxu1 %v7041_v32 }
0x12be   :  { %6423 = vmatpush1.bf16.msra.mxu1 %v7059_v38 }
0x12bf   :  { %6425 = vmatprep.subr.bf16.mxu1 %v7062_v39 }
0x12c2   :  { %6427 = vmatpush1.bf16.msra.mxu1 %v7087_v47 }
0x12c3   :  { %6429 = vmatprep.subr.bf16.mxu1 %v7090_v48 }
0x12c6   :  { %6431 = vmatpush1.bf16.msra.mxu1 %v7100_v51 }
0x12c7   :  { %6449 = vmatprep.subr.bf16.mxu1 %v8282_v56 }
0x1384   :  { %v3625_v6 = vpop.f32.mrb[44].mxu1 }
0x1385   :  { %v3626_v3 = vadd.f32 %v3625_v6, %v8287_v42  ;;  %v3627_v63 = vpop.f32.mrb[45].mxu1 }
0x1386   :  { %v3628_v34 = vadd.f32 %v3627_v63, %v7344_v11 }
0x1387   :  { %v3700_v60 = vadd.f32 %v3626_v3, %v3458_v55 }
0x1388   :  { %v3707_v52 = vadd.f32 %v3628_v34, %v3527_v59  ;;  %v3720_v34 = vpop.permute.xlu0 %3719 }
0x1389   :  { %v5663_v62 = vmul.f32 -1.442695, %v3700_v60 }
0x138a   :  { %v5664_v53 = vmul.f32 -1.442695, %v3707_v52 }
0x138b   :  { %6808 = vpow2.f32 %v5663_v62 }
0x138c   :  { %v3696_v29 = vpop.f32.mrb[46].mxu1  ;;  %6810 = vpow2.f32 %v5664_v53 }
0x138d   :  { %v5859_v2 = vpop.f32.mrb[47].mxu1  ;;  %v3697_v46 = vadd.f32 %v3696_v29, %v7355_v16 }
0x1395   :  { %v6809_v25 = vpop.eup %6808 }
0x1396   :  { %v3704_v13 = vadd.f32 1.0, %v6809_v25  ;;  %v6811_v49 = vpop.eup %6810  ;;  %v3735_v25 = vpop.permute.xlu1 %3734 }
0x1397   :  { %v3711_v5 = vadd.f32 1.0, %v6811_v49  ;;  %v8313_v49 = vld [vmem:[#allocation7_spill] sm:$0xff] }
0x1398   :  { %6812 = vrcp.f32 %v3704_v13 }
0x1399   :  { %6814 = vrcp.f32 %v3711_v5 }
0x13a2   :  { %v6813_v50 = vpop.eup %6812 }
0x13a3   :  { %v3714_v6 = vmul.f32 %v6813_v50, %v3529_v24  ;;  %v6815_v3 = vpop.eup %6814  ;;  %v8314_v24 = vld [vmem:[#allocation8_spill] sm:$0xff] }
0x13a4   :  { %v3717_v63 = vsub.f32 1.0, %v6815_v3  ;;  %v3722_v52 = vmul.f32 %v6815_v3, %v3720_v34  ;;  %v8316_v34 = vld [vmem:[#allocation12_spill] sm:$0xff] }
0x13a5   :  { %v3715_v55 = vadd.f32 %v3714_v6, %v3697_v46 }
0x13a7   :  { %6816 = vtanh.f32 %v3715_v55  ;;  %v8315_v55 = vld [vmem:[#allocation10_spill] sm:$0xff] }
0x13b1   :  { %v6817_v59 = vpop.eup %6816 }
0x13b2   :  { %v3718_v60 = vmul.f32 %v6817_v59, %v3717_v63 }
0x13b4   :  { %v3723_v62 = vadd.f32 %v3722_v52, %v3718_v60 }
0x13b6   :  { %3725 = vrot.lane.b32.xlu0 %v3723_v62, %s6914_s9 }
0x1428   :  { %v3726_v2 = vpop.permute.xlu0 %3725 }
0x1429   :  { %v3728_v53 = vsel %vm592_vm0, %v3555_v54, %v3726_v2  ;;  %v147_v54 = vpop.permute.xlu1 %146 }
0x142a   :  { %v3731_v37 = vsub.f32 %v3728_v53, %v7848_v7  ;;  %v204_v5 = vmul.f32 %v8313_v49, %v147_v54  ;;  %v205_v50 = vmul.f32 %v8314_v24, %v147_v54 }
0x142c   :  { %v3737_v13 = vmul.f32 %v3735_v25, %v3731_v37  ;;  %v256_v6 = vadd.f32 %v8284_v58, %v204_v5  ;;  %v257_v2 = vadd.f32 %v8286_v40, %v205_v50 }
0x142e   :  { %v7918_v29 = vadd.f32 %v3737_v13, %v7848_v7  ;;  %v8312_v7 = vld [vmem:[#allocation3_spill] sm:$0xff] }
0x1430   :  { %4143 = vrot.lane.b32.xlu0 %v7918_v29, %s6915_s28  ;;  %5666 = vmatmul.mubr.msk.f32.vlgmr.msra.gmra.mrb[32].mxu0 %vm335_vm2, %v7918_v29 }
0x1431   :  { %5667 = vmatmul.mubr.msk.f32.vlgmr.msra.gmra.mrb[48].mxu1 %vm335_vm2, %v7918_v29  ;;  %6435 = vmatpush1.bf16.msra.mxu0 %v7122_v57 }
0x1432   :  { %6437 = vmatprep.subr.bf16.mxu0 %v7135_v61  ;;  %3948 = vmatprep.mubr.f32.mxu0 %v8280_v12 }
0x1433   :  { %6451 = vmatpush1.bf16.msra.mxu1 %v7160_v8  ;;  %4047 = vmatprep.mubr.f32.mxu1 %v8280_v12 }
0x1434   :  { %6453 = vmatprep.subr.bf16.mxu1 %v7186_v21 }
0x1435   :  { %6439 = vmatpush1.bf16.msra.mxu0 %v7146_v1 }
0x1436   :  { %6441 = vmatprep.subr.bf16.mxu0 %v7171_v14 }
0x1437   :  { %6455 = vmatpush1.bf16.msra.mxu1 %v7199_v26 }
0x1438   :  { %6456 = vmatprep.subr.bf16.mxu1 %v8281_v22 }
0x1439   :  { %6443 = vmatpush1.bf16.msra.mxu0 %v7184_v20 }
0x143a   :  { %6445 = vmatprep.subr.bf16.mxu0 %v7201_v28 }
0x143d   :  { %6447 = vmatpush1.bf16.msra.mxu0 %v7211_v33 }
0x143e   :  { %6463 = vmatprep.subr.bf16.mxu0 %v6963_v4 }
0x1440   :  { %5668 = vmatmul.mubr.msk.f32.vlgmr.msra.gmra.mrb[34].mxu0 %vm335_vm2, %v7918_v29 }
0x1441   :  { %6465 = vmatpush1.bf16.msra.mxu0 %v6974_v9  ;;  %4230 = vmatprep.mubr.f32.mxu0 %v8280_v12 }
0x1442   :  { %6467 = vmatprep.subr.bf16.mxu0 %v6976_v10 }
0x1445   :  { %6469 = vmatpush1.bf16.msra.mxu0 %v6992_v15 }
0x1446   :  { %6471 = vmatprep.subr.bf16.mxu0 %v7004_v19 }
0x1449   :  { %6473 = vmatpush1.bf16.msra.mxu0 %v7038_v31 }
0x144a   :  { %6475 = vmatprep.subr.bf16.mxu0 %v7050_v35 }
0x144d   :  { %6477 = vmatpush1.bf16.msra.mxu0 %v7080_v45 }
0x144e   :  { %6495 = vmatprep.subr.bf16.mxu0 %v8312_v7 }
0x1503   :  { %v3808_v46 = vpop.f32.mrb[32].mxu0 }
0x1504   :  { %v3809_v3 = vadd.f32 %v3808_v46, %v8315_v55  ;;  %v3879_v63 = vpop.f32.mrb[48].mxu1  ;;  %v3810_v59 = vpop.f32.mrb[33].mxu0  ;;  %v206_v46 = vmul.f32 %v7280_v30, %v147_v54 }
0x1505   :  { %v3811_v60 = vadd.f32 %v3810_v59, %v8316_v34  ;;  %v3881_v52 = vpop.f32.mrb[49].mxu1  ;;  %v3880_v59 = vadd.f32 %v3879_v63, %v7284_v36 }
0x1506   :  { %v3959_v62 = vadd.f32 %v3809_v3, %v256_v6  ;;  %v258_v6 = vadd.f32 %v7287_v44, %v206_v46 }
0x1507   :  { %v3966_v37 = vadd.f32 %v3811_v60, %v257_v2 }
0x1508   :  { %v5669_v53 = vmul.f32 -1.442695, %v3959_v62 }
0x1509   :  { %v5670_v25 = vmul.f32 -1.442695, %v3966_v37 }
0x150a   :  { %6818 = vpow2.f32 %v5669_v53 }
0x150b   :  { %6820 = vpow2.f32 %v5670_v25 }
0x1513   :  { %v3950_v13 = vpop.f32.mrb[34].mxu0 }
0x1514   :  { %v6819_v24 = vpop.eup %6818  ;;  %v3952_v49 = vpop.f32.mrb[35].mxu0  ;;  %v3951_v37 = vadd.f32 %v3950_v13, %v8283_v0 }
0x1515   :  { %v3963_v7 = vadd.f32 1.0, %v6819_v24  ;;  %v6821_v5 = vpop.eup %6820 }
0x1516   :  { %v3970_v55 = vadd.f32 1.0, %v6821_v5 }
0x1517   :  { %6822 = vrcp.f32 %v3963_v7 }
0x1518   :  { %6824 = vrcp.f32 %v3970_v55  ;;  %v3882_v55 = vadd.f32 %v3881_v52, %v7338_v41 }
0x1521   :  { %v6823_v34 = vpop.eup %6822 }
0x1522   :  { %v3973_v50 = vmul.f32 %v6823_v34, %v3880_v59  ;;  %v6825_v60 = vpop.eup %6824 }
0x1523   :  { %v3976_v62 = vsub.f32 1.0, %v6825_v60  ;;  %v3978_v24 = vmul.f32 %v6825_v60, %v7918_v29 }
0x1524   :  { %v3974_v3 = vadd.f32 %v3973_v50, %v258_v6 }
0x1526   :  { %6826 = vtanh.f32 %v3974_v3 }
0x1530   :  { %v6827_v2 = vpop.eup %6826 }
0x1531   :  { %v3977_v53 = vmul.f32 %v6827_v2, %v3976_v62 }
0x1533   :  { %v3979_v7 = vadd.f32 %v3978_v24, %v3977_v53  ;;  %v3953_v53 = vadd.f32 %v3952_v49, %v7352_v18 }
0x1535   :  { %5671 = vmatmul.mubr.msk.f32.vlgmr.msra.gmra.mrb[50].mxu1 %vm592_vm0, %v3979_v7 }
0x1536   :  { %6458 = vmatpush3.bf16.msra.mxu1 %v7298_v17  ;;  %5868 = vmatprep.mubr.msk.f32.mxu1 %vm6913_vm1, %v8280_v12 }
0x1537   :  { %6459 = vmatprep.subr.bf16.mxu1 %v8281_v22 }
0x153a   :  { %6461 = vmatpush3.bf16.msra.mxu1 %v7311_v43 }
0x153b   :  { %6479 = vmatprep.subr.bf16.mxu1 %v7015_v23 }
0x153d   :  { %5869 = vmatmul.mubr.msk.f32.vlgmr.msra.gmra.mrb[52].mxu1 %vm592_vm0, %v3979_v7 }
0x153e   :  { %6481 = vmatpush1.bf16.msra.mxu1 %v7026_v27  ;;  %4301 = vmatprep.mubr.f32.mxu1 %v8280_v12 }
0x153f   :  { %6483 = vmatprep.subr.bf16.mxu1 %v7041_v32 }
0x1542   :  { %6485 = vmatpush1.bf16.msra.mxu1 %v7059_v38 }
0x1543   :  { %6487 = vmatprep.subr.bf16.mxu1 %v7062_v39 }
0x1546   :  { %6489 = vmatpush1.bf16.msra.mxu1 %v7087_v47 }
0x1547   :  { %6491 = vmatprep.subr.bf16.mxu1 %v7090_v48 }
0x154a   :  { %6493 = vmatpush1.bf16.msra.mxu1 %v7100_v51 }
0x154b   :  { %6511 = vmatprep.subr.bf16.mxu1 %v8282_v56 }
0x1608   :  { %v4049_v54 = vpop.f32.mrb[50].mxu1 }
0x1609   :  { %v4050_v63 = vadd.f32 %v4049_v54, %v8287_v42  ;;  %v4051_v34 = vpop.f32.mrb[51].mxu1 }
0x160a   :  { %v4052_v25 = vadd.f32 %v4051_v34, %v7344_v11 }
0x160b   :  { %v4124_v5 = vadd.f32 %v4050_v63, %v3882_v55 }
0x160c   :  { %v4131_v46 = vadd.f32 %v4052_v25, %v3951_v37  ;;  %v4144_v25 = vpop.permute.xlu0 %4143 }
0x160d   :  { %v5673_v59 = vmul.f32 -1.442695, %v4124_v5 }
0x160e   :  { %v5674_v3 = vmul.f32 -1.442695, %v4131_v46 }
0x160f   :  { %6828 = vpow2.f32 %v5673_v59 }
0x1610   :  { %v4120_v6 = vpop.f32.mrb[52].mxu1  ;;  %6830 = vpow2.f32 %v5674_v3 }
0x1611   :  { %v5870_v50 = vpop.f32.mrb[53].mxu1  ;;  %v4121_v13 = vadd.f32 %v4120_v6, %v7355_v16 }
0x1619   :  { %v6829_v60 = vpop.eup %6828 }
0x161a   :  { %v4128_v62 = vadd.f32 1.0, %v6829_v60  ;;  %v6831_v2 = vpop.eup %6830  ;;  %v4159_v60 = vpop.permute.xlu1 %4158 }
0x161b   :  { %v4135_v52 = vadd.f32 1.0, %v6831_v2  ;;  %v8318_v2 = vld [vmem:[#allocation7_spill] sm:$0xff] }
0x161c   :  { %6832 = vrcp.f32 %v4128_v62 }
0x161d   :  { %6834 = vrcp.f32 %v4135_v52 }
0x1626   :  { %v6833_v24 = vpop.eup %6832 }
0x1627   :  { %v4138_v54 = vmul.f32 %v6833_v24, %v3953_v53  ;;  %v6835_v63 = vpop.eup %6834  ;;  %v8319_v53 = vld [vmem:[#allocation8_spill] sm:$0xff] }
0x1628   :  { %v4141_v34 = vsub.f32 1.0, %v6835_v63  ;;  %v4146_v46 = vmul.f32 %v6835_v63, %v4144_v25  ;;  %v8321_v25 = vld [vmem:[#allocation12_spill] sm:$0xff] }
0x1629   :  { %v4139_v55 = vadd.f32 %v4138_v54, %v4121_v13 }
0x162b   :  { %6836 = vtanh.f32 %v4139_v55  ;;  %v8320_v55 = vld [vmem:[#allocation10_spill] sm:$0xff] }
0x1635   :  { %v6837_v37 = vpop.eup %6836 }
0x1636   :  { %v4142_v5 = vmul.f32 %v6837_v37, %v4141_v34 }
0x1638   :  { %v4147_v59 = vadd.f32 %v4146_v46, %v4142_v5 }
0x163a   :  { %4149 = vrot.lane.b32.xlu0 %v4147_v59, %s6914_s9 }
0x16ac   :  { %v4150_v50 = vpop.permute.xlu0 %4149 }
0x16ad   :  { %v4152_v3 = vsel %vm592_vm0, %v3979_v7, %v4150_v50  ;;  %v152_v7 = vpop.permute.xlu1 %151 }
0x16ae   :  { %v4155_v49 = vsub.f32 %v4152_v3, %v7918_v29  ;;  %v207_v52 = vmul.f32 %v8318_v2, %v152_v7  ;;  %v208_v24 = vmul.f32 %v8319_v53, %v152_v7 }
0x16b0   :  { %v4161_v62 = vmul.f32 %v4159_v60, %v4155_v49  ;;  %v259_v54 = vadd.f32 %v8284_v58, %v207_v52  ;;  %v260_v50 = vadd.f32 %v8286_v40, %v208_v24 }
0x16b2   :  { %v7988_v6 = vadd.f32 %v4161_v62, %v7918_v29  ;;  %v8317_v29 = vld [vmem:[#allocation3_spill] sm:$0xff] }
0x16b4   :  { %4567 = vrot.lane.b32.xlu0 %v7988_v6, %s6915_s28  ;;  %5676 = vmatmul.mubr.msk.f32.vlgmr.msra.gmra.mrb[36].mxu0 %vm335_vm2, %v7988_v6 }
0x16b5   :  { %5677 = vmatmul.mubr.msk.f32.vlgmr.msra.gmra.mrb[54].mxu1 %vm335_vm2, %v7988_v6  ;;  %6497 = vmatpush1.bf16.msra.mxu0 %v7122_v57 }
0x16b6   :  { %6499 = vmatprep.subr.bf16.mxu0 %v7135_v61  ;;  %4372 = vmatprep.mubr.f32.mxu0 %v8280_v12 }
0x16b7   :  { %6513 = vmatpush1.bf16.msra.mxu1 %v7160_v8  ;;  %4471 = vmatprep.mubr.f32.mxu1 %v8280_v12 }
0x16b8   :  { %6515 = vmatprep.subr.bf16.mxu1 %v7186_v21 }
0x16b9   :  { %6501 = vmatpush1.bf16.msra.mxu0 %v7146_v1 }
0x16ba   :  { %6503 = vmatprep.subr.bf16.mxu0 %v7171_v14 }
0x16bb   :  { %6517 = vmatpush1.bf16.msra.mxu1 %v7199_v26 }
0x16bc   :  { %6518 = vmatprep.subr.bf16.mxu1 %v8281_v22 }
0x16bd   :  { %6505 = vmatpush1.bf16.msra.mxu0 %v7184_v20 }
0x16be   :  { %6507 = vmatprep.subr.bf16.mxu0 %v7201_v28 }
0x16c1   :  { %6509 = vmatpush1.bf16.msra.mxu0 %v7211_v33 }
0x16c2   :  { %6525 = vmatprep.subr.bf16.mxu0 %v6963_v4 }
0x16c4   :  { %5678 = vmatmul.mubr.msk.f32.vlgmr.msra.gmra.mrb[38].mxu0 %vm335_vm2, %v7988_v6 }
0x16c5   :  { %6527 = vmatpush1.bf16.msra.mxu0 %v6974_v9  ;;  %4654 = vmatprep.mubr.f32.mxu0 %v8280_v12 }
0x16c6   :  { %6529 = vmatprep.subr.bf16.mxu0 %v6976_v10 }
0x16c9   :  { %6531 = vmatpush1.bf16.msra.mxu0 %v6992_v15 }
0x16ca   :  { %6533 = vmatprep.subr.bf16.mxu0 %v7004_v19 }
0x16cd   :  { %6535 = vmatpush1.bf16.msra.mxu0 %v7038_v31 }
0x16ce   :  { %6537 = vmatprep.subr.bf16.mxu0 %v7050_v35 }
0x16d1   :  { %6539 = vmatpush1.bf16.msra.mxu0 %v7080_v45 }
0x16d2   :  { %6557 = vmatprep.subr.bf16.mxu0 %v8317_v29 }
0x1787   :  { %v4232_v13 = vpop.f32.mrb[36].mxu0 }
0x1788   :  { %v4233_v63 = vadd.f32 %v4232_v13, %v8320_v55  ;;  %v4303_v34 = vpop.f32.mrb[54].mxu1  ;;  %v4234_v37 = vpop.f32.mrb[37].mxu0  ;;  %v209_v13 = vmul.f32 %v7280_v30, %v152_v7 }
0x1789   :  { %v4235_v5 = vadd.f32 %v4234_v37, %v8321_v25  ;;  %v4305_v46 = vpop.f32.mrb[55].mxu1  ;;  %v4304_v37 = vadd.f32 %v4303_v34, %v7284_v36 }
0x178a   :  { %v4383_v59 = vadd.f32 %v4233_v63, %v259_v54  ;;  %v261_v54 = vadd.f32 %v7287_v44, %v209_v13 }
0x178b   :  { %v4390_v49 = vadd.f32 %v4235_v5, %v260_v50 }
0x178c   :  { %v5679_v3 = vmul.f32 -1.442695, %v4383_v59 }
0x178d   :  { %v5680_v60 = vmul.f32 -1.442695, %v4390_v49 }
0x178e   :  { %6838 = vpow2.f32 %v5679_v3 }
0x178f   :  { %6840 = vpow2.f32 %v5680_v60 }
0x1797   :  { %v4374_v62 = vpop.f32.mrb[38].mxu0 }
0x1798   :  { %v6839_v53 = vpop.eup %6838  ;;  %v4376_v2 = vpop.f32.mrb[39].mxu0  ;;  %v4375_v49 = vadd.f32 %v4374_v62, %v8283_v0 }
0x1799   :  { %v4387_v29 = vadd.f32 1.0, %v6839_v53  ;;  %v6841_v52 = vpop.eup %6840 }
0x179a   :  { %v4394_v55 = vadd.f32 1.0, %v6841_v52 }
0x179b   :  { %6842 = vrcp.f32 %v4387_v29 }
0x179c   :  { %6844 = vrcp.f32 %v4394_v55  ;;  %v4306_v55 = vadd.f32 %v4305_v46, %v7338_v41 }
0x17a5   :  { %v6843_v25 = vpop.eup %6842 }
0x17a6   :  { %v4397_v24 = vmul.f32 %v6843_v25, %v4304_v37  ;;  %v6845_v5 = vpop.eup %6844 }
0x17a7   :  { %v4400_v59 = vsub.f32 1.0, %v6845_v5  ;;  %v4402_v53 = vmul.f32 %v6845_v5, %v7988_v6 }
0x17a8   :  { %v4398_v63 = vadd.f32 %v4397_v24, %v261_v54 }
0x17aa   :  { %6846 = vtanh.f32 %v4398_v63 }
0x17b4   :  { %v6847_v50 = vpop.eup %6846 }
0x17b5   :  { %v4401_v3 = vmul.f32 %v6847_v50, %v4400_v59 }
0x17b7   :  { %v4403_v29 = vadd.f32 %v4402_v53, %v4401_v3  ;;  %v4377_v3 = vadd.f32 %v4376_v2, %v7352_v18 }
0x17b9   :  { %5681 = vmatmul.mubr.msk.f32.vlgmr.msra.gmra.mrb[56].mxu1 %vm592_vm0, %v4403_v29 }
0x17ba   :  { %6520 = vmatpush3.bf16.msra.mxu1 %v7298_v17  ;;  %5879 = vmatprep.mubr.msk.f32.mxu1 %vm6913_vm1, %v8280_v12 }
0x17bb   :  { %6521 = vmatprep.subr.bf16.mxu1 %v8281_v22 }
0x17be   :  { %6523 = vmatpush3.bf16.msra.mxu1 %v7311_v43 }
0x17bf   :  { %6541 = vmatprep.subr.bf16.mxu1 %v7015_v23 }
0x17c1   :  { %5880 = vmatmul.mubr.msk.f32.vlgmr.msra.gmra.mrb[58].mxu1 %vm592_vm0, %v4403_v29 }
0x17c2   :  { %6543 = vmatpush1.bf16.msra.mxu1 %v7026_v27  ;;  %4725 = vmatprep.mubr.f32.mxu1 %v8280_v12 }
0x17c3   :  { %6545 = vmatprep.subr.bf16.mxu1 %v7041_v32 }
0x17c6   :  { %6547 = vmatpush1.bf16.msra.mxu1 %v7059_v38 }
0x17c7   :  { %6549 = vmatprep.subr.bf16.mxu1 %v7062_v39 }
0x17ca   :  { %6551 = vmatpush1.bf16.msra.mxu1 %v7087_v47 }
0x17cb   :  { %6553 = vmatprep.subr.bf16.mxu1 %v7090_v48 }
0x17ce   :  { %6555 = vmatpush1.bf16.msra.mxu1 %v7100_v51 }
0x17cf   :  { %6573 = vmatprep.subr.bf16.mxu1 %v8282_v56 }
0x188c   :  { %v4473_v7 = vpop.f32.mrb[56].mxu1 }
0x188d   :  { %v4474_v34 = vadd.f32 %v4473_v7, %v8287_v42  ;;  %v4475_v25 = vpop.f32.mrb[57].mxu1 }
0x188e   :  { %v4476_v60 = vadd.f32 %v4475_v25, %v7344_v11 }
0x188f   :  { %v4548_v52 = vadd.f32 %v4474_v34, %v4306_v55 }
0x1890   :  { %v4555_v13 = vadd.f32 %v4476_v60, %v4375_v49  ;;  %v4568_v60 = vpop.permute.xlu0 %4567 }
0x1891   :  { %v5683_v37 = vmul.f32 -1.442695, %v4548_v52 }
0x1892   :  { %v5684_v63 = vmul.f32 -1.442695, %v4555_v13 }
0x1893   :  { %6848 = vpow2.f32 %v5683_v37 }
0x1894   :  { %v4544_v54 = vpop.f32.mrb[58].mxu1  ;;  %6850 = vpow2.f32 %v5684_v63 }
0x1895   :  { %v5881_v24 = vpop.f32.mrb[59].mxu1  ;;  %v4545_v62 = vadd.f32 %v4544_v54, %v7355_v16 }
0x189d   :  { %v6849_v5 = vpop.eup %6848 }
0x189e   :  { %v4552_v59 = vadd.f32 1.0, %v6849_v5  ;;  %v6851_v50 = vpop.eup %6850  ;;  %v4583_v5 = vpop.permute.xlu1 %4582 }
0x189f   :  { %v4559_v46 = vadd.f32 1.0, %v6851_v50 }
0x18a0   :  { %6852 = vrcp.f32 %v4552_v59 }
0x18a1   :  { %6854 = vrcp.f32 %v4559_v46 }
0x18aa   :  { %v6853_v53 = vpop.eup %6852 }
0x18ab   :  { %v4562_v7 = vmul.f32 %v6853_v53, %v4377_v3  ;;  %v6855_v34 = vpop.eup %6854  ;;  %v8325_v53 = vld [vmem:[#allocation10_spill] sm:$0xff] }
0x18ac   :  { %v4565_v25 = vsub.f32 1.0, %v6855_v34  ;;  %v4570_v13 = vmul.f32 %v6855_v34, %v4568_v60 }
0x18ad   :  { %v4563_v55 = vadd.f32 %v4562_v7, %v4545_v62  ;;  %v8326_v7 = vld [vmem:[#allocation12_spill] sm:$0xff] }
0x18af   :  { %6856 = vtanh.f32 %v4563_v55 }
0x18b9   :  { %v6857_v49 = vpop.eup %6856 }
0x18ba   :  { %v4566_v52 = vmul.f32 %v6857_v49, %v4565_v25 }
0x18bc   :  { %v4571_v37 = vadd.f32 %v4570_v13, %v4566_v52 }
0x18be   :  { %4573 = vrot.lane.b32.xlu0 %v4571_v37, %s6914_s9 }
0x1930   :  { %v4574_v24 = vpop.permute.xlu0 %4573 }
0x1931   :  { %v4576_v63 = vsel %vm592_vm0, %v4403_v29, %v4574_v24  ;;  %v8323_v29 = vld [vmem:[#allocation7_spill] sm:$0xff] }
0x1932   :  { %v4579_v2 = vsub.f32 %v4576_v63, %v7988_v6 }
0x1934   :  { %v4585_v59 = vmul.f32 %v4583_v5, %v4579_v2 }
0x1936   :  { %v8058_v54 = vadd.f32 %v4585_v59, %v7988_v6  ;;  %v157_v6 = vpop.permute.xlu1 %156 }
0x1937   :  { %v210_v50 = vmul.f32 %v8323_v29, %v157_v6  ;;  %v212_v63 = vmul.f32 %v7280_v30, %v157_v6 }
0x1938   :  { %4991 = vrot.lane.b32.xlu0 %v8058_v54, %s6915_s28  ;;  %5686 = vmatmul.mubr.msk.f32.vlgmr.msra.gmra.mrb[40].mxu0 %vm335_vm2, %v8058_v54 }
0x1939   :  { %5687 = vmatmul.mubr.msk.f32.vlgmr.msra.gmra.mrb[60].mxu1 %vm335_vm2, %v8058_v54  ;;  %6559 = vmatpush1.bf16.msra.mxu0 %v7122_v57 }
0x193a   :  { %6561 = vmatprep.subr.bf16.mxu0 %v7135_v61  ;;  %4796 = vmatprep.mubr.f32.mxu0 %v8280_v12 }
0x193b   :  { %6575 = vmatpush1.bf16.msra.mxu1 %v7160_v8  ;;  %4895 = vmatprep.mubr.f32.mxu1 %v8280_v12 }
0x193c   :  { %6577 = vmatprep.subr.bf16.mxu1 %v7186_v21 }
0x193d   :  { %6563 = vmatpush1.bf16.msra.mxu0 %v7146_v1 }
0x193e   :  { %6565 = vmatprep.subr.bf16.mxu0 %v7171_v14 }
0x193f   :  { %6579 = vmatpush1.bf16.msra.mxu1 %v7199_v26 }
0x1940   :  { %6580 = vmatprep.subr.bf16.mxu1 %v8281_v22 }
0x1941   :  { %6567 = vmatpush1.bf16.msra.mxu0 %v7184_v20 }
0x1942   :  { %6569 = vmatprep.subr.bf16.mxu0 %v7201_v28 }
0x1945   :  { %6571 = vmatpush1.bf16.msra.mxu0 %v7211_v33 }
0x1946   :  { %6587 = vmatprep.subr.bf16.mxu0 %v6963_v4  ;;  %v8322_v4 = vld [vmem:[#allocation3_spill] sm:$0xff] }
0x1948   :  { %5688 = vmatmul.mubr.msk.f32.vlgmr.msra.gmra.mrb[42].mxu0 %vm335_vm2, %v8058_v54 }
0x1949   :  { %6589 = vmatpush1.bf16.msra.mxu0 %v6974_v9  ;;  %5078 = vmatprep.mubr.f32.mxu0 %v8280_v12  ;;  %v8324_v9 = vld [vmem:[#allocation8_spill] sm:$0xff] }
0x194a   :  { %6591 = vmatprep.subr.bf16.mxu0 %v6976_v10  ;;  %v211_v46 = vmul.f32 %v8324_v9, %v157_v6  ;;  %v262_v10 = vadd.f32 %v8284_v58, %v210_v50 }
0x194d   :  { %6593 = vmatpush1.bf16.msra.mxu0 %v6992_v15 }
0x194e   :  { %6595 = vmatprep.subr.bf16.mxu0 %v7004_v19 }
0x1951   :  { %6597 = vmatpush1.bf16.msra.mxu0 %v7038_v31 }
0x1952   :  { %6599 = vmatprep.subr.bf16.mxu0 %v7050_v35 }
0x1955   :  { %6601 = vmatpush1.bf16.msra.mxu0 %v7080_v45  ;;  %v263_v45 = vadd.f32 %v8286_v40, %v211_v46 }
0x1956   :  { %6619 = vmatprep.subr.bf16.mxu0 %v8322_v4  ;;  %v264_v4 = vadd.f32 %v7287_v44, %v212_v63 }
0x1a0b   :  { %v4656_v3 = vpop.f32.mrb[40].mxu0 }
0x1a0c   :  { %v4657_v15 = vadd.f32 %v4656_v3, %v8325_v53  ;;  %v4727_v62 = vpop.f32.mrb[60].mxu1  ;;  %v4658_v19 = vpop.f32.mrb[41].mxu0 }
0x1a0d   :  { %v4659_v31 = vadd.f32 %v4658_v19, %v8326_v7  ;;  %v4729_v55 = vpop.f32.mrb[61].mxu1  ;;  %v4728_v5 = vadd.f32 %v4727_v62, %v7284_v36 }
0x1a0e   :  { %v4807_v35 = vadd.f32 %v4657_v15, %v262_v10  ;;  %v4730_v6 = vadd.f32 %v4729_v55, %v7338_v41 }
0x1a0f   :  { %v4814_v25 = vadd.f32 %v4659_v31, %v263_v45 }
0x1a10   :  { %v5689_v34 = vmul.f32 -1.442695, %v4807_v35 }
0x1a11   :  { %v5690_v49 = vmul.f32 -1.442695, %v4814_v25 }
0x1a12   :  { %6858 = vpow2.f32 %v5689_v34 }
0x1a13   :  { %6860 = vpow2.f32 %v5690_v49 }
0x1a1b   :  { %v4798_v60 = vpop.f32.mrb[42].mxu0 }
0x1a1c   :  { %v6859_v52 = vpop.eup %6858  ;;  %v4800_v13 = vpop.f32.mrb[43].mxu0 }
0x1a1d   :  { %v4811_v37 = vadd.f32 1.0, %v6859_v52  ;;  %v6861_v24 = vpop.eup %6860  ;;  %v4801_v52 = vadd.f32 %v4800_v13, %v7352_v18 }
0x1a1e   :  { %v4818_v2 = vadd.f32 1.0, %v6861_v24 }
0x1a1f   :  { %6862 = vrcp.f32 %v4811_v37 }
0x1a20   :  { %6864 = vrcp.f32 %v4818_v2 }
0x1a29   :  { %v6863_v59 = vpop.eup %6862 }
0x1a2a   :  { %v4821_v50 = vmul.f32 %v6863_v59, %v4728_v5  ;;  %v6865_v3 = vpop.eup %6864 }
0x1a2b   :  { %v4824_v10 = vsub.f32 1.0, %v6865_v3  ;;  %v4826_v31 = vmul.f32 %v6865_v3, %v8058_v54 }
0x1a2c   :  { %v4822_v46 = vadd.f32 %v4821_v50, %v264_v4  ;;  %v4992_v4 = vpop.permute.xlu0 %4991 }
0x1a2e   :  { %6866 = vtanh.f32 %v4822_v46 }
0x1a38   :  { %v6867_v15 = vpop.eup %6866 }
0x1a39   :  { %v4825_v19 = vmul.f32 %v6867_v15, %v4824_v10 }
0x1a3b   :  { %v4827_v35 = vadd.f32 %v4826_v31, %v4825_v19  ;;  %v5007_v19 = vpop.permute.xlu1 %5006 }
0x1a3d   :  { %5691 = vmatmul.mubr.msk.f32.vlgmr.msra.gmra.mrb[62].mxu1 %vm592_vm0, %v4827_v35 }
0x1a3e   :  { %6582 = vmatpush3.bf16.msra.mxu1 %v7298_v17  ;;  %5890 = vmatprep.mubr.msk.f32.mxu1 %vm6913_vm1, %v8280_v12 }
0x1a3f   :  { %6583 = vmatprep.subr.bf16.mxu1 %v8281_v22 }
0x1a42   :  { %6585 = vmatpush3.bf16.msra.mxu1 %v7311_v43 }
0x1a43   :  { %6603 = vmatprep.subr.bf16.mxu1 %v7015_v23 }
0x1a45   :  { %5891 = vmatmul.mubr.msk.f32.vlgmr.msra.gmra.mrb[64].mxu1 %vm592_vm0, %v4827_v35 }
0x1a46   :  { %6605 = vmatpush1.bf16.msra.mxu1 %v7026_v27  ;;  %5149 = vmatprep.mubr.f32.mxu1 %v8280_v12 }
0x1a47   :  { %6607 = vmatprep.subr.bf16.mxu1 %v7041_v32  ;;  %v4799_v32 = vadd.f32 %v4798_v60, %v8283_v0 }
0x1a4a   :  { %6609 = vmatpush1.bf16.msra.mxu1 %v7059_v38 }
0x1a4b   :  { %6611 = vmatprep.subr.bf16.mxu1 %v7062_v39 }
0x1a4e   :  { %6613 = vmatpush1.bf16.msra.mxu1 %v7087_v47 }
0x1a4f   :  { %6615 = vmatprep.subr.bf16.mxu1 %v7090_v48 }
0x1a52   :  { %6617 = vmatpush1.bf16.msra.mxu1 %v7100_v51 }
0x1a53   :  { %6635 = vmatprep.subr.bf16.mxu1 %v8282_v56 }
0x1b10   :  { %v4897_v23 = vpop.f32.mrb[62].mxu1 }
0x1b11   :  { %v4898_v27 = vadd.f32 %v4897_v23, %v8287_v42  ;;  %v4899_v62 = vpop.f32.mrb[63].mxu1 }
0x1b12   :  { %v4900_v38 = vadd.f32 %v4899_v62, %v7344_v11 }
0x1b13   :  { %v4972_v45 = vadd.f32 %v4898_v27, %v4730_v6 }
0x1b14   :  { %v4979_v39 = vadd.f32 %v4900_v38, %v4799_v32 }
0x1b15   :  { %v5693_v34 = vmul.f32 -1.442695, %v4972_v45 }
0x1b16   :  { %v5694_v25 = vmul.f32 -1.442695, %v4979_v39 }
0x1b17   :  { %6868 = vpow2.f32 %v5693_v34 }
0x1b18   :  { %v4968_v47 = vpop.f32.mrb[64].mxu1  ;;  %6870 = vpow2.f32 %v5694_v25 }
0x1b19   :  { %v5892_v48 = vpop.f32.mrb[65].mxu1  ;;  %v4969_v60 = vadd.f32 %v4968_v47, %v7355_v16 }
0x1b21   :  { %v6869_v51 = vpop.eup %6868 }
0x1b22   :  { %v4976_v56 = vadd.f32 1.0, %v6869_v51  ;;  %v6871_v49 = vpop.eup %6870 }
0x1b23   :  { %v4983_v55 = vadd.f32 1.0, %v6871_v49 }
0x1b24   :  { %6872 = vrcp.f32 %v4976_v56 }
0x1b25   :  { %6874 = vrcp.f32 %v4983_v55 }
0x1b2e   :  { %v6873_v37 = vpop.eup %6872 }
0x1b2f   :  { %v4986_v24 = vmul.f32 %v6873_v37, %v4801_v52  ;;  %v6875_v2 = vpop.eup %6874 }
0x1b30   :  { %v4989_v5 = vsub.f32 1.0, %v6875_v2  ;;  %v4994_v46 = vmul.f32 %v6875_v2, %v4992_v4 }
0x1b31   :  { %v4987_v63 = vadd.f32 %v4986_v24, %v4969_v60 }
0x1b33   :  { %6876 = vtanh.f32 %v4987_v63 }
0x1b3d   :  { %v6877_v59 = vpop.eup %6876 }
0x1b3e   :  { %v4990_v50 = vmul.f32 %v6877_v59, %v4989_v5 }
0x1b40   :  { %v4995_v3 = vadd.f32 %v4994_v46, %v4990_v50 }
0x1b42   :  { %4997 = vrot.lane.b32.xlu0 %v4995_v3, %s6914_s9 }
0x1bb4   :  { %v4998_v10 = vpop.permute.xlu0 %4997 }
0x1bb5   :  { %v5000_v15 = vsel %vm592_vm0, %v4827_v35, %v4998_v10 }
0x1bb6   :  { %v5003_v13 = vsub.f32 %v5000_v15, %v8058_v54 }
0x1bb8   :  { %v5009_v31 = vmul.f32 %v5007_v19, %v5003_v13 }
0x1bba   :  { %v8128_v23 = vadd.f32 %v5009_v31, %v8058_v54 }
0x1bbc   :  { %5415 = vrot.lane.b32.xlu0 %v8128_v23, %s6915_s28  ;;  %5696 = vmatmul.mubr.msk.f32.vlgmr.msra.gmra.mrb[44].mxu0 %vm335_vm2, %v8128_v23 }
0x1bbd   :  { %5697 = vmatmul.mubr.msk.f32.vlgmr.msra.gmra.mrb[66].mxu1 %vm335_vm2, %v8128_v23  ;;  %6621 = vmatpush1.bf16.msra.mxu0 %v7122_v57  ;;  %v162_v57 = vpop.permute.xlu1 %161 }
0x1bbe   :  { %6623 = vmatprep.subr.bf16.mxu0 %v7135_v61  ;;  %5220 = vmatprep.mubr.f32.mxu0 %v8280_v12  ;;  %v213_v61 = vmul.f32 %v8323_v29, %v162_v57 }
0x1bbf   :  { %6637 = vmatpush1.bf16.msra.mxu1 %v7160_v8  ;;  %5319 = vmatprep.mubr.f32.mxu1 %v8280_v12 }
0x1bc0   :  { %6639 = vmatprep.subr.bf16.mxu1 %v7186_v21 }
0x1bc1   :  { %6625 = vmatpush1.bf16.msra.mxu0 %v7146_v1  ;;  %v214_v1 = vmul.f32 %v8324_v9, %v162_v57 }
0x1bc2   :  { %6627 = vmatprep.subr.bf16.mxu0 %v7171_v14  ;;  %v265_v14 = vadd.f32 %v8284_v58, %v213_v61 }
0x1bc3   :  { %6641 = vmatpush1.bf16.msra.mxu1 %v7199_v26 }
0x1bc4   :  { %6642 = vmatprep.subr.bf16.mxu1 %v8281_v22 }
0x1bc5   :  { %6629 = vmatpush1.bf16.msra.mxu0 %v7184_v20 }
0x1bc6   :  { %6631 = vmatprep.subr.bf16.mxu0 %v7201_v28 }
0x1bc9   :  { %6633 = vmatpush1.bf16.msra.mxu0 %v7211_v33  ;;  %v266_v33 = vadd.f32 %v8286_v40, %v214_v1  ;;  %v5431_v1 = vpop.permute.xlu1 %5430 }
0x1bcc   :  { %5698 = vmatmul.mubr.msk.f32.vlgmr.msra.gmra.mrb[46].mxu0 %vm335_vm2, %v8128_v23 }
0x1c2e   :  { %v5416_v13 = vpop.permute.xlu0 %5415 }
0x1c8f   :  { %v5080_v8 = vpop.f32.mrb[44].mxu0 }
0x1c90   :  { %v5081_v21 = vadd.f32 %v5080_v8, %v8325_v53  ;;  %v5151_v26 = vpop.f32.mrb[66].mxu1  ;;  %v5082_v54 = vpop.f32.mrb[45].mxu0  ;;  %v215_v53 = vmul.f32 %v7280_v30, %v162_v57  ;;  %v5435_v30 = vld [vmem:[%s8234_s5 + $0x30] ss:$0 sm:$0xff] }
0x1c91   :  { %v5083_v20 = vadd.f32 %v5082_v54, %v8326_v7  ;;  %v5153_v28 = vpop.f32.mrb[67].mxu1  ;;  %v5152_v7 = vadd.f32 %v5151_v26, %v7284_v36  ;;  %5438 = vrot.lane.b32.xlu1 %v5435_v30, %s6914_s9  ;;  %v5483_v54 = vld [vmem:[%s8235_s2] sm:$0xff] }
0x1c92   :  { %v5231_v35 = vadd.f32 %v5081_v21, %v265_v14  ;;  %v267_v34 = vadd.f32 %v7287_v44, %v215_v53  ;;  %v5154_v44 = vadd.f32 %v5153_v28, %v7338_v41 }
0x1c93   :  { %v5238_v27 = vadd.f32 %v5083_v20, %v266_v33 }
0x1c94   :  { %v5699_v6 = vmul.f32 -1.442695, %v5231_v35  ;;  %v5436_v35 = vld [vmem:[%s8234_s5 + $0x32] ss:$0 sm:$0xff] }
0x1c95   :  { %v5700_v62 = vmul.f32 -1.442695, %v5238_v27  ;;  %v6916_v27 = vmov 1  }
0x1c96   :  { %6878 = vpow2.f32 %v5699_v6 }
0x1c97   :  { %6880 = vpow2.f32 %v5700_v62  ;;  %v5706_v62 = vld [vmem:[%s8234_s5 + $0x4] ss:$8 sm:$0x7] }
0x1c9f   :  { %v5222_v29 = vpop.f32.mrb[46].mxu0 }
0x1ca0   :  { %v6879_v9 = vpop.eup %6878  ;;  %v5224_v32 = vpop.f32.mrb[47].mxu0 }
0x1ca1   :  { %v5235_v38 = vadd.f32 1.0, %v6879_v9  ;;  %v6881_v58 = vpop.eup %6880  ;;  %v5707_v9 = vld [vmem:[%s8234_s5 + $0x5] ss:$8 sm:$0x7] }
0x1ca2   :  { %v5242_v45 = vadd.f32 1.0, %v6881_v58  ;;  %v5708_v58 = vld [vmem:[%s8234_s5 + $0x6] ss:$8 sm:$0x7] }
0x1ca3   :  { %6882 = vrcp.f32 %v5235_v38 }
0x1ca4   :  { %6884 = vrcp.f32 %v5242_v45  ;;  %v8328_v45 = vld [vmem:[#allocation13_spill] sm:$0xff] }
0x1cad   :  { %v6883_v39 = vpop.eup %6882 }
0x1cae   :  { %v5245_v40 = vmul.f32 %v6883_v39, %v5152_v7  ;;  %v6885_v48 = vpop.eup %6884  ;;  %v5476_v7 = vrot.slane %v5706_v62, %v8328_v45 }
0x1caf   :  { %v5248_v25 = vsub.f32 1.0, %v6885_v48  ;;  %v5250_v49 = vmul.f32 %v6885_v48, %v8128_v23  ;;  %v5527_v48 = vrot.slane %v5708_v58, %v8328_v45 }
0x1cb0   :  { %v5246_v47 = vadd.f32 %v5245_v40, %v267_v34  ;;  %v5501_v34 = vrot.slane %v5707_v9, %v8328_v45 }
0x1cb2   :  { %6886 = vtanh.f32 %v5246_v47 }
0x1cbc   :  { %v6887_v51 = vpop.eup %6886 }
0x1cbd   :  { %v5249_v56 = vmul.f32 %v6887_v51, %v5248_v25  ;;  %v5709_v25 = vld [vmem:[%s8234_s5 + $0x7] ss:$8 sm:$0x7] }
0x1cbf   :  { %v5251_v55 = vadd.f32 %v5250_v49, %v5249_v56 }
0x1cc1   :  { %5701 = vmatmul.mubr.msk.f32.vlgmr.msra.gmra.mrb[68].mxu1 %vm592_vm0, %v5251_v55 }
0x1cc2   :  { %6644 = vmatpush3.bf16.msra.mxu1 %v7298_v17  ;;  %5901 = vmatprep.mubr.msk.f32.mxu1 %vm6913_vm1, %v8280_v12  ;;  %v5223_v12 = vadd.f32 %v5222_v29, %v8283_v0 }
0x1cc3   :  { %6645 = vmatprep.subr.bf16.mxu1 %v8281_v22 }
0x1cc6   :  { %6647 = vmatpush3.bf16.msra.mxu1 %v7311_v43 }
0x1cc9   :  { %5902 = vmatmul.mubr.msk.f32.vlgmr.msra.gmra.mrb[70].mxu1 %vm592_vm0, %v5251_v55 }
0x1d94   :  { %v5321_v36 = vpop.f32.mrb[68].mxu1 }
0x1d95   :  { %v5322_v17 = vadd.f32 %v5321_v36, %v8287_v42  ;;  %v5323_v52 = vpop.f32.mrb[69].mxu1  ;;  %v5225_v42 = vadd.f32 %v5224_v32, %v7352_v18  ;;  %v8327_v32 = vld [vmem:[#allocation5_spill] sm:$0xff] }
0x1d96   :  { %v5324_v22 = vadd.f32 %v5323_v52, %v7344_v11  ;;  %v5468_v38 = vrot.slane %v5706_v62, %v8327_v32  ;;  %v5493_v53 = vrot.slane %v5707_v9, %v8327_v32  ;;  %v5519_v47 = vrot.slane %v5708_v58, %v8327_v32  ;;  %v8329_v52 = vld [vmem:[#allocation6_spill] sm:$0xff] }
0x1d97   :  { %v5396_v37 = vadd.f32 %v5322_v17, %v5154_v44  ;;  %v5541_v36 = vrot.slane %v5709_v25, %v8327_v32 }
0x1d98   :  { %v5403_v43 = vadd.f32 %v5324_v22, %v5223_v12  ;;  %v5472_v12 = vrot.slane %v5706_v62, %v8329_v52 }
0x1d99   :  { %v5703_v60 = vmul.f32 -1.442695, %v5396_v37 }
0x1d9a   :  { %v5704_v2 = vmul.f32 -1.442695, %v5403_v43  ;;  %v5497_v43 = vrot.slane %v5707_v9, %v8329_v52 }
0x1d9b   :  { %6888 = vpow2.f32 %v5703_v60  ;;  %v5523_v60 = vrot.slane %v5708_v58, %v8329_v52 }
0x1d9c   :  { %v5392_v24 = vpop.f32.mrb[70].mxu1  ;;  %6890 = vpow2.f32 %v5704_v2 }
0x1d9d   :  { %v5903_v63 = vpop.f32.mrb[71].mxu1  ;;  %v5393_v0 = vadd.f32 %v5392_v24, %v7355_v16  ;;  %v5439_v16 = vpop.permute.xlu1 %5438  ;;  %v5549_v24 = vrot.slane %v5709_v25, %v8328_v45 }
0x1da5   :  { %v6889_v5 = vpop.eup %6888 }
0x1da6   :  { %v5400_v59 = vadd.f32 1.0, %v6889_v5  ;;  %v6891_v4 = vpop.eup %6890 }
0x1da7   :  { %v5407_v41 = vadd.f32 1.0, %v6891_v4 }
0x1da8   :  { %6892 = vrcp.f32 %v5400_v59 }
0x1da9   :  { %6894 = vrcp.f32 %v5407_v41 }
0x1db2   :  { %v6893_v50 = vpop.eup %6892 }
0x1db3   :  { %v5410_v11 = vmul.f32 %v6893_v50, %v5225_v42  ;;  %v6895_v3 = vpop.eup %6894 }
0x1db4   :  { %v5413_v10 = vsub.f32 1.0, %v6895_v3  ;;  %v5418_v31 = vmul.f32 %v6895_v3, %v5416_v13 }
0x1db5   :  { %v5411_v46 = vadd.f32 %v5410_v11, %v5393_v0  ;;  %v5545_v0 = vrot.slane %v5709_v25, %v8329_v52 }
0x1db7   :  { %6896 = vtanh.f32 %v5411_v46 }
0x1dc1   :  { %v6897_v15 = vpop.eup %6896 }
0x1dc2   :  { %v5414_v19 = vmul.f32 %v6897_v15, %v5413_v10 }
0x1dc4   :  { %v5419_v57 = vadd.f32 %v5418_v31, %v5414_v19 }
0x1dc6   :  { %5421 = vrot.lane.b32.xlu0 %v5419_v57, %s6914_s9 }
0x1e38   :  { %v5422_v61 = vpop.permute.xlu0 %5421 }
0x1e39   :  { %v5424_v18 = vsel %vm592_vm0, %v5251_v55, %v5422_v61 }
0x1e3a   :  { %v5427_v8 = vsub.f32 %v5424_v18, %v8128_v23 }
0x1e3c   :  { %v5433_v14 = vmul.f32 %v5431_v1, %v5427_v8  ;;  %v5572_v8 = vld [vmem:[%s8234_s5 + $0x31] ss:$0 sm:$0xff] }
0x1e3e   :  { %v5434_v21 = vadd.f32 %v5433_v14, %v8128_v23 }
0x1e40   :  { %v5441_v26 = vmul.f32 %v5439_v16, %v5434_v21  ;;  %v5573_v21 = vld [vmem:[%s8234_s5 + $0x33] ss:$0 sm:$0xff] }
0x1e42   :  { %5443 = vrot.lane.b32.xlu0 %v5441_v26, %s6915_s28 }
0x1e46   :  { %5486 = vperm.xlu0 %6655, %v5483_v54  }
0x1eb4   :  { %v5444_v20 = vpop.permute.xlu0 %5443 }
0x1eb5   :  { %v5446_v28 = vsel %vm592_vm0, %v5444_v20, 0.0 }
0x1eb6   :  { %5447 = vadd.xlane.f32.xlu1 %v5446_v28 }
0x1ec5   :  { %v5487_v29 = vpop.permute.xlu0 %5486 }
0x1ec6   :  { %v5505_v51 = vmul.f32 %v5493_v53, %v5487_v29  ;;  %v5507_v49 = vmul.f32 %v5501_v34, %v5487_v29  ;;  %v5506_v4 = vmul.f32 %v5497_v43, %v5487_v29 }
0x1f43   :  { %v5448_v33 = vpop.xlane.xlu1 %5447 }
0x1f44   :  { %v8190_v6 = vadd.f32 %v5448_v33, %v5436_v35 }
0x1f46   :  { %v5450_v23 = vmax.f32 %v8190_v6, 0.0 }
0x1f48   :  { %5461 = vperm.xlu0 %6655, %v5450_v23  }
0x1f4c   :  { %6657 = vset.pattern.permute.xlu0 %v6916_v27 }
0x1f4d   :  { %5512 = vperm.xlu0 %6657, %v5483_v54  }
0x1fc7   :  { %v5462_v39 = vpop.permute.xlu0 %5461 }
0x1fc8   :  { %v5480_v40 = vmul.f32 %v5468_v38, %v5462_v39  ;;  %v5482_v56 = vmul.f32 %v5476_v7, %v5462_v39  ;;  %v5481_v5 = vmul.f32 %v5472_v12, %v5462_v39 }
0x1fca   :  { %v5508_v30 = vadd.f32 %v5505_v51, %v5480_v40  ;;  %v5510_v22 = vadd.f32 %v5507_v49, %v5482_v56  ;;  %v5509_v50 = vadd.f32 %v5506_v4, %v5481_v5 }
0x1fcc   :  { %v5513_v55 = vpop.permute.xlu0 %5512 }
0x1fcd   :  { %v5531_v44 = vmul.f32 %v5519_v47, %v5513_v55  ;;  %v5533_v17 = vmul.f32 %v5527_v48, %v5513_v55  ;;  %v5532_v41 = vmul.f32 %v5523_v60, %v5513_v55 }
0x1fcf   :  { %v5534_v37 = vadd.f32 %v5531_v44, %v5508_v30  ;;  %v5536_v63 = vadd.f32 %v5533_v17, %v5510_v22  ;;  %v5535_v11 = vadd.f32 %v5532_v41, %v5509_v50 }
0x1fd1   :  { %v5553_v2 = vadd.f32 %v5541_v36, %v5534_v37  ;;  %v5555_v42 = vadd.f32 %v5549_v24, %v5536_v63  ;;  %v5554_v3 = vadd.f32 %v5545_v0, %v5535_v11 }
0x1fd3   :  { %v5710_v59 = vmul.f32 -1.442695, %v5553_v2  ;;  %v5711_v46 = vmul.f32 -1.442695, %v5555_v42 }
0x1fd5   :  { %6898 = vpow2.f32 %v5710_v59 }
0x1fd6   :  { %6900 = vpow2.f32 %v5711_v46 }
0x1fd7   :  { %6902 = vtanh.f32 %v5554_v3 }
0x1fdf   :  { %v6899_v10 = vpop.eup %6898 }
0x1fe0   :  { %v5559_v15 = vadd.f32 1.0, %v6899_v10  ;;  %v6901_v13 = vpop.eup %6900 }
0x1fe1   :  { %v5566_v19 = vadd.f32 1.0, %v6901_v13  ;;  %v6903_v31 = vpop.eup %6902 }
0x1fe2   :  { %6904 = vrcp.f32 %v5559_v15 }
0x1fe3   :  { %6906 = vrcp.f32 %v5566_v19 }
0x1fec   :  { %v6905_v57 = vpop.eup %6904 }
0x1fed   :  { %v5569_v61 = vmul.f32 %v6905_v57, %v6903_v31  ;;  %v6907_v1 = vpop.eup %6906 }
0x1fef   :  { %6908 = vtanh.f32 %v5569_v61 }
0x1ff9   :  { %v6909_v18 = vpop.eup %6908 }
0x1ffa   :  { %v5571_v14 = vmul.f32 %v6909_v18, %v6907_v1 }
0x1ffc   :  { %v5574_v16 = vmul.f32 %v5572_v8, %v5571_v14 }
0x1ffe   :  { %5575 = vadd.xlane.f32.xlu0 %v5574_v16 }
0x208b   :  { %v5576_v26 = vpop.xlane.xlu0 %5575 }
0x208c   :  { %v5577_v54 = vadd.f32 %v5576_v26, %v5573_v21 }
0x208e   :  { %v5578_v20 = vmul.f32 0.1, %v5577_v54 }
0x2090   :  { %v5579_v28 = vadd.f32 %v5578_v20, %v5450_v23 }
0x2092   :  { %5581 = vst.msk [vmem:[%s8236_s6] sm:$0xff] %vm5580_vm3, %v5579_v28 }

</bundles_post_ra>
